<compile_context>
chip_gen: v7x
topology: tpu7x:2x2x1
jax: 0.10.0
libtpu: 0.0.40
codegen_flags: <defaults>
</compile_context>

<pallas_src>
import functools

import jax
import jax.numpy as jnp
from jax.experimental import pallas as pl
from jax.experimental.pallas import tpu as pltpu


INPUT_DIM = 1280
HIDDEN_DIM = 256
COMPRESSED_DIM = 128
_B1_END = HIDDEN_DIM                          # 256
_B2_END = _B1_END + COMPRESSED_DIM            # 384
_B3_END = _B2_END + HIDDEN_DIM                # 640
_BIAS_PACKED = _B3_END + INPUT_DIM            # 1920 (all slice offsets lane-aligned)


def _ae_kernel(x_ref,
               w1_ref, w2_ref, w3_ref, w4_ref,
               b_ref,
               comp_ref, recon_ref):
    cdt = w1_ref.dtype                      # compute dtype comes from the pre-cast weights
    x = x_ref[...].astype(cdt)              # in-kernel cast (no wrapper HBM round trip)

    # Packed biases along the lane axis; all offsets are multiples of 128.
    b1 = b_ref[:, 0:_B1_END]
    b2 = b_ref[:, _B1_END:_B2_END]
    b3 = b_ref[:, _B2_END:_B3_END]
    b4 = b_ref[:, _B3_END:_BIAS_PACKED]

    # ---- encoder ----
    h1 = jnp.dot(x, w1_ref[...], preferred_element_type=jnp.float32) + b1
    h1 = jnp.maximum(h1, 0.0).astype(cdt)
    comp_f32 = jnp.dot(h1, w2_ref[...], preferred_element_type=jnp.float32) + b2
    comp_ref[...] = comp_f32.astype(comp_ref.dtype)

    # ---- decoder ----
    h2 = jnp.dot(comp_f32.astype(cdt), w3_ref[...],
                 preferred_element_type=jnp.float32) + b3
    h2 = jnp.maximum(h2, 0.0).astype(cdt)
    # Fuse the bias add into the output store; no extra full-size f32 temporary kept live.
    recon_ref[...] = (
        jnp.dot(h2, w4_ref[...], preferred_element_type=jnp.float32) + b4
    ).astype(recon_ref.dtype)


def prepare_params(params, compute_dtype=jnp.bfloat16):
    """One-time conversion: cast weights to the compute dtype, pack biases (f32)."""
    w1, b1, w2, b2, w3, b3, w4, b4 = params
    wc = tuple(w.astype(compute_dtype) for w in (w1, w2, w3, w4))
    b_packed = jnp.concatenate(
        [jnp.reshape(b, (1, -1)).astype(jnp.float32) for b in (b1, b2, b3, b4)],
        axis=-1)
    return wc + (b_packed,)


@functools.partial(jax.jit, static_argnames=("tile_b", "out_dtype"))
def autoencoder_forward(x, prepared, tile_b=256, out_dtype=None):
    """Pallas forward pass. Returns (compressed, reconstructed).

    `prepared` comes from prepare_params(). `out_dtype=None` keeps x.dtype
    outputs (PyTorch semantics); pass jnp.bfloat16 to halve the writeback.
    """
    B, D = x.shape
    assert D == INPUT_DIM
    out_dtype = x.dtype if out_dtype is None else out_dtype

    w1c, w2c, w3c, w4c, b_packed = prepared

    grid = (pl.cdiv(B, tile_b),)   # Pallas masks the partial last block; no pad/slice.

    def resident(arr):
        # grid-invariant block: whole array stays in VMEM across all steps.
        return pl.BlockSpec(arr.shape, lambda i: (0, 0))

    in_specs = [
        pl.BlockSpec((tile_b, INPUT_DIM), lambda i: (i, 0)),     # x tile
        resident(w1c), resident(w2c), resident(w3c), resident(w4c),
        resident(b_packed),
    ]
    out_specs = [
        pl.BlockSpec((tile_b, COMPRESSED_DIM), lambda i: (i, 0)),
        pl.BlockSpec((tile_b, INPUT_DIM), lambda i: (i, 0)),
    ]
    out_shape = [
        jax.ShapeDtypeStruct((B, COMPRESSED_DIM), out_dtype),
        jax.ShapeDtypeStruct((B, INPUT_DIM), out_dtype),
    ]

    x_bytes = x.dtype.itemsize
    w_bytes = w1c.dtype.itemsize
    o_bytes = jnp.dtype(out_dtype).itemsize
    weight_bytes = (sum(int(w.size) for w in (w1c, w2c, w3c, w4c)) * w_bytes
                    + int(b_packed.size) * 4)
    flops = 2 * B * (INPUT_DIM * HIDDEN_DIM + HIDDEN_DIM * COMPRESSED_DIM
                     + COMPRESSED_DIM * HIDDEN_DIM + HIDDEN_DIM * INPUT_DIM)
    bytes_accessed = (B * INPUT_DIM * x_bytes
                      + B * (COMPRESSED_DIM + INPUT_DIM) * o_bytes
                      + weight_bytes)

    comp, recon = pl.pallas_call(
        _ae_kernel,
        grid_spec=pltpu.PrefetchScalarGridSpec(
            num_scalar_prefetch=0,
            grid=grid,
            in_specs=in_specs,
            out_specs=out_specs,
        ),
        out_shape=out_shape,
        compiler_params=pltpu.CompilerParams(
            dimension_semantics=("parallel",),
            vmem_limit_bytes=32 * 1024 * 1024,
        ),
        cost_estimate=pl.CostEstimate(
            flops=flops, transcendentals=0, bytes_accessed=bytes_accessed),
    )(x, w1c, w2c, w3c, w4c, b_packed)

    return comp, recon


def init_params(key):
    """Deterministic init mirroring torch.nn.Linear shapes (stored as (in, out))."""
    def linear(k, fan_in, fan_out):
        kw, kb = jax.random.split(k)
        bound = 1.0 / jnp.sqrt(fan_in)
        w = jax.random.uniform(kw, (fan_in, fan_out), jnp.float32, -bound, bound)
        b = jax.random.uniform(kb, (1, fan_out), jnp.float32, -bound, bound)
        return w, b

    k1, k2, k3, k4 = jax.random.split(key, 4)
    w1, b1 = linear(k1, INPUT_DIM, HIDDEN_DIM)       # encoder Linear(1280, 256)
    w2, b2 = linear(k2, HIDDEN_DIM, COMPRESSED_DIM)  # encoder Linear(256, 128)
    w3, b3 = linear(k3, COMPRESSED_DIM, HIDDEN_DIM)  # decoder Linear(128, 256)
    w4, b4 = linear(k4, HIDDEN_DIM, INPUT_DIM)       # decoder Linear(256, 1280)
    return (w1, b1, w2, b2, w3, b3, w4, b4)


def reference_forward(x, params):
    w1, b1, w2, b2, w3, b3, w4, b4 = params
    h1 = jnp.maximum(x @ w1 + b1, 0.0)
    comp = h1 @ w2 + b2
    h2 = jnp.maximum(comp @ w3 + b3, 0.0)
    recon = h2 @ w4 + b4
    return comp, recon


if __name__ == "__main__":
    key = jax.random.PRNGKey(0)
    kx, kp = jax.random.split(key)

    params = init_params(kp)
    prep_f32 = prepare_params(params, compute_dtype=jnp.float32)
    prep_bf16 = prepare_params(params, compute_dtype=jnp.bfloat16)

    # batch=512, tile_b=64 -> grid=(8,): >=4 pipelined steps per TensorCore on v7x.
    batch = 512
    x = jax.random.normal(kx, (batch, INPUT_DIM), jnp.float32)
    comp_ref, recon_ref = reference_forward(x, params)

    # f32 compute path: tight numerical check against the pure-JAX reference.
    comp32, recon32 = autoencoder_forward(x, prep_f32, tile_b=64)
    jax.block_until_ready((comp32, recon32))
    assert comp32.shape == (batch, COMPRESSED_DIM)
    assert recon32.shape == (batch, INPUT_DIM)
    assert jnp.allclose(comp32, comp_ref, atol=1e-4, rtol=1e-4)
    assert jnp.allclose(recon32, recon_ref, atol=1e-4, rtol=1e-4)

    # bf16 compute + bf16 outputs (fast MXU path, halved HBM traffic): loose check.
    comp16, recon16 = autoencoder_forward(x, prep_bf16, tile_b=64,
                                          out_dtype=jnp.bfloat16)
    jax.block_until_ready((comp16, recon16))
    assert comp16.dtype == jnp.bfloat16 and recon16.dtype == jnp.bfloat16
    assert jnp.allclose(comp16.astype(jnp.float32), comp_ref, atol=4e-2, rtol=4e-2)
    assert jnp.allclose(recon16.astype(jnp.float32), recon_ref, atol=4e-2, rtol=4e-2)

    # Partial last block (B not a multiple of tile_b): cdiv grid, no wrapper pad/slice.
    xp = x[:200]
    comp_p, recon_p = autoencoder_forward(xp, prep_f32, tile_b=64)
    jax.block_until_ready((comp_p, recon_p))
    comp_pr, recon_pr = reference_forward(xp, params)
    assert comp_p.shape == (200, COMPRESSED_DIM)
    assert recon_p.shape == (200, INPUT_DIM)
    assert jnp.allclose(comp_p, comp_pr, atol=1e-4, rtol=1e-4)
    assert jnp.allclose(recon_p, recon_pr, atol=1e-4, rtol=1e-4)

    print("KERNEL_OK")
</pallas_src>

<mosaic_0001>
module attributes {stable_mosaic.version = 11 : i64} {
  func.func @_ae_kernel(%arg0: i32, %arg1: memref<64x1280xf32, #tpu.memory_space<vmem>>, %arg2: memref<1280x256xf32, #tpu.memory_space<vmem>>, %arg3: memref<256x128xf32, #tpu.memory_space<vmem>>, %arg4: memref<128x256xf32, #tpu.memory_space<vmem>>, %arg5: memref<256x1280xf32, #tpu.memory_space<vmem>>, %arg6: memref<1x1920xf32, #tpu.memory_space<vmem>>, %arg7: memref<64x128xf32, #tpu.memory_space<vmem>>, %arg8: memref<64x1280xf32, #tpu.memory_space<vmem>>) attributes {dimension_semantics = [#tpu.dimension_semantics<parallel>], iteration_bounds = array<i64: 8>, scalar_prefetch = 0 : i64, scratch_operands = 0 : i64, tpu.core_type = #tpu.core_type<tc>, window_params = [{transform_indices = @transform_0, window_bounds = array<i64: 64, 1280>}, {pipeline_mode = #tpu.pipeline_mode<synchronous>, transform_indices = @transform_1, window_bounds = array<i64: 1280, 256>}, {pipeline_mode = #tpu.pipeline_mode<synchronous>, transform_indices = @transform_2, window_bounds = array<i64: 256, 128>}, {pipeline_mode = #tpu.pipeline_mode<synchronous>, transform_indices = @transform_3, window_bounds = array<i64: 128, 256>}, {pipeline_mode = #tpu.pipeline_mode<synchronous>, transform_indices = @transform_4, window_bounds = array<i64: 256, 1280>}, {pipeline_mode = #tpu.pipeline_mode<synchronous>, transform_indices = @transform_5, window_bounds = array<i64: 1, 1920>}, {transform_indices = @transform_6, window_bounds = array<i64: 64, 128>}, {transform_indices = @transform_7, window_bounds = array<i64: 64, 1280>}]} {
    %c0 = arith.constant 0 : index
    %c0_0 = arith.constant 0 : index
    %0 = vector.load %arg1[%c0, %c0_0] : memref<64x1280xf32, #tpu.memory_space<vmem>>, vector<64x1280xf32>
    %c0_1 = arith.constant 0 : index
    %c0_2 = arith.constant 0 : index
    %1 = vector.load %arg6[%c0_1, %c0_2] : memref<1x1920xf32, #tpu.memory_space<vmem>>, vector<1x256xf32>
    %c0_3 = arith.constant 0 : index
    %c256 = arith.constant 256 : index
    %2 = vector.load %arg6[%c0_3, %c256] : memref<1x1920xf32, #tpu.memory_space<vmem>>, vector<1x128xf32>
    %c0_4 = arith.constant 0 : index
    %c384 = arith.constant 384 : index
    %3 = vector.load %arg6[%c0_4, %c384] : memref<1x1920xf32, #tpu.memory_space<vmem>>, vector<1x256xf32>
    %c0_5 = arith.constant 0 : index
    %c640 = arith.constant 640 : index
    %4 = vector.load %arg6[%c0_5, %c640] : memref<1x1920xf32, #tpu.memory_space<vmem>>, vector<1x1280xf32>
    %c0_6 = arith.constant 0 : index
    %c0_7 = arith.constant 0 : index
    %5 = vector.load %arg2[%c0_6, %c0_7] : memref<1280x256xf32, #tpu.memory_space<vmem>>, vector<1280x256xf32>
    %cst = arith.constant dense<0.000000e+00> : vector<64x256xf32>
    %6 = tpu.matmul %0, %5, %cst {dimension_numbers = #tpu.dot_dimension_numbers<[1], [0], [0], [1], [0, 0, 1, 1], [], []>} : vector<64x1280xf32>, vector<1280x256xf32>, vector<64x256xf32> -> vector<64x256xf32>
    %7 = vector.broadcast %1 : vector<1x256xf32> to vector<64x256xf32>
    %8 = arith.addf %6, %7 : vector<64x256xf32>
    %cst_8 = arith.constant 0.000000e+00 : f32
    %9 = vector.broadcast %cst_8 : f32 to vector<64x256xf32>
    %10 = arith.maximumf %8, %9 : vector<64x256xf32>
    %c0_9 = arith.constant 0 : index
    %c0_10 = arith.constant 0 : index
    %11 = vector.load %arg3[%c0_9, %c0_10] : memref<256x128xf32, #tpu.memory_space<vmem>>, vector<256x128xf32>
    %cst_11 = arith.constant dense<0.000000e+00> : vector<64x128xf32>
    %12 = tpu.matmul %10, %11, %cst_11 {dimension_numbers = #tpu.dot_dimension_numbers<[1], [0], [0], [1], [0, 0, 1, 1], [], []>} : vector<64x256xf32>, vector<256x128xf32>, vector<64x128xf32> -> vector<64x128xf32>
    %13 = vector.broadcast %2 : vector<1x128xf32> to vector<64x128xf32>
    %14 = arith.addf %12, %13 : vector<64x128xf32>
    %c0_12 = arith.constant 0 : index
    %c0_13 = arith.constant 0 : index
    %15 = vector.load %arg7[%c0_12, %c0_13] : memref<64x128xf32, #tpu.memory_space<vmem>>, vector<64x128xf32>
    tpu.vector_store %arg7[%c0_12, %c0_13], %14 {strides = array<i32>} : memref<64x128xf32, #tpu.memory_space<vmem>>, vector<64x128xf32>,
    %c0_14 = arith.constant 0 : index
    %c0_15 = arith.constant 0 : index
    %16 = vector.load %arg4[%c0_14, %c0_15] : memref<128x256xf32, #tpu.memory_space<vmem>>, vector<128x256xf32>
    %cst_16 = arith.constant dense<0.000000e+00> : vector<64x256xf32>
    %17 = tpu.matmul %14, %16, %cst_16 {dimension_numbers = #tpu.dot_dimension_numbers<[1], [0], [0], [1], [0, 0, 1, 1], [], []>} : vector<64x128xf32>, vector<128x256xf32>, vector<64x256xf32> -> vector<64x256xf32>
    %18 = vector.broadcast %3 : vector<1x256xf32> to vector<64x256xf32>
    %19 = arith.addf %17, %18 : vector<64x256xf32>
    %cst_17 = arith.constant 0.000000e+00 : f32
    %20 = vector.broadcast %cst_17 : f32 to vector<64x256xf32>
    %21 = arith.maximumf %19, %20 : vector<64x256xf32>
    %c0_18 = arith.constant 0 : index
    %c0_19 = arith.constant 0 : index
    %22 = vector.load %arg5[%c0_18, %c0_19] : memref<256x1280xf32, #tpu.memory_space<vmem>>, vector<256x1280xf32>
    %cst_20 = arith.constant dense<0.000000e+00> : vector<64x1280xf32>
    %23 = tpu.matmul %21, %22, %cst_20 {dimension_numbers = #tpu.dot_dimension_numbers<[1], [0], [0], [1], [0, 0, 1, 1], [], []>} : vector<64x256xf32>, vector<256x1280xf32>, vector<64x1280xf32> -> vector<64x1280xf32>
    %24 = vector.broadcast %4 : vector<1x1280xf32> to vector<64x1280xf32>
    %25 = arith.addf %23, %24 : vector<64x1280xf32>
    %c0_21 = arith.constant 0 : index
    %c0_22 = arith.constant 0 : index
    %26 = vector.load %arg8[%c0_21, %c0_22] : memref<64x1280xf32, #tpu.memory_space<vmem>>, vector<64x1280xf32>
    tpu.vector_store %arg8[%c0_21, %c0_22], %25 {strides = array<i32>} : memref<64x1280xf32, #tpu.memory_space<vmem>>, vector<64x1280xf32>,
    return
  }
  func.func @transform_0(%arg0: i32) -> (i32, i32) {
    %c0_i32 = arith.constant 0 : i32
    %c0_i32_0 = arith.constant 0 : i32
    return %arg0, %c0_i32 : i32, i32
  }
  func.func @transform_1(%arg0: i32) -> (i32, i32) {
    %c0_i32 = arith.constant 0 : i32
    %c0_i32_0 = arith.constant 0 : i32
    %c0_i32_1 = arith.constant 0 : i32
    return %c0_i32, %c0_i32_0 : i32, i32
  }
  func.func @transform_2(%arg0: i32) -> (i32, i32) {
    %c0_i32 = arith.constant 0 : i32
    %c0_i32_0 = arith.constant 0 : i32
    %c0_i32_1 = arith.constant 0 : i32
    return %c0_i32, %c0_i32_0 : i32, i32
  }
  func.func @transform_3(%arg0: i32) -> (i32, i32) {
    %c0_i32 = arith.constant 0 : i32
    %c0_i32_0 = arith.constant 0 : i32
    %c0_i32_1 = arith.constant 0 : i32
    return %c0_i32, %c0_i32_0 : i32, i32
  }
  func.func @transform_4(%arg0: i32) -> (i32, i32) {
    %c0_i32 = arith.constant 0 : i32
    %c0_i32_0 = arith.constant 0 : i32
    %c0_i32_1 = arith.constant 0 : i32
    return %c0_i32, %c0_i32_0 : i32, i32
  }
  func.func @transform_5(%arg0: i32) -> (i32, i32) {
    %c0_i32 = arith.constant 0 : i32
    %c0_i32_0 = arith.constant 0 : i32
    %c0_i32_1 = arith.constant 0 : i32
    return %c0_i32, %c0_i32_0 : i32, i32
  }
  func.func @transform_6(%arg0: i32) -> (i32, i32) {
    %c0_i32 = arith.constant 0 : i32
    %c0_i32_0 = arith.constant 0 : i32
    return %arg0, %c0_i32 : i32, i32
  }
  func.func @transform_7(%arg0: i32) -> (i32, i32) {
    %c0_i32 = arith.constant 0 : i32
    %c0_i32_0 = arith.constant 0 : i32
    return %arg0, %c0_i32 : i32, i32
  }
}

</mosaic_0001>

<bundles_post_ra>
// kernel: autoencoder_forward.1
= control target key start
LH: loop header
LB: loop body
LE: loop exit
PB: predicated region body
PF: predicated region fallthrough
CT: control target
= control target key end

     0   :  { %s5175_s0 = inlined_call_operand.hbm [shape: f32[512,1280], index: 0, kind: input, shape index: {}]   ;;  %s5176_s1 = inlined_call_operand.hbm [shape: f32[1280,256], index: 1, kind: input, shape index: {}]   ;;  %s5177_s2 = inlined_call_operand.hbm [shape: f32[256,128], index: 2, kind: input, shape index: {}]   ;;  %s5178_s3 = inlined_call_operand.hbm [shape: f32[128,256], index: 3, kind: input, shape index: {}]   ;;  %s5179_s4 = inlined_call_operand.hbm [shape: f32[256,1280], index: 4, kind: input, shape index: {}]   ;;  %s5180_s5 = inlined_call_operand.hbm [shape: f32[1,1920], index: 5, kind: input, shape index: {}]   ;;  %s5181_s6 = inlined_call_operand.hbm [shape: f32[512,128], index: 6, kind: output, shape index: {0}]   ;;  %s5182_s7 = inlined_call_operand.hbm [shape: f32[512,1280], index: 7, kind: output, shape index: {1}]  }
   0x1   :  { %5196 = sst [smem:[#allocation29_spill]] %s5176_s1 }
   0x2   :  { %13 = vsyncpa [#allocation3], 0 }
   0x3   :  { %15 = vsyncpa [#allocation3 + $0x1], 0 }
   0x4   :  { %16 = vsyncpa [#allocation6], 0 }
   0x5   :  { %17 = vsyncpa [#allocation9], 0 }
   0x6   :  { %18 = vsyncpa [#allocation12], 0 }
   0x7   :  { %19 = vsyncpa [#allocation4], 0 }
   0x8   :  { %21 = vsyncpa [#allocation4 + $0x1], 0 }
   0x9   :  { %22 = vsyncpa [#allocation15], 0 }
   0xa   :  { %24 = vsyncpa [#allocation15 + $0x1], 0  ;;  %s4267_s24 = smov 0   ;;  %s4269_s25 = smov 0  }
   0xb   :  { %s4271_s26 = smov 0   ;;  %s4273_s27 = smov 0  }
   0xc LB: > { %s4208_s28 = smov [#allocation5]   ;;  %s4288_s30 = sadd.s32 4294967295, %s4206_s27   ;;  %s4206_s27 = sphi %s4273_s27, %s5234_s27   ;;  %s4202_s26 = sphi %s4271_s26, %s5233_s26   ;;  %s4198_s25 = sphi %s4269_s25, %s5232_s25   ;;  %s4194_s24 = sphi %s4267_s24, %s5231_s24  }
   0xd   : > { %s230_s29 = sshll.u32 %s4208_s28, 4  ;;  %p2910_p0 = scmp.ge.s32.totalorder %s4206_s27, 1  ;;  %s4293_s29 = int_to_ptr.vmem [resolvable:$true] %s230_s29 }
   0xe   : > { %p5183_p1 = scmp.eq.s32.totalorder %s4288_s30, 0  ;;  %p218_p2 = scmp.lt.s32.totalorder %s4206_s27, 9 }
   0xf   : > { %s4209_s9 = smov [#allocation8]   ;;  %s4210_s12 = smov [#allocation7]  }
  0x10   : > { %p4295_p3 = pnand %p2910_p0, %p218_p2  ;;  %s256_s10 = sshll.u32 %s4209_s9, 4  ;;  %s4307_s10 = int_to_ptr.vmem [resolvable:$true] %s256_s10 }
  0x11   : > { %s243_s13 = sshll.u32 %s4210_s12, 4  ;;  %s5199_s1 = sld [smem:[#allocation29_spill]]  ;;  %s4309_s13 = int_to_ptr.vmem [resolvable:$true] %s243_s13 }
  0x12   : > { %s5197_s8 = scalar_select %p4295_p3, 1, 0 }
  0x13   : > { %p3839_p4 = pneg %p4295_p3 }
  0x15   : > { %p4303_p5 = pnand %p3839_p4, %p5183_p1 }
  0x17   : > { %s3926_s16 = scalar_lea.hbm %s5199_s1, 40960  ;;  %p4319_p7 = pneg %p4303_p5 }
  0x18   : > { %p3927_p6 = scmp.ne.s32.totalorder %s5199_s1, %s3926_s16  ;;  %p3933_p10 = scmp.lt.u32.totalorder %s3926_s16, %s5199_s1 }
  0x1a   : > { %p3929_p8 = pnand %p4319_p7, %p3927_p6 }
  0x1c   : > { %p3930_p9 = pneg %p3929_p8 }
  0x1e   : > { %p3935_p11 = pnand %p3933_p10, %p3930_p9 }
  0x20   : > { %3938 = shalt.err (!%p3935_p11)
}
  0x21   : > { %s3939_s22 = scalar_lea.vmem %s4293_s29, 40960  ;;  %p3947_p2 = scmp.lt.s32.totalorder %s4293_s29, %s4293_s29 }
  0x22   : > { %p3940_p12 = scmp.ne.s32.totalorder %s4293_s29, %s3939_s22  ;;  %p3948_p4 = scmp.lt.s32.totalorder %s3939_s22, %s3939_s22 }
  0x24   : > { %p3942_p13 = pnand %p3940_p12, %p4319_p7  ;;  %p3949_p6 = por %p3948_p4, %p3947_p2 }
  0x26   : > { %p3943_p0 = pneg %p3942_p13 }
  0x28   : > { %p3950_p8 = pnand %p3949_p6, %p3943_p0 }
  0x2a   : > { %3953 = shalt.err (!%p3950_p8)
}
  0x2b   : > { %s4211_s23 = smov 256   ;;  %s4212_s28 = smov 16  }
  0x2c   : > { %3842 = dma.hbm_to_vmem [thread:$0]  (!%p4303_p5), %s5199_s1, 40960, %s4293_s29, [#allocation6], %s4211_s23, %s4211_s23, %s4212_s28  }
  0x2d   : > { %s3954_s16 = scalar_lea.hbm %s5178_s3, 4096 }
  0x2e   : > { %p3955_p9 = scmp.ne.s32.totalorder %s5178_s3, %s3954_s16  ;;  %p3961_p12 = scmp.lt.u32.totalorder %s3954_s16, %s5178_s3 }
  0x30   : > { %p3957_p10 = pnand %p3955_p9, %p4319_p7 }
  0x32   : > { %p3958_p11 = pneg %p3957_p10 }
  0x34   : > { %p3963_p13 = pnand %p3961_p12, %p3958_p11 }
  0x36   : > { %3966 = shalt.err (!%p3963_p13)
}
  0x37   : > { %s3967_s29 = scalar_lea.vmem %s4307_s10, 4096  ;;  %p3975_p6 = scmp.lt.s32.totalorder %s4307_s10, %s4307_s10 }
  0x38   : > { %p3968_p0 = scmp.ne.s32.totalorder %s4307_s10, %s3967_s29  ;;  %p3976_p8 = scmp.lt.s32.totalorder %s3967_s29, %s3967_s29 }
  0x3a   : > { %p3970_p2 = pnand %p3968_p0, %p4319_p7  ;;  %p3977_p9 = por %p3976_p8, %p3975_p6 }
  0x3c   : > { %p3971_p4 = pneg %p3970_p2 }
  0x3e   : > { %p3978_p10 = pnand %p3977_p9, %p3971_p4 }
  0x40   : > { %3981 = shalt.err (!%p3978_p10)
}
  0x41   : > { %3848 = dma.hbm_to_vmem [thread:$0]  (!%p4303_p5), %s5178_s3, 4096, %s4307_s10, [#allocation9], %s4211_s23, %s4211_s23, %s4212_s28  }
  0x42   : > { %s3982_s15 = scalar_lea.hbm %s5177_s2, 4096 }
  0x43   : > { %p3983_p11 = scmp.ne.s32.totalorder %s5177_s2, %s3982_s15  ;;  %p3989_p0 = scmp.lt.u32.totalorder %s3982_s15, %s5177_s2 }
  0x45   : > { %p3985_p12 = pnand %p3983_p11, %p4319_p7 }
  0x47   : > { %p3986_p13 = pneg %p3985_p12 }
  0x49   : > { %p3991_p2 = pnand %p3989_p0, %p3986_p13 }
  0x4b   : > { %3994 = shalt.err (!%p3991_p2)
}
  0x4c   : > { %s3995_s10 = scalar_lea.vmem %s4309_s13, 4096  ;;  %p4003_p9 = scmp.lt.s32.totalorder %s4309_s13, %s4309_s13 }
  0x4d   : > { %p3996_p4 = scmp.ne.s32.totalorder %s4309_s13, %s3995_s10  ;;  %p4004_p10 = scmp.lt.s32.totalorder %s3995_s10, %s3995_s10 }
  0x4f   : > { %p3998_p6 = pnand %p3996_p4, %p4319_p7  ;;  %p4005_p11 = por %p4004_p10, %p4003_p9 }
  0x51   : > { %p3999_p8 = pneg %p3998_p6 }
  0x53   : > { %p4006_p12 = pnand %p4005_p11, %p3999_p8 }
  0x55   : > { %4009 = shalt.err (!%p4006_p12)
}
  0x56   : > { %s4213_s23 = smov 128   ;;  %s4214_s28 = smov 8  }
  0x57   : > { %3845 = dma.hbm_to_vmem [thread:$0]  (!%p4303_p5), %s5177_s2, 4096, %s4309_s13, [#allocation6], %s4213_s23, %s4213_s23, %s4214_s28  }
  0x58   : > { %s4215_s22 = smov [#allocation10]   ;;  %s4010_s15 = scalar_lea.hbm %s5179_s4, 40960 }
  0x59   : > { %s269_s9 = sshll.u32 %s4215_s22, 4  ;;  %p4011_p13 = scmp.ne.s32.totalorder %s5179_s4, %s4010_s15  ;;  %s270_s9 = int_to_ptr.vmem [resolvable:$true] %s269_s9 }
  0x5a   : > { %p4017_p4 = scmp.lt.u32.totalorder %s4010_s15, %s5179_s4 }
  0x5b   : > { %p4013_p0 = pnand %p4011_p13, %p4319_p7 }
  0x5d   : > { %p4014_p2 = pneg %p4013_p0 }
  0x5f   : > { %p4019_p6 = pnand %p4017_p4, %p4014_p2 }
  0x61   : > { %4022 = shalt.err (!%p4019_p6)
}
  0x62   : > { %s4023_s13 = scalar_lea.vmem %s270_s9, 40960  ;;  %p4031_p11 = scmp.lt.s32.totalorder %s270_s9, %s270_s9 }
  0x63   : > { %p4024_p8 = scmp.ne.s32.totalorder %s270_s9, %s4023_s13  ;;  %p4032_p12 = scmp.lt.s32.totalorder %s4023_s13, %s4023_s13 }
  0x65   : > { %p4026_p9 = pnand %p4024_p8, %p4319_p7  ;;  %p4033_p1 = por %p4032_p12, %p4031_p11 }
  0x67   : > { %p4027_p10 = pneg %p4026_p9 }
  0x69   : > { %p4034_p3 = pnand %p4033_p1, %p4027_p10 }
  0x6b   : > { %4037 = shalt.err (!%p4034_p3)
}
  0x6c   : > { %s5185_s10 = smov 1280   ;;  %s5186_s23 = smov 80  }
  0x6d   : > { %3851 = dma.hbm_to_vmem [thread:$0]  (!%p4303_p5), %s5179_s4, 40960, %s270_s9, [#allocation9], %s5185_s10, %s5185_s10, %s5186_s23  }
  0x6e   : > { %s4218_s29 = smov [#allocation11]   ;;  %s4038_s15 = scalar_lea.hbm %s5180_s5, 240 }
  0x6f   : > { %s283_s22 = sshll.u32 %s4218_s29, 4  ;;  %p4039_p1 = scmp.ne.s32.totalorder %s5180_s5, %s4038_s15  ;;  %s284_s22 = int_to_ptr.vmem [resolvable:$true] %s283_s22 }
  0x70   : > { %p4045_p0 = scmp.lt.u32.totalorder %s4038_s15, %s5180_s5 }
  0x71   : > { %p4041_p3 = pnand %p4039_p1, %p4319_p7 }
  0x73   : > { %p4042_p13 = pneg %p4041_p3 }
  0x75   : > { %p4047_p2 = pnand %p4045_p0, %p4042_p13 }
  0x77   : > { %4050 = shalt.err (!%p4047_p2)
}
  0x78   : > { %s4051_s9 = scalar_lea.vmem %s284_s22, 240  ;;  %s4058_s13 = scalar_lea.vmem %s284_s22, 256 }
  0x79   : > { %p4052_p4 = scmp.ne.s32.totalorder %s284_s22, %s4051_s9  ;;  %p4059_p9 = scmp.lt.s32.totalorder %s284_s22, %s284_s22 }
  0x7a   : > { %p4060_p10 = scmp.lt.s32.totalorder %s4058_s13, %s4051_s9 }
  0x7b   : > { %p4054_p6 = pnand %p4052_p4, %p4319_p7 }
  0x7c   : > { %p4061_p11 = por %p4060_p10, %p4059_p9 }
  0x7d   : > { %p4055_p8 = pneg %p4054_p6 }
  0x7f   : > { %p4062_p12 = pnand %p4061_p11, %p4055_p8 }
  0x81   : > { %4065 = shalt.err (!%p4062_p12)
}
  0x82   : > { %3854 = dma.hbm_to_vmem [thread:$0]  (!%p4303_p5), %s5180_s5, 240, %s284_s22, [#allocation12]  }
  0x83   : > { %s2909_s19 = sadd.s32 4294967294, %s4206_s27   ;;  %s4427_s11 = sadd.s32 1, %s4206_s27  }
  0x84   : > { %s37_s29 = sadd.s32 1, %s4202_s26  ;;  %s34_s12 = ssub.s32 %s4206_s27, %s4427_s11 }
  0x85   : > { %p44_p7 = scmp.ne.s32.totalorder %s4202_s26, %s4198_s25  ;;  %p35_p1 = scmp.eq.s32.totalorder %s34_s12, 0 }
  0x86   : > { %p45_p3 = scmp.eq.s32.totalorder %s4206_s27, 0  ;;  %p50_p13 = scmp.ne.s32.totalorder %s4198_s25, %s4194_s24 }
  0x87   : > { %p179_p0 = scmp.eq.s32.totalorder %s4288_s30, 7  ;;  %p5201_p4 = scmp.eq.s32.totalorder %s4288_s30, 0 }
  0x88   : > { %s4439_s14 = scalar_select %p35_p1, %s4202_s26, %s37_s29  }
  0x89   : > { %p46_p2 = por %p45_p3, %p44_p7  ;;  %p4443_p6 = por %p5201_p4, %p50_p13 }
  0x8a   : > { %p4447_p5 = por %p179_p0, %p44_p7  ;;  %p185_p8 = scmp.eq.s32.totalorder %s2909_s19, 7 }
  0x8b   : > { %p3871_p9 = scmp.lt.s32.totalorder %s4206_s27, 8  ;;  %s294_s16 = sand.u32 1, %s4202_s26  }
  0x8c   : > { %s5203_s22 = scalar_select %p4447_p5, 1, 0 }
  0x8d   : > { %p4453_p10 = por %p185_p8, %p50_p13  ;;  %s3809_s18 = smul.u32 640, %s294_s16 }
  0x8e   : > { %p4457_p11 = pnand %p3871_p9, %p46_p2  ;;  %s3810_s9 = smul.u32 10240, %s4206_s27 }
  0x8f   : > { %s5204_s17 = scalar_select %p4453_p10, 1, 0 }
  0x90   : > { %s4465_s21 = scalar_lea.hbm %s5175_s0, %s3810_s9  ;;  %s298_s19 = scalar_lea.vmem [#allocation2], %s3809_s18 }
  0x91   : > { %s306_s29 = sshll.u32 %s298_s19, 4  ;;  %s4469_s12 = scalar_lea.sflag [#allocation3], %s294_s16  ;;  %s4467_s29 = int_to_ptr.vmem [resolvable:$true] %s306_s29 }
  0x92   : > { %s4066_s10 = scalar_lea.hbm %s4465_s21, 10240  ;;  %p4068_p7 = pneg %p4457_p11 }
  0x93   : > { %p4067_p12 = scmp.ne.s32.totalorder %s4465_s21, %s4066_s10  ;;  %s4071_s28 = scalar_lea.hbm %s5175_s0, 81920 }
  0x94   : > { %p4072_p13 = scmp.lt.u32.totalorder %s4465_s21, %s5175_s0  ;;  %p4073_p0 = scmp.lt.u32.totalorder %s4071_s28, %s4066_s10 }
  0x95   : > { %p4069_p1 = pnand %p4068_p7, %p4067_p12  ;;  %p4075_p4 = scmp.lt.u32.totalorder %s4066_s10, %s4465_s21 }
  0x96   : > { %p4074_p2 = por %p4073_p0, %p4072_p13 }
  0x97   : > { %p4070_p3 = pneg %p4069_p1 }
  0x98   : > { %p4076_p8 = por %p4075_p4, %p4074_p2 }
  0x9a   : > { %p4077_p9 = pnand %p4076_p8, %p4070_p3 }
  0x9c   : > { %4080 = shalt.err (!%p4077_p9)
}
  0x9d   : > { %s4081_s16 = scalar_lea.vmem %s4467_s29, 10240  ;;  %s4219_s18 = smov [#allocation2]  }
  0x9e   : > { %p4082_p12 = scmp.ne.s32.totalorder %s4467_s29, %s4081_s16  ;;  %s4086_s19 = sshll.u32 %s4219_s18, 4  ;;  %s4087_s19 = int_to_ptr.vmem [resolvable:$false] %s4086_s19 }
  0x9f   : > { %s4088_s1 = scalar_lea.vmem %s4087_s19, 20480  ;;  %p4089_p5 = scmp.lt.s32.totalorder %s4467_s29, %s4087_s19 }
  0xa0   : > { %p4084_p1 = pnand %p4082_p12, %p4068_p7  ;;  %p4090_p13 = scmp.lt.s32.totalorder %s4088_s1, %s4081_s16 }
  0xa2   : > { %p4085_p10 = pneg %p4084_p1  ;;  %p4091_p0 = por %p4090_p13, %p4089_p5 }
  0xa4   : > { %p4092_p2 = pnand %p4091_p0, %p4085_p10 }
  0xa6   : > { %4095 = shalt.err (!%p4092_p2)
}
  0xa7   : > { %s5206_s10 = smov 80   ;;  %s5207_s23 = smov 1280  }
  0xa8   : > { %3858 = dma.hbm_to_vmem [thread:$0]  (!%p4457_p11), %s4465_s21, 10240, %s4467_s29, %s4469_s12, %s5207_s23, %s5207_s23, %s5206_s10  }
  0xa9   : > { %p5208_p7 = scmp.ne.s32.totalorder %s5197_s8, 0 }
  0xab   : > { %318 = sbr.rel (%p5208_p7) target bundleno = 1667 (0x683), region = 44 }
  0xb2   : > { %s4503_s9 = sand.u32 1, %s4198_s25  }
  0xb3   : > { %s3811_s13 = smul.u32 640, %s4503_s9  ;;  %s321_s28 = scalar_lea.sflag [#allocation3], %s4503_s9 }
  0xb5   : > { %s4509_s20 = scalar_lea.vmem [#allocation2], %s3811_s13 }
  0xb6   : > { %4169 = dma.done.wait (%p4443_p6), %s321_s28, 10240  }
  0xb7   : > { %4171 = vsyncadd (%p4443_p6), %s321_s28, 4294957056  ;;  %p5209_p5 = scmp.eq.s32.totalorder %s4288_s30, 0 }
  0xb9   : > { %4173 = dma.done.wait (%p5209_p5), [#allocation6], 45056   ;;  %p5210_p10 = pmov %p5209_p5 }
  0xba   : > { %p5211_p11 = pmov %p5209_p5 }
  0xbb   : > { %4175 = vsyncadd (%p5210_p10), [#allocation6], 4294922240 }
  0xbc   : > { %4177 = dma.done.wait (%p5211_p11), [#allocation9], 45056   ;;  %p5212_p3 = pmov %p5209_p5 }
  0xbe   : > { %4179 = vsyncadd (%p5212_p3), [#allocation9], 4294922240  ;;  %p5213_p4 = pmov %p5212_p3 }
  0xbf   : > { %p5214_p8 = pmov %p5212_p3 }
  0xc0   : > { %4181 = dma.done.wait (%p5213_p4), [#allocation12], 240  }
  0xc1   : > { %4183 = vsyncadd (%p5214_p8), [#allocation12], 4294967056  ;;  %v469_v0 = vld [vmem:[#allocation5 + $0x8] sm:$0xff]  ;;  %v471_v1 = vld [vmem:[#allocation5 + $0x18] sm:$0xff]  ;;  %s2926_s8 = sshll.u32 %s4503_s9, 6  ;;  %s4919_s21 = scalar_lea.vmem [#allocation14], %s3811_s13 }
  0xc2   : > { %v468_v2 = vld [vmem:[#allocation5] sm:$0xff]  ;;  %v2993_v3 = vpack.c.bf16 %v471_v1, %v469_v0  ;;  %v470_v4 = vld [vmem:[#allocation5 + $0x10] sm:$0xff]  ;;  %v473_v5 = vld [vmem:[#allocation5 + $0x28] sm:$0xff]  ;;  %s4729_s15 = scalar_lea.vmem [#allocation13], %s2926_s8  ;;  %s2936_s12 = sshll.u32 %s4288_s30, 10 }
  0xc3   : > { %v475_v6 = vld [vmem:[#allocation5 + $0x38] sm:$0xff]  ;;  %v2995_v7 = vpack.c.bf16 %v470_v4, %v468_v2  ;;  %v472_v9 = vld [vmem:[#allocation5 + $0x20] sm:$0xff]  ;;  %v474_v10 = vld [vmem:[#allocation5 + $0x30] sm:$0xff]  ;;  %s2739_s29 = sshll.u32 %s4729_s15, 4  ;;  %s5047_s19 = scalar_lea.hbm %s5181_s6, %s2936_s12  ;;  %s5039_s29 = int_to_ptr.vmem [resolvable:$true] %s2739_s29 }
  0xc4   : > { %v2997_v8 = vpack.c.bf16 %v475_v6, %v473_v5  ;;  %v477_v11 = vld [vmem:[#allocation5 + $0x48] sm:$0xff]  ;;  %2994 = vmatprep.subr.bf16.mxu0 %v2993_v3  ;;  %v479_v12 = vld [vmem:[#allocation5 + $0x58] sm:$0xff]  ;;  %v2999_v13 = vpack.c.bf16 %v474_v10, %v472_v9  ;;  %v476_v15 = vld [vmem:[#allocation5 + $0x40] sm:$0xff]  ;;  %s2721_s1 = scalar_lea.sflag [#allocation4], %s4503_s9  ;;  %s4096_s10 = scalar_lea.vmem %s5039_s29, 1024 }
  0xc5   : > { %2996 = vmatpush1.bf16.msra.mxu0 %v2995_v7  ;;  %v3001_v14 = vpack.c.bf16 %v479_v12, %v477_v11  ;;  %v478_v16 = vld [vmem:[#allocation5 + $0x50] sm:$0xff]  ;;  %v481_v17 = vld [vmem:[#allocation5 + $0x68] sm:$0xff]  ;;  %v483_v18 = vld [vmem:[#allocation5 + $0x78] sm:$0xff]  ;;  %p4097_p6 = scmp.ne.s32.totalorder %s5039_s29, %s4096_s10  ;;  %p5229_p9 = scmp.ne.s32.totalorder %s5203_s22, 0 }
  0xc6   : > { %2998 = vmatprep.subr.bf16.mxu0 %v2997_v8  ;;  %v3003_v19 = vpack.c.bf16 %v478_v16, %v476_v15  ;;  %v3005_v20 = vpack.c.bf16 %v483_v18, %v481_v17  ;;  %v480_v21 = vld [vmem:[#allocation5 + $0x60] sm:$0xff]  ;;  %v482_v22 = vld [vmem:[#allocation5 + $0x70] sm:$0xff]  ;;  %v485_v23 = vld [vmem:[#allocation5 + $0x88] sm:$0xff]  ;;  %s4221_s23 = smov [#allocation13]  }
  0xc7   : > { %v487_v24 = vld [vmem:[#allocation5 + $0x98] sm:$0xff]  ;;  %v3007_v25 = vpack.c.bf16 %v482_v22, %v480_v21  ;;  %v484_v27 = vld [vmem:[#allocation5 + $0x80] sm:$0xff]  ;;  %v486_v28 = vld [vmem:[#allocation5 + $0x90] sm:$0xff]  ;;  %p4098_p12 = pnand %p4097_p6, %p5229_p9  ;;  %s4100_s13 = sshll.u32 %s4221_s23, 4  ;;  %s4101_s13 = int_to_ptr.vmem [resolvable:$false] %s4100_s13 }
  0xc8   : > { %v3009_v26 = vpack.c.bf16 %v487_v24, %v485_v23  ;;  %v489_v29 = vld [vmem:[#allocation5 + $0xa8] sm:$0xff]  ;;  %v491_v30 = vld [vmem:[#allocation5 + $0xb8] sm:$0xff]  ;;  %v3011_v31 = vpack.c.bf16 %v486_v28, %v484_v27  ;;  %v488_v33 = vld [vmem:[#allocation5 + $0xa0] sm:$0xff]  ;;  %s4102_s28 = scalar_lea.vmem %s4101_s13, 2048  ;;  %p4103_p13 = scmp.lt.s32.totalorder %s5039_s29, %s4101_s13 }
  0xc9   : > { %3000 = vmatpush1.bf16.msra.mxu0 %v2999_v13  ;;  %v3013_v32 = vpack.c.bf16 %v491_v30, %v489_v29  ;;  %v490_v34 = vld [vmem:[#allocation5 + $0xb0] sm:$0xff]  ;;  %v493_v35 = vld [vmem:[#allocation5 + $0xc8] sm:$0xff]  ;;  %v495_v36 = vld [vmem:[#allocation5 + $0xd8] sm:$0xff]  ;;  %p4099_p1 = pneg %p4098_p12  ;;  %p4104_p0 = scmp.lt.s32.totalorder %s4102_s28, %s4096_s10 }
  0xca   : > { %3002 = vmatprep.subr.bf16.mxu0 %v3001_v14  ;;  %v3015_v37 = vpack.c.bf16 %v490_v34, %v488_v33  ;;  %v3017_v38 = vpack.c.bf16 %v495_v36, %v493_v35  ;;  %v492_v39 = vld [vmem:[#allocation5 + $0xc0] sm:$0xff]  ;;  %v494_v40 = vld [vmem:[#allocation5 + $0xd0] sm:$0xff]  ;;  %v384_v41 = vld [vmem:[%s4509_s20 + $0x8] sm:$0xff] }
  0xcb   : > { %v497_v42 = vld [vmem:[#allocation5 + $0xe8] sm:$0xff]  ;;  %v499_v43 = vld [vmem:[#allocation5 + $0xf8] sm:$0xff]  ;;  %863 = vmatprep.mubr.f32.mxu0 %v384_v41  ;;  %v3019_v44 = vpack.c.bf16 %v494_v40, %v492_v39  ;;  %v496_v46 = vld [vmem:[#allocation5 + $0xe0] sm:$0xff]  ;;  %p4105_p2 = por %p4104_p0, %p4103_p13 }
  0xcc   : > { %v3021_v45 = vpack.c.bf16 %v499_v43, %v497_v42  ;;  %v498_v47 = vld [vmem:[#allocation5 + $0xf0] sm:$0xff]  ;;  %v501_v48 = vld [vmem:[#allocation5 + $0x108] sm:$0xff]  ;;  %v503_v49 = vld [vmem:[#allocation5 + $0x118] sm:$0xff] }
  0xcd   : > { %3004 = vmatpush1.bf16.msra.mxu0 %v3003_v19  ;;  %v3023_v50 = vpack.c.bf16 %v498_v47, %v496_v46  ;;  %v3025_v51 = vpack.c.bf16 %v503_v49, %v501_v48  ;;  %v500_v52 = vld [vmem:[#allocation5 + $0x100] sm:$0xff]  ;;  %v502_v53 = vld [vmem:[#allocation5 + $0x110] sm:$0xff]  ;;  %v505_v54 = vld [vmem:[#allocation5 + $0x128] sm:$0xff]  ;;  %p4106_p7 = pnand %p4105_p2, %p4099_p1 }
  0xce   : > { %3006 = vmatprep.subr.bf16.mxu0 %v3005_v20  ;;  %v507_v55 = vld [vmem:[#allocation5 + $0x138] sm:$0xff]  ;;  %v3027_v56 = vpack.c.bf16 %v502_v53, %v500_v52  ;;  %v504_v58 = vld [vmem:[#allocation5 + $0x120] sm:$0xff]  ;;  %v506_v59 = vld [vmem:[#allocation5 + $0x130] sm:$0xff] }
  0xcf   : > { %v3029_v57 = vpack.c.bf16 %v507_v55, %v505_v54  ;;  %v509_v60 = vld [vmem:[#allocation5 + $0x148] sm:$0xff]  ;;  %v511_v61 = vld [vmem:[#allocation5 + $0x158] sm:$0xff]  ;;  %v3031_v62 = vpack.c.bf16 %v506_v59, %v504_v58  ;;  %v508_v0 = vld [vmem:[#allocation5 + $0x140] sm:$0xff] }
  0xd0   : > { %v3033_v63 = vpack.c.bf16 %v511_v61, %v509_v60  ;;  %v510_v1 = vld [vmem:[#allocation5 + $0x150] sm:$0xff]  ;;  %v513_v2 = vld [vmem:[#allocation5 + $0x168] sm:$0xff]  ;;  %v515_v3 = vld [vmem:[#allocation5 + $0x178] sm:$0xff] }
  0xd1   : > { %3008 = vmatpush1.bf16.msra.mxu0 %v3007_v25  ;;  %v3035_v4 = vpack.c.bf16 %v510_v1, %v508_v0  ;;  %v3037_v5 = vpack.c.bf16 %v515_v3, %v513_v2  ;;  %v512_v6 = vld [vmem:[#allocation5 + $0x160] sm:$0xff]  ;;  %v514_v7 = vld [vmem:[#allocation5 + $0x170] sm:$0xff]  ;;  %v517_v8 = vld [vmem:[#allocation5 + $0x188] sm:$0xff] }
  0xd2   : > { %3010 = vmatprep.subr.bf16.mxu0 %v3009_v26  ;;  %v519_v9 = vld [vmem:[#allocation5 + $0x198] sm:$0xff]  ;;  %v3039_v10 = vpack.c.bf16 %v514_v7, %v512_v6  ;;  %v516_v12 = vld [vmem:[#allocation5 + $0x180] sm:$0xff]  ;;  %v518_v13 = vld [vmem:[#allocation5 + $0x190] sm:$0xff] }
  0xd3   : > { %v3041_v11 = vpack.c.bf16 %v519_v9, %v517_v8  ;;  %v521_v14 = vld [vmem:[#allocation5 + $0x1a8] sm:$0xff]  ;;  %v523_v15 = vld [vmem:[#allocation5 + $0x1b8] sm:$0xff]  ;;  %v3043_v16 = vpack.c.bf16 %v518_v13, %v516_v12  ;;  %v520_v18 = vld [vmem:[#allocation5 + $0x1a0] sm:$0xff] }
  0xd4   : > { %v3045_v17 = vpack.c.bf16 %v523_v15, %v521_v14  ;;  %v522_v19 = vld [vmem:[#allocation5 + $0x1b0] sm:$0xff]  ;;  %v525_v20 = vld [vmem:[#allocation5 + $0x1c8] sm:$0xff]  ;;  %v527_v21 = vld [vmem:[#allocation5 + $0x1d8] sm:$0xff] }
  0xd5   : > { %3012 = vmatpush1.bf16.msra.mxu0 %v3011_v31  ;;  %v3047_v22 = vpack.c.bf16 %v522_v19, %v520_v18  ;;  %v3049_v23 = vpack.c.bf16 %v527_v21, %v525_v20  ;;  %v524_v24 = vld [vmem:[#allocation5 + $0x1c0] sm:$0xff]  ;;  %v526_v25 = vld [vmem:[#allocation5 + $0x1d0] sm:$0xff]  ;;  %v529_v26 = vld [vmem:[#allocation5 + $0x1e8] sm:$0xff] }
  0xd6   : > { %3014 = vmatprep.subr.bf16.mxu0 %v3013_v32  ;;  %v531_v27 = vld [vmem:[#allocation5 + $0x1f8] sm:$0xff]  ;;  %v3051_v28 = vpack.c.bf16 %v526_v25, %v524_v24  ;;  %v528_v30 = vld [vmem:[#allocation5 + $0x1e0] sm:$0xff]  ;;  %v530_v31 = vld [vmem:[#allocation5 + $0x1f0] sm:$0xff] }
  0xd7   : > { %v3053_v29 = vpack.c.bf16 %v531_v27, %v529_v26  ;;  %v533_v32 = vld [vmem:[#allocation5 + $0x208] sm:$0xff]  ;;  %v535_v33 = vld [vmem:[#allocation5 + $0x218] sm:$0xff]  ;;  %v3055_v34 = vpack.c.bf16 %v530_v31, %v528_v30  ;;  %v532_v36 = vld [vmem:[#allocation5 + $0x200] sm:$0xff] }
  0xd8   : > { %v3057_v35 = vpack.c.bf16 %v535_v33, %v533_v32  ;;  %v539_v39 = vld [vmem:[#allocation5 + $0x238] sm:$0xff]  ;;  %v383_v40 = vld [vmem:[%s4509_s20] sm:$0xff]  ;;  %v541_v46 = vld [vmem:[#allocation5 + $0x248] sm:$0xff] }
  0xd9   : > { %3016 = vmatpush1.bf16.msra.mxu0 %v3015_v37  ;;  %v534_v37 = vld [vmem:[#allocation5 + $0x210] sm:$0xff]  ;;  %v536_v43 = vld [vmem:[#allocation5 + $0x220] sm:$0xff]  ;;  %v543_v47 = vld [vmem:[#allocation5 + $0x258] sm:$0xff] }
  0xda   : > { %3018 = vmatprep.subr.bf16.mxu0 %v3017_v38  ;;  %v537_v38 = vld [vmem:[#allocation5 + $0x228] sm:$0xff]  ;;  %v3059_v41 = vpack.c.bf16 %v534_v37, %v532_v36  ;;  %v393_v49 = vld [vmem:[%s4509_s20 + $0x50] sm:$0xff]  ;;  %v547_v55 = vld [vmem:[#allocation5 + $0x278] sm:$0xff] }
  0xdb   : > { %v3061_v42 = vpack.c.bf16 %v539_v39, %v537_v38  ;;  %v542_v52 = vld [vmem:[#allocation5 + $0x250] sm:$0xff]  ;;  %v404_v53 = vld [vmem:[%s4509_s20 + $0xa8] sm:$0xff]  ;;  %v544_v59 = vld [vmem:[#allocation5 + $0x260] sm:$0xff] }
  0xdc   : > { %v545_v54 = vld [vmem:[#allocation5 + $0x268] sm:$0xff]  ;;  %v546_v60 = vld [vmem:[#allocation5 + $0x270] sm:$0xff]  ;;  %v414_v61 = vld [vmem:[%s4509_s20 + $0xf8] sm:$0xff] }
  0xdd   : > { %3020 = vmatpush1.bf16.msra.mxu0 %v3019_v44  ;;  %v538_v44 = vld [vmem:[#allocation5 + $0x230] sm:$0xff]  ;;  %v3069_v58 = vpack.c.bf16 %v547_v55, %v545_v54  ;;  %v3071_v0 = vpack.c.bf16 %v546_v60, %v544_v59  ;;  %v548_v3 = vld [vmem:[#allocation5 + $0x280] sm:$0xff]  ;;  %v553_v6 = vld [vmem:[#allocation5 + $0x2a8] sm:$0xff] }
  0xde   : > { %3022 = vmatprep.subr.bf16.mxu0 %v3021_v45  ;;  %v394_v45 = vld [vmem:[%s4509_s20 + $0x58] sm:$0xff]  ;;  %v3063_v48 = vpack.c.bf16 %v538_v44, %v536_v43  ;;  %v413_v1 = vld [vmem:[%s4509_s20 + $0xf0] sm:$0xff]  ;;  %v423_v9 = vld [vmem:[%s4509_s20 + $0x140] sm:$0xff] }
  0xdf   : > { %v555_v7 = vld [vmem:[#allocation5 + $0x2b8] sm:$0xff]  ;;  %v554_v12 = vld [vmem:[#allocation5 + $0x2b0] sm:$0xff]  ;;  %v557_v14 = vld [vmem:[#allocation5 + $0x2c8] sm:$0xff] }
  0xe0   : > { %v434_v13 = vld [vmem:[%s4509_s20 + $0x198] sm:$0xff]  ;;  %v556_v19 = vld [vmem:[#allocation5 + $0x2c0] sm:$0xff]  ;;  %v558_v20 = vld [vmem:[#allocation5 + $0x2d0] sm:$0xff] }
  0xe1   : > { %3024 = vmatpush1.bf16.msra.mxu0 %v3023_v50  ;;  %v3065_v50 = vpack.c.bf16 %v543_v47, %v541_v46  ;;  %v559_v15 = vld [vmem:[#allocation5 + $0x2d8] sm:$0xff]  ;;  %v444_v21 = vld [vmem:[%s4509_s20 + $0x1e8] sm:$0xff]  ;;  %v3083_v24 = vpack.c.bf16 %v558_v20, %v556_v19  ;;  %v443_v25 = vld [vmem:[%s4509_s20 + $0x1e0] sm:$0xff] }
  0xe2   : > { %3026 = vmatprep.subr.bf16.mxu0 %v3025_v51  ;;  %v540_v51 = vld [vmem:[#allocation5 + $0x240] sm:$0xff]  ;;  %v3081_v18 = vpack.c.bf16 %v559_v15, %v557_v14  ;;  %v565_v30 = vld [vmem:[#allocation5 + $0x308] sm:$0xff]  ;;  %v567_v31 = vld [vmem:[#allocation5 + $0x318] sm:$0xff] }
  0xe3   : > { %v560_v27 = vld [vmem:[#allocation5 + $0x2e0] sm:$0xff]  ;;  %v453_v33 = vld [vmem:[%s4509_s20 + $0x230] sm:$0xff]  ;;  %v386_v37 = vld [vmem:[%s4509_s20 + $0x18] sm:$0xff] }
  0xe4   : > { %v566_v36 = vld [vmem:[#allocation5 + $0x310] sm:$0xff]  ;;  %v569_v38 = vld [vmem:[#allocation5 + $0x328] sm:$0xff]  ;;  %v571_v39 = vld [vmem:[#allocation5 + $0x338] sm:$0xff] }
  0xe5   : > { %3028 = vmatpush1.bf16.msra.mxu0 %v3027_v56  ;;  %v3067_v56 = vpack.c.bf16 %v542_v52, %v540_v51  ;;  %v570_v43 = vld [vmem:[#allocation5 + $0x330] sm:$0xff]  ;;  %v573_v44 = vld [vmem:[#allocation5 + $0x348] sm:$0xff]  ;;  %v579_v51 = vld [vmem:[#allocation5 + $0x378] sm:$0xff] }
  0xe6   : > { %3030 = vmatprep.subr.bf16.mxu0 %v3029_v57  ;;  %v403_v57 = vld [vmem:[%s4509_s20 + $0xa0] sm:$0xff]  ;;  %v578_v55 = vld [vmem:[#allocation5 + $0x370] sm:$0xff] }
  0xe7   : > { %v576_v54 = vld [vmem:[#allocation5 + $0x360] sm:$0xff]  ;;  %v594_v15 = vld [vmem:[#allocation5 + $0x3f0] sm:$0xff] }
  0xe8   : > { %v580_v60 = vld [vmem:[#allocation5 + $0x380] sm:$0xff] }
  0xe9   : > { %3032 = vmatpush1.bf16.msra.mxu0 %v3031_v62  ;;  %v549_v62 = vld [vmem:[#allocation5 + $0x288] sm:$0xff]  ;;  %v592_v14 = vld [vmem:[#allocation5 + $0x3e0] sm:$0xff] }
  0xea   : > { %3034 = vmatprep.subr.bf16.mxu0 %v3033_v63  ;;  %v551_v63 = vld [vmem:[#allocation5 + $0x298] sm:$0xff]  ;;  %v596_v20 = vld [vmem:[#allocation5 + $0x400] sm:$0xff] }
  0xeb   : > { %v3073_v2 = vpack.c.bf16 %v551_v63, %v549_v62  ;;  %v585_v62 = vld [vmem:[#allocation5 + $0x3a8] sm:$0xff]  ;;  %v587_v63 = vld [vmem:[#allocation5 + $0x3b8] sm:$0xff] }
  0xed   : > { %3036 = vmatpush1.bf16.msra.mxu0 %v3035_v4  ;;  %v550_v4 = vld [vmem:[#allocation5 + $0x290] sm:$0xff] }
  0xee   : > { %3038 = vmatprep.subr.bf16.mxu0 %v3037_v5  ;;  %v424_v5 = vld [vmem:[%s4509_s20 + $0x148] sm:$0xff]  ;;  %v3075_v8 = vpack.c.bf16 %v550_v4, %v548_v3  ;;  %v586_v3 = vld [vmem:[#allocation5 + $0x3b0] sm:$0xff] }
  0xef   : > { %v589_v4 = vld [vmem:[#allocation5 + $0x3c8] sm:$0xff] }
  0xf1   : > { %3040 = vmatpush1.bf16.msra.mxu0 %v3039_v10  ;;  %v3077_v10 = vpack.c.bf16 %v555_v7, %v553_v6 }
  0xf2   : > { %3042 = vmatprep.subr.bf16.mxu0 %v3041_v11  ;;  %v552_v11 = vld [vmem:[#allocation5 + $0x2a0] sm:$0xff] }
  0xf5   : > { %3044 = vmatpush1.bf16.msra.mxu0 %v3043_v16  ;;  %v3079_v16 = vpack.c.bf16 %v554_v12, %v552_v11  ;;  %v595_v11 = vld [vmem:[#allocation5 + $0x3f8] sm:$0xff] }
  0xf6   : > { %3046 = vmatprep.subr.bf16.mxu0 %v3045_v17  ;;  %v433_v17 = vld [vmem:[%s4509_s20 + $0x190] sm:$0xff] }
  0xf9   : > { %3048 = vmatpush1.bf16.msra.mxu0 %v3047_v22  ;;  %v561_v22 = vld [vmem:[#allocation5 + $0x2e8] sm:$0xff] }
  0xfa   : > { %3050 = vmatprep.subr.bf16.mxu0 %v3049_v23  ;;  %v563_v23 = vld [vmem:[#allocation5 + $0x2f8] sm:$0xff] }
  0xfb   : > { %v3085_v26 = vpack.c.bf16 %v563_v23, %v561_v22  ;;  %v601_v22 = vld [vmem:[#allocation5 + $0x428] sm:$0xff]  ;;  %v603_v23 = vld [vmem:[#allocation5 + $0x438] sm:$0xff] }
  0xfd   : > { %3052 = vmatpush1.bf16.msra.mxu0 %v3051_v28  ;;  %v562_v28 = vld [vmem:[#allocation5 + $0x2f0] sm:$0xff] }
  0xfe   : > { %3054 = vmatprep.subr.bf16.mxu0 %v3053_v29  ;;  %v454_v29 = vld [vmem:[%s4509_s20 + $0x238] sm:$0xff]  ;;  %v3087_v32 = vpack.c.bf16 %v562_v28, %v560_v27  ;;  %v600_v27 = vld [vmem:[#allocation5 + $0x420] sm:$0xff]  ;;  %v602_v28 = vld [vmem:[#allocation5 + $0x430] sm:$0xff] }
 0x101   : > { %3056 = vmatpush1.bf16.msra.mxu0 %v3055_v34  ;;  %v3089_v34 = vpack.c.bf16 %v567_v31, %v565_v30  ;;  %v605_v30 = vld [vmem:[#allocation5 + $0x448] sm:$0xff]  ;;  %v607_v31 = vld [vmem:[#allocation5 + $0x458] sm:$0xff] }
 0x102   : > { %3058 = vmatprep.subr.bf16.mxu0 %v3057_v35  ;;  %v564_v35 = vld [vmem:[#allocation5 + $0x300] sm:$0xff] }
 0x104   : > { %864 = vmatmul.mubr.f32.vlgmr.msra.gmra.mrb[0].mxu0 %v383_v40  ;;  %v3091_v40 = vpack.c.bf16 %v566_v36, %v564_v35  ;;  %v604_v35 = vld [vmem:[#allocation5 + $0x440] sm:$0xff]  ;;  %v606_v36 = vld [vmem:[#allocation5 + $0x450] sm:$0xff] }
 0x105   : > { %3060 = vmatpush1.bf16.msra.mxu0 %v3059_v41  ;;  %869 = vmatprep.mubr.f32.mxu0 %v394_v45  ;;  %v3093_v41 = vpack.c.bf16 %v571_v39, %v569_v38  ;;  %v575_v45 = vld [vmem:[#allocation5 + $0x358] sm:$0xff]  ;;  %v609_v38 = vld [vmem:[#allocation5 + $0x468] sm:$0xff] }
 0x106   : > { %3062 = vmatprep.subr.bf16.mxu0 %v3061_v42  ;;  %v568_v42 = vld [vmem:[#allocation5 + $0x320] sm:$0xff]  ;;  %v3097_v47 = vpack.c.bf16 %v575_v45, %v573_v44  ;;  %v611_v39 = vld [vmem:[#allocation5 + $0x478] sm:$0xff]  ;;  %v610_v44 = vld [vmem:[#allocation5 + $0x470] sm:$0xff] }
 0x107   : > { %v3095_v46 = vpack.c.bf16 %v570_v43, %v568_v42  ;;  %v3133_v42 = vpack.c.bf16 %v611_v39, %v609_v38  ;;  %v608_v43 = vld [vmem:[#allocation5 + $0x460] sm:$0xff]  ;;  %v416_v45 = vld [vmem:[%s4509_s20 + $0x108] sm:$0xff]  ;;  %v642_v39 = vld [vmem:[#allocation5 + $0x570] sm:$0xff] }
 0x108   : > { %870 = vmatmul.mubr.f32.gmra.mrb[2].mxu0 %v393_v49  ;;  %v574_v49 = vld [vmem:[#allocation5 + $0x350] sm:$0xff]  ;;  %v640_v38 = vld [vmem:[#allocation5 + $0x560] sm:$0xff] }
 0x109   : > { %3064 = vmatpush1.bf16.msra.mxu0 %v3063_v48  ;;  %875 = vmatprep.mubr.f32.mxu0 %v404_v53  ;;  %v572_v48 = vld [vmem:[#allocation5 + $0x340] sm:$0xff] }
 0x10a   : > { %3066 = vmatprep.subr.bf16.mxu0 %v3065_v50  ;;  %v577_v50 = vld [vmem:[#allocation5 + $0x368] sm:$0xff]  ;;  %v3099_v52 = vpack.c.bf16 %v574_v49, %v572_v48  ;;  %v3135_v48 = vpack.c.bf16 %v610_v44, %v608_v43  ;;  %v415_v49 = vld [vmem:[%s4509_s20 + $0x100] sm:$0xff] }
 0x10b   : > { %v3101_v53 = vpack.c.bf16 %v579_v51, %v577_v50  ;;  %v612_v51 = vld [vmem:[#allocation5 + $0x480] sm:$0xff] }
 0x10c   : > { %876 = vmatmul.mubr.f32.gmra.mrb[4].mxu0 %v403_v57  ;;  %v583_v57 = vld [vmem:[#allocation5 + $0x398] sm:$0xff]  ;;  %v644_v44 = vld [vmem:[#allocation5 + $0x580] sm:$0xff] }
 0x10d   : > { %3068 = vmatpush1.bf16.msra.mxu0 %v3067_v56  ;;  %881 = vmatprep.mubr.f32.mxu0 %v414_v61  ;;  %v581_v56 = vld [vmem:[#allocation5 + $0x388] sm:$0xff]  ;;  %v582_v61 = vld [vmem:[#allocation5 + $0x390] sm:$0xff] }
 0x10e   : > { %3070 = vmatprep.subr.bf16.mxu0 %v3069_v58  ;;  %v3103_v58 = vpack.c.bf16 %v578_v55, %v576_v54  ;;  %v3105_v59 = vpack.c.bf16 %v583_v57, %v581_v56  ;;  %v617_v54 = vld [vmem:[#allocation5 + $0x4a8] sm:$0xff]  ;;  %v619_v55 = vld [vmem:[#allocation5 + $0x4b8] sm:$0xff]  ;;  %v425_v57 = vld [vmem:[%s4509_s20 + $0x150] sm:$0xff] }
 0x110   : > { %882 = vmatmul.mubr.f32.gmra.mrb[6].mxu0 %v413_v1  ;;  %v3109_v1 = vpack.c.bf16 %v587_v63, %v585_v62  ;;  %v621_v62 = vld [vmem:[#allocation5 + $0x4c8] sm:$0xff]  ;;  %v623_v63 = vld [vmem:[#allocation5 + $0x4d8] sm:$0xff] }
 0x111   : > { %3072 = vmatpush1.bf16.msra.mxu0 %v3071_v0  ;;  %887 = vmatprep.mubr.f32.mxu0 %v424_v5  ;;  %v3107_v0 = vpack.c.bf16 %v582_v61, %v580_v60  ;;  %v591_v5 = vld [vmem:[#allocation5 + $0x3d8] sm:$0xff]  ;;  %v618_v60 = vld [vmem:[#allocation5 + $0x4b0] sm:$0xff]  ;;  %v436_v61 = vld [vmem:[%s4509_s20 + $0x1a8] sm:$0xff] }
 0x112   : > { %3074 = vmatprep.subr.bf16.mxu0 %v3073_v2  ;;  %v584_v2 = vld [vmem:[#allocation5 + $0x3a0] sm:$0xff]  ;;  %v3113_v7 = vpack.c.bf16 %v591_v5, %v589_v4  ;;  %v622_v4 = vld [vmem:[#allocation5 + $0x4d0] sm:$0xff]  ;;  %v446_v5 = vld [vmem:[%s4509_s20 + $0x1f8] sm:$0xff] }
 0x113   : > { %v3111_v6 = vpack.c.bf16 %v586_v3, %v584_v2  ;;  %v3145_v2 = vpack.c.bf16 %v623_v63, %v621_v62  ;;  %v620_v3 = vld [vmem:[#allocation5 + $0x4c0] sm:$0xff]  ;;  %v658_v63 = vld [vmem:[#allocation5 + $0x5f0] sm:$0xff] }
 0x114   : > { %888 = vmatmul.mubr.f32.gmra.mrb[8].mxu0 %v423_v9  ;;  %v590_v9 = vld [vmem:[#allocation5 + $0x3d0] sm:$0xff]  ;;  %v656_v62 = vld [vmem:[#allocation5 + $0x5e0] sm:$0xff] }
 0x115   : > { %3076 = vmatpush1.bf16.msra.mxu0 %v3075_v8  ;;  %893 = vmatprep.mubr.f32.mxu0 %v434_v13  ;;  %v588_v8 = vld [vmem:[#allocation5 + $0x3c0] sm:$0xff] }
 0x116   : > { %3078 = vmatprep.subr.bf16.mxu0 %v3077_v10  ;;  %v593_v10 = vld [vmem:[#allocation5 + $0x3e8] sm:$0xff]  ;;  %v3115_v12 = vpack.c.bf16 %v590_v9, %v588_v8  ;;  %v3147_v8 = vpack.c.bf16 %v622_v4, %v620_v3  ;;  %v445_v9 = vld [vmem:[%s4509_s20 + $0x1f0] sm:$0xff]  ;;  %v660_v4 = vld [vmem:[#allocation5 + $0x600] sm:$0xff] }
 0x117   : > { %v3117_v13 = vpack.c.bf16 %v595_v11, %v593_v10  ;;  %v624_v11 = vld [vmem:[#allocation5 + $0x4e0] sm:$0xff] }
 0x118   : > { %894 = vmatmul.mubr.f32.gmra.mrb[10].mxu0 %v433_v17  ;;  %v599_v17 = vld [vmem:[#allocation5 + $0x418] sm:$0xff] }
 0x119   : > { %3080 = vmatpush1.bf16.msra.mxu0 %v3079_v16  ;;  %899 = vmatprep.mubr.f32.mxu0 %v444_v21  ;;  %v597_v16 = vld [vmem:[#allocation5 + $0x408] sm:$0xff]  ;;  %v598_v21 = vld [vmem:[#allocation5 + $0x410] sm:$0xff] }
 0x11a   : > { %3082 = vmatprep.subr.bf16.mxu0 %v3081_v18  ;;  %v3119_v18 = vpack.c.bf16 %v594_v15, %v592_v14  ;;  %v3121_v19 = vpack.c.bf16 %v599_v17, %v597_v16  ;;  %v629_v14 = vld [vmem:[#allocation5 + $0x508] sm:$0xff]  ;;  %v631_v15 = vld [vmem:[#allocation5 + $0x518] sm:$0xff]  ;;  %v455_v17 = vld [vmem:[%s4509_s20 + $0x240] sm:$0xff] }
 0x11c   : > { %900 = vmatmul.mubr.f32.gmra.mrb[12].mxu0 %v443_v25  ;;  %v3123_v25 = vpack.c.bf16 %v598_v21, %v596_v20  ;;  %v630_v20 = vld [vmem:[#allocation5 + $0x510] sm:$0xff]  ;;  %v388_v21 = vld [vmem:[%s4509_s20 + $0x28] sm:$0xff] }
 0x11d   : > { %3084 = vmatpush1.bf16.msra.mxu0 %v3083_v24  ;;  %905 = vmatprep.mubr.f32.mxu0 %v454_v29  ;;  %v385_v24 = vld [vmem:[%s4509_s20 + $0x10] sm:$0xff]  ;;  %v396_v29 = vld [vmem:[%s4509_s20 + $0x68] sm:$0xff] }
 0x11e   : > { %3086 = vmatprep.subr.bf16.mxu0 %v3085_v26  ;;  %v3125_v26 = vpack.c.bf16 %v603_v23, %v601_v22  ;;  %v633_v22 = vld [vmem:[#allocation5 + $0x528] sm:$0xff]  ;;  %v635_v23 = vld [vmem:[#allocation5 + $0x538] sm:$0xff] }
 0x120   : > { %906 = vmatmul.mubr.f32.gmra.mrb[14].mxu0 %v453_v33  ;;  %v395_v33 = vld [vmem:[%s4509_s20 + $0x60] sm:$0xff] }
 0x121   : > { %3088 = vmatpush1.bf16.msra.mxu0 %v3087_v32  ;;  %976 = vmatprep.mubr.f32.mxu0 %v386_v37  ;;  %v3127_v32 = vpack.c.bf16 %v602_v28, %v600_v27  ;;  %v406_v37 = vld [vmem:[%s4509_s20 + $0xb8] sm:$0xff]  ;;  %v634_v27 = vld [vmem:[#allocation5 + $0x530] sm:$0xff]  ;;  %v637_v28 = vld [vmem:[#allocation5 + $0x548] sm:$0xff] }
 0x122   : > { %3090 = vmatprep.subr.bf16.mxu0 %v3089_v34  ;;  %v3129_v34 = vpack.c.bf16 %v607_v31, %v605_v30 }
 0x125   : > { %3092 = vmatpush1.bf16.msra.mxu0 %v3091_v40  ;;  %v3131_v40 = vpack.c.bf16 %v606_v36, %v604_v35  ;;  %v643_v35 = vld [vmem:[#allocation5 + $0x578] sm:$0xff] }
 0x126   : > { %3094 = vmatprep.subr.bf16.mxu0 %v3093_v41  ;;  %v405_v41 = vld [vmem:[%s4509_s20 + $0xb0] sm:$0xff] }
 0x129   : > { %3096 = vmatpush1.bf16.msra.mxu0 %v3095_v46  ;;  %v613_v46 = vld [vmem:[#allocation5 + $0x488] sm:$0xff] }
 0x12a   : > { %3098 = vmatprep.subr.bf16.mxu0 %v3097_v47  ;;  %v615_v47 = vld [vmem:[#allocation5 + $0x498] sm:$0xff] }
 0x12b   : > { %v3137_v50 = vpack.c.bf16 %v615_v47, %v613_v46  ;;  %v649_v46 = vld [vmem:[#allocation5 + $0x5a8] sm:$0xff]  ;;  %v651_v47 = vld [vmem:[#allocation5 + $0x5b8] sm:$0xff] }
 0x12d   : > { %3100 = vmatpush1.bf16.msra.mxu0 %v3099_v52  ;;  %v614_v52 = vld [vmem:[#allocation5 + $0x490] sm:$0xff] }
 0x12e   : > { %3102 = vmatprep.subr.bf16.mxu0 %v3101_v53  ;;  %v426_v53 = vld [vmem:[%s4509_s20 + $0x158] sm:$0xff]  ;;  %v3139_v56 = vpack.c.bf16 %v614_v52, %v612_v51  ;;  %v650_v51 = vld [vmem:[#allocation5 + $0x5b0] sm:$0xff]  ;;  %v653_v52 = vld [vmem:[#allocation5 + $0x5c8] sm:$0xff] }
 0x131   : > { %3104 = vmatpush1.bf16.msra.mxu0 %v3103_v58  ;;  %v3141_v58 = vpack.c.bf16 %v619_v55, %v617_v54 }
 0x132   : > { %3106 = vmatprep.subr.bf16.mxu0 %v3105_v59  ;;  %v616_v59 = vld [vmem:[#allocation5 + $0x4a0] sm:$0xff] }
 0x135   : > { %3108 = vmatpush1.bf16.msra.mxu0 %v3107_v0  ;;  %v3143_v0 = vpack.c.bf16 %v618_v60, %v616_v59  ;;  %v659_v59 = vld [vmem:[#allocation5 + $0x5f8] sm:$0xff] }
 0x136   : > { %3110 = vmatprep.subr.bf16.mxu0 %v3109_v1  ;;  %v435_v1 = vld [vmem:[%s4509_s20 + $0x1a0] sm:$0xff] }
 0x139   : > { %3112 = vmatpush1.bf16.msra.mxu0 %v3111_v6  ;;  %v625_v6 = vld [vmem:[#allocation5 + $0x4e8] sm:$0xff] }
 0x13a   : > { %3114 = vmatprep.subr.bf16.mxu0 %v3113_v7  ;;  %v627_v7 = vld [vmem:[#allocation5 + $0x4f8] sm:$0xff] }
 0x13b   : > { %v3149_v10 = vpack.c.bf16 %v627_v7, %v625_v6  ;;  %v665_v6 = vld [vmem:[#allocation5 + $0x628] sm:$0xff]  ;;  %v667_v7 = vld [vmem:[#allocation5 + $0x638] sm:$0xff] }
 0x13d   : > { %3116 = vmatpush1.bf16.msra.mxu0 %v3115_v12  ;;  %v626_v12 = vld [vmem:[#allocation5 + $0x4f0] sm:$0xff] }
 0x13e   : > { %3118 = vmatprep.subr.bf16.mxu0 %v3117_v13  ;;  %v456_v13 = vld [vmem:[%s4509_s20 + $0x248] sm:$0xff]  ;;  %v3151_v16 = vpack.c.bf16 %v626_v12, %v624_v11  ;;  %v664_v11 = vld [vmem:[#allocation5 + $0x620] sm:$0xff]  ;;  %v666_v12 = vld [vmem:[#allocation5 + $0x630] sm:$0xff] }
 0x141   : > { %3120 = vmatpush1.bf16.msra.mxu0 %v3119_v18  ;;  %v3153_v18 = vpack.c.bf16 %v631_v15, %v629_v14  ;;  %v669_v14 = vld [vmem:[#allocation5 + $0x648] sm:$0xff]  ;;  %v671_v15 = vld [vmem:[#allocation5 + $0x658] sm:$0xff] }
 0x142   : > { %3122 = vmatprep.subr.bf16.mxu0 %v3121_v19  ;;  %v628_v19 = vld [vmem:[#allocation5 + $0x500] sm:$0xff] }
 0x144   : > { %977 = vmatmul.mubr.f32.vlgmr.msra.gmra.mrb[0].mxu0 %v385_v24  ;;  %v3155_v24 = vpack.c.bf16 %v630_v20, %v628_v19  ;;  %v668_v19 = vld [vmem:[#allocation5 + $0x640] sm:$0xff]  ;;  %v670_v20 = vld [vmem:[#allocation5 + $0x650] sm:$0xff] }
 0x145   : > { %3124 = vmatpush1.bf16.msra.mxu0 %v3123_v25  ;;  %982 = vmatprep.mubr.f32.mxu0 %v396_v29  ;;  %v3157_v25 = vpack.c.bf16 %v635_v23, %v633_v22  ;;  %v639_v29 = vld [vmem:[#allocation5 + $0x558] sm:$0xff]  ;;  %v673_v22 = vld [vmem:[#allocation5 + $0x668] sm:$0xff] }
 0x146   : > { %3126 = vmatprep.subr.bf16.mxu0 %v3125_v26  ;;  %v632_v26 = vld [vmem:[#allocation5 + $0x520] sm:$0xff]  ;;  %v3161_v31 = vpack.c.bf16 %v639_v29, %v637_v28  ;;  %v675_v23 = vld [vmem:[#allocation5 + $0x678] sm:$0xff]  ;;  %v674_v28 = vld [vmem:[#allocation5 + $0x670] sm:$0xff] }
 0x147   : > { %v3159_v30 = vpack.c.bf16 %v634_v27, %v632_v26  ;;  %v3197_v26 = vpack.c.bf16 %v675_v23, %v673_v22  ;;  %v672_v27 = vld [vmem:[#allocation5 + $0x660] sm:$0xff]  ;;  %v418_v29 = vld [vmem:[%s4509_s20 + $0x118] sm:$0xff] }
 0x148   : > { %983 = vmatmul.mubr.f32.gmra.mrb[2].mxu0 %v395_v33  ;;  %v638_v33 = vld [vmem:[#allocation5 + $0x550] sm:$0xff]  ;;  %v1383_v22 = vld [vmem:[#allocation7 + $0x18] sm:$0xff]  ;;  %v1400_v23 = vld [vmem:[#allocation7 + $0xa0] sm:$0xff] }
 0x149   : > { %3128 = vmatpush1.bf16.msra.mxu0 %v3127_v32  ;;  %988 = vmatprep.mubr.f32.mxu0 %v406_v37  ;;  %v636_v32 = vld [vmem:[#allocation5 + $0x540] sm:$0xff] }
 0x14a   : > { %3130 = vmatprep.subr.bf16.mxu0 %v3129_v34  ;;  %v641_v34 = vld [vmem:[#allocation5 + $0x568] sm:$0xff]  ;;  %v3163_v36 = vpack.c.bf16 %v638_v33, %v636_v32  ;;  %v3199_v32 = vpack.c.bf16 %v674_v28, %v672_v27  ;;  %v417_v33 = vld [vmem:[%s4509_s20 + $0x110] sm:$0xff] }
 0x14b   : > { %v3165_v37 = vpack.c.bf16 %v643_v35, %v641_v34  ;;  %v676_v35 = vld [vmem:[#allocation5 + $0x680] sm:$0xff] }
 0x14c   : > { %989 = vmatmul.mubr.f32.gmra.mrb[4].mxu0 %v405_v41  ;;  %v647_v41 = vld [vmem:[#allocation5 + $0x598] sm:$0xff] }
 0x14d   : > { %3132 = vmatpush1.bf16.msra.mxu0 %v3131_v40  ;;  %994 = vmatprep.mubr.f32.mxu0 %v416_v45  ;;  %v645_v40 = vld [vmem:[#allocation5 + $0x588] sm:$0xff]  ;;  %v646_v45 = vld [vmem:[#allocation5 + $0x590] sm:$0xff] }
 0x14e   : > { %3134 = vmatprep.subr.bf16.mxu0 %v3133_v42  ;;  %v3167_v42 = vpack.c.bf16 %v642_v39, %v640_v38  ;;  %v3169_v43 = vpack.c.bf16 %v647_v41, %v645_v40  ;;  %v681_v38 = vld [vmem:[#allocation5 + $0x6a8] sm:$0xff]  ;;  %v683_v39 = vld [vmem:[#allocation5 + $0x6b8] sm:$0xff]  ;;  %v427_v41 = vld [vmem:[%s4509_s20 + $0x160] sm:$0xff] }
 0x150   : > { %995 = vmatmul.mubr.f32.gmra.mrb[6].mxu0 %v415_v49  ;;  %v3173_v49 = vpack.c.bf16 %v651_v47, %v649_v46  ;;  %v685_v46 = vld [vmem:[#allocation5 + $0x6c8] sm:$0xff]  ;;  %v687_v47 = vld [vmem:[#allocation5 + $0x6d8] sm:$0xff] }
 0x151   : > { %3136 = vmatpush1.bf16.msra.mxu0 %v3135_v48  ;;  %1000 = vmatprep.mubr.f32.mxu0 %v426_v53  ;;  %v3171_v48 = vpack.c.bf16 %v646_v45, %v644_v44  ;;  %v655_v53 = vld [vmem:[#allocation5 + $0x5d8] sm:$0xff]  ;;  %v682_v44 = vld [vmem:[#allocation5 + $0x6b0] sm:$0xff] }
 0x152   : > { %3138 = vmatprep.subr.bf16.mxu0 %v3137_v50  ;;  %v648_v50 = vld [vmem:[#allocation5 + $0x5a0] sm:$0xff]  ;;  %v3177_v55 = vpack.c.bf16 %v655_v53, %v653_v52  ;;  %v438_v45 = vld [vmem:[%s4509_s20 + $0x1b8] sm:$0xff]  ;;  %v686_v52 = vld [vmem:[#allocation5 + $0x6d0] sm:$0xff] }
 0x153   : > { %v3175_v54 = vpack.c.bf16 %v650_v51, %v648_v50  ;;  %v3209_v50 = vpack.c.bf16 %v687_v47, %v685_v46  ;;  %v684_v51 = vld [vmem:[#allocation5 + $0x6c0] sm:$0xff]  ;;  %v448_v53 = vld [vmem:[%s4509_s20 + $0x208] sm:$0xff]  ;;  %v706_v46 = vld [vmem:[#allocation5 + $0x770] sm:$0xff] }
 0x154   : > { %1001 = vmatmul.mubr.f32.gmra.mrb[8].mxu0 %v425_v57  ;;  %v654_v57 = vld [vmem:[#allocation5 + $0x5d0] sm:$0xff]  ;;  %v1404_v47 = vld [vmem:[#allocation7 + $0xc0] sm:$0xff] }
 0x155   : > { %3140 = vmatpush1.bf16.msra.mxu0 %v3139_v56  ;;  %1006 = vmatprep.mubr.f32.mxu0 %v436_v61  ;;  %v652_v56 = vld [vmem:[#allocation5 + $0x5c0] sm:$0xff] }
 0x156   : > { %3142 = vmatprep.subr.bf16.mxu0 %v3141_v58  ;;  %v657_v58 = vld [vmem:[#allocation5 + $0x5e8] sm:$0xff]  ;;  %v3179_v60 = vpack.c.bf16 %v654_v57, %v652_v56  ;;  %v3211_v56 = vpack.c.bf16 %v686_v52, %v684_v51  ;;  %v447_v57 = vld [vmem:[%s4509_s20 + $0x200] sm:$0xff] }
 0x157   : > { %v3181_v61 = vpack.c.bf16 %v659_v59, %v657_v58  ;;  %v688_v59 = vld [vmem:[#allocation5 + $0x6e0] sm:$0xff] }
 0x158   : > { %1007 = vmatmul.mubr.f32.gmra.mrb[10].mxu0 %v435_v1  ;;  %v663_v1 = vld [vmem:[#allocation5 + $0x618] sm:$0xff] }
 0x159   : > { %3144 = vmatpush1.bf16.msra.mxu0 %v3143_v0  ;;  %1012 = vmatprep.mubr.f32.mxu0 %v446_v5  ;;  %v661_v0 = vld [vmem:[#allocation5 + $0x608] sm:$0xff]  ;;  %v662_v5 = vld [vmem:[#allocation5 + $0x610] sm:$0xff] }
 0x15a   : > { %3146 = vmatprep.subr.bf16.mxu0 %v3145_v2  ;;  %v3183_v2 = vpack.c.bf16 %v658_v63, %v656_v62  ;;  %v3185_v3 = vpack.c.bf16 %v663_v1, %v661_v0  ;;  %v693_v62 = vld [vmem:[#allocation5 + $0x708] sm:$0xff]  ;;  %v695_v63 = vld [vmem:[#allocation5 + $0x718] sm:$0xff]  ;;  %v457_v1 = vld [vmem:[%s4509_s20 + $0x250] sm:$0xff] }
 0x15c   : > { %1013 = vmatmul.mubr.f32.gmra.mrb[12].mxu0 %v445_v9  ;;  %v3187_v9 = vpack.c.bf16 %v662_v5, %v660_v4  ;;  %v694_v4 = vld [vmem:[#allocation5 + $0x710] sm:$0xff]  ;;  %v390_v5 = vld [vmem:[%s4509_s20 + $0x38] sm:$0xff] }
 0x15d   : > { %3148 = vmatpush1.bf16.msra.mxu0 %v3147_v8  ;;  %1018 = vmatprep.mubr.f32.mxu0 %v456_v13  ;;  %v387_v8 = vld [vmem:[%s4509_s20 + $0x20] sm:$0xff]  ;;  %v398_v13 = vld [vmem:[%s4509_s20 + $0x78] sm:$0xff] }
 0x15e   : > { %3150 = vmatprep.subr.bf16.mxu0 %v3149_v10  ;;  %v3189_v10 = vpack.c.bf16 %v667_v7, %v665_v6  ;;  %v697_v6 = vld [vmem:[#allocation5 + $0x728] sm:$0xff]  ;;  %v699_v7 = vld [vmem:[#allocation5 + $0x738] sm:$0xff] }
 0x160   : > { %1019 = vmatmul.mubr.f32.gmra.mrb[14].mxu0 %v455_v17  ;;  %v397_v17 = vld [vmem:[%s4509_s20 + $0x70] sm:$0xff] }
 0x161   : > { %3152 = vmatpush1.bf16.msra.mxu0 %v3151_v16  ;;  %1089 = vmatprep.mubr.f32.mxu0 %v388_v21  ;;  %v3191_v16 = vpack.c.bf16 %v666_v12, %v664_v11  ;;  %v408_v21 = vld [vmem:[%s4509_s20 + $0xc8] sm:$0xff]  ;;  %v1380_v12 = vld [vmem:[#allocation7] sm:$0xff] }
 0x162   : > { %3154 = vmatprep.subr.bf16.mxu0 %v3153_v18  ;;  %v3193_v18 = vpack.c.bf16 %v671_v15, %v669_v14  ;;  %v1397_v11 = vld [vmem:[#allocation7 + $0x88] sm:$0xff] }
 0x163   : > { %v1381_v15 = vld [vmem:[#allocation7 + $0x8] sm:$0xff] }
 0x165   : > { %3156 = vmatpush1.bf16.msra.mxu0 %v3155_v24  ;;  %v3195_v24 = vpack.c.bf16 %v670_v20, %v668_v19  ;;  %v3315_v19 = vpack.c.bf16 %v1381_v15, %v1380_v12  ;;  %v716_v15 = vld [vmem:[#allocation5 + $0x7c0] sm:$0xff] }
 0x166   : > { %3158 = vmatprep.subr.bf16.mxu0 %v3157_v25  ;;  %v407_v25 = vld [vmem:[%s4509_s20 + $0xc0] sm:$0xff] }
 0x169   : > { %3160 = vmatpush1.bf16.msra.mxu0 %v3159_v30  ;;  %v677_v30 = vld [vmem:[#allocation5 + $0x688] sm:$0xff] }
 0x16a   : > { %3162 = vmatprep.subr.bf16.mxu0 %v3161_v31  ;;  %v679_v31 = vld [vmem:[#allocation5 + $0x698] sm:$0xff] }
 0x16b   : > { %v3201_v34 = vpack.c.bf16 %v679_v31, %v677_v30  ;;  %v1384_v31 = vld [vmem:[#allocation7 + $0x20] sm:$0xff] }
 0x16d   : > { %3164 = vmatpush1.bf16.msra.mxu0 %v3163_v36  ;;  %v678_v36 = vld [vmem:[#allocation5 + $0x690] sm:$0xff] }
 0x16e   : > { %3166 = vmatprep.subr.bf16.mxu0 %v3165_v37  ;;  %v428_v37 = vld [vmem:[%s4509_s20 + $0x168] sm:$0xff]  ;;  %v3203_v40 = vpack.c.bf16 %v678_v36, %v676_v35  ;;  %v1402_v35 = vld [vmem:[#allocation7 + $0xb0] sm:$0xff]  ;;  %v1403_v36 = vld [vmem:[#allocation7 + $0xb8] sm:$0xff] }
 0x171   : > { %3168 = vmatpush1.bf16.msra.mxu0 %v3167_v42  ;;  %v3205_v42 = vpack.c.bf16 %v683_v39, %v681_v38  ;;  %v707_v38 = vld [vmem:[#allocation5 + $0x778] sm:$0xff] }
 0x172   : > { %3170 = vmatprep.subr.bf16.mxu0 %v3169_v43  ;;  %v680_v43 = vld [vmem:[#allocation5 + $0x6a0] sm:$0xff] }
 0x175   : > { %3172 = vmatpush1.bf16.msra.mxu0 %v3171_v48  ;;  %v3207_v48 = vpack.c.bf16 %v682_v44, %v680_v43  ;;  %v1386_v43 = vld [vmem:[#allocation7 + $0x30] sm:$0xff]  ;;  %v1387_v44 = vld [vmem:[#allocation7 + $0x38] sm:$0xff] }
 0x176   : > { %3174 = vmatprep.subr.bf16.mxu0 %v3173_v49  ;;  %v437_v49 = vld [vmem:[%s4509_s20 + $0x1b0] sm:$0xff]  ;;  %v3327_v51 = vpack.c.bf16 %v1387_v44, %v1386_v43  ;;  %v410_v44 = vld [vmem:[%s4509_s20 + $0xd8] sm:$0xff] }
 0x177   : > { %v734_v43 = vld [vmem:[#allocation5 + $0x850] sm:$0xff] }
 0x179   : > { %3176 = vmatpush1.bf16.msra.mxu0 %v3175_v54  ;;  %v689_v54 = vld [vmem:[#allocation5 + $0x6e8] sm:$0xff] }
 0x17a   : > { %3178 = vmatprep.subr.bf16.mxu0 %v3177_v55  ;;  %v691_v55 = vld [vmem:[#allocation5 + $0x6f8] sm:$0xff] }
 0x17b   : > { %v3213_v58 = vpack.c.bf16 %v691_v55, %v689_v54  ;;  %v1388_v55 = vld [vmem:[#allocation7 + $0x40] sm:$0xff] }
 0x17d   : > { %3180 = vmatpush1.bf16.msra.mxu0 %v3179_v60  ;;  %v690_v60 = vld [vmem:[#allocation5 + $0x6f0] sm:$0xff] }
 0x17e   : > { %3182 = vmatprep.subr.bf16.mxu0 %v3181_v61  ;;  %v458_v61 = vld [vmem:[%s4509_s20 + $0x258] sm:$0xff]  ;;  %v3215_v0 = vpack.c.bf16 %v690_v60, %v688_v59  ;;  %v1406_v59 = vld [vmem:[#allocation7 + $0xd0] sm:$0xff] }
 0x17f   : > { %v1407_v60 = vld [vmem:[#allocation7 + $0xd8] sm:$0xff] }
 0x181   : > { %3184 = vmatpush1.bf16.msra.mxu0 %v3183_v2  ;;  %v3217_v2 = vpack.c.bf16 %v695_v63, %v693_v62  ;;  %v715_v62 = vld [vmem:[#allocation5 + $0x7b8] sm:$0xff] }
 0x182   : > { %3186 = vmatprep.subr.bf16.mxu0 %v3185_v3  ;;  %v692_v3 = vld [vmem:[#allocation5 + $0x700] sm:$0xff] }
 0x184   : > { %1090 = vmatmul.mubr.f32.vlgmr.msra.gmra.mrb[0].mxu0 %v387_v8  ;;  %v696_v8 = vld [vmem:[#allocation5 + $0x720] sm:$0xff] }
 0x185   : > { %3188 = vmatpush1.bf16.msra.mxu0 %v3187_v9  ;;  %1095 = vmatprep.mubr.f32.mxu0 %v398_v13  ;;  %v698_v9 = vld [vmem:[#allocation5 + $0x730] sm:$0xff]  ;;  %v3219_v13 = vpack.c.bf16 %v694_v4, %v692_v3  ;;  %v1391_v4 = vld [vmem:[#allocation7 + $0x58] sm:$0xff] }
 0x186   : > { %3190 = vmatprep.subr.bf16.mxu0 %v3189_v10  ;;  %v1396_v10 = vld [vmem:[#allocation7 + $0x80] sm:$0xff]  ;;  %v3223_v28 = vpack.c.bf16 %v698_v9, %v696_v8  ;;  %v1390_v3 = vld [vmem:[#allocation7 + $0x50] sm:$0xff]  ;;  %v1409_v8 = vld [vmem:[#allocation7 + $0xe8] sm:$0xff] }
 0x187   : > { %v3313_v14 = vpack.c.bf16 %v1397_v11, %v1396_v10  ;;  %v717_v9 = vld [vmem:[#allocation5 + $0x7c8] sm:$0xff]  ;;  %v719_v10 = vld [vmem:[#allocation5 + $0x7d8] sm:$0xff]  ;;  %v3335_v11 = vpack.c.bf16 %v1391_v4, %v1390_v3  ;;  %v746_v3 = vld [vmem:[#allocation5 + $0x8b0] sm:$0xff] }
 0x188   : > { %1096 = vmatmul.mubr.f32.gmra.mrb[2].mxu0 %v397_v17  ;;  %v1399_v17 = vld [vmem:[#allocation7 + $0x98] sm:$0xff]  ;;  %v440_v4 = vld [vmem:[%s4509_s20 + $0x1c8] sm:$0xff] }
 0x189   : > { %3192 = vmatpush1.bf16.msra.mxu0 %v3191_v16  ;;  %1101 = vmatprep.mubr.f32.mxu0 %v408_v21  ;;  %v1398_v16 = vld [vmem:[#allocation7 + $0x90] sm:$0xff] }
 0x18a   : > { %3194 = vmatprep.subr.bf16.mxu0 %v3193_v18  ;;  %v3221_v18 = vpack.c.bf16 %v699_v7, %v697_v6  ;;  %v3317_v20 = vpack.c.bf16 %v1399_v17, %v1398_v16  ;;  %v1382_v21 = vld [vmem:[#allocation7 + $0x10] sm:$0xff]  ;;  %3314 = vmatprep.subr.bf16.mxu1 %v3313_v14  ;;  %v1408_v7 = vld [vmem:[#allocation7 + $0xe0] sm:$0xff]  ;;  %v3241_v14 = vpack.c.bf16 %v719_v10, %v717_v9  ;;  %v721_v17 = vld [vmem:[#allocation5 + $0x7e8] sm:$0xff] }
 0x18b   : > { %3316 = vmatpush3.bf16.msra.mxu1 %v3315_v19  ;;  %v3319_v27 = vpack.c.bf16 %v1383_v22, %v1382_v21  ;;  %v714_v6 = vld [vmem:[#allocation5 + $0x7b0] sm:$0xff]  ;;  %v720_v21 = vld [vmem:[#allocation5 + $0x7e0] sm:$0xff] }
 0x18c   : > { %1102 = vmatmul.mubr.f32.gmra.mrb[4].mxu0 %v407_v25  ;;  %v703_v25 = vld [vmem:[#allocation5 + $0x758] sm:$0xff]  ;;  %3318 = vmatprep.subr.bf16.mxu1 %v3317_v20  ;;  %v718_v16 = vld [vmem:[#allocation5 + $0x7d0] sm:$0xff]  ;;  %v748_v10 = vld [vmem:[#allocation5 + $0x8c0] sm:$0xff] }
 0x18d   : > { %3196 = vmatpush1.bf16.msra.mxu0 %v3195_v24  ;;  %1107 = vmatprep.mubr.f32.mxu0 %v418_v29  ;;  %v701_v24 = vld [vmem:[#allocation5 + $0x748] sm:$0xff]  ;;  %v700_v29 = vld [vmem:[#allocation5 + $0x740] sm:$0xff]  ;;  %v3243_v19 = vpack.c.bf16 %v718_v16, %v716_v15  ;;  %v722_v22 = vld [vmem:[#allocation5 + $0x7f0] sm:$0xff] }
 0x18e   : > { %3198 = vmatprep.subr.bf16.mxu0 %v3197_v26  ;;  %v1401_v26 = vld [vmem:[#allocation7 + $0xa8] sm:$0xff]  ;;  %v449_v16 = vld [vmem:[%s4509_s20 + $0x210] sm:$0xff] }
 0x18f   : > { %v3321_v30 = vpack.c.bf16 %v1401_v26, %v1400_v23  ;;  %3320 = vmatpush3.bf16.msra.mxu1 %v3319_v27  ;;  %v725_v23 = vld [vmem:[#allocation5 + $0x808] sm:$0xff]  ;;  %v724_v27 = vld [vmem:[#allocation5 + $0x800] sm:$0xff] }
 0x190   : > { %1108 = vmatmul.mubr.f32.gmra.mrb[6].mxu0 %v417_v33  ;;  %v3225_v33 = vpack.c.bf16 %v703_v25, %v701_v24  ;;  %v727_v24 = vld [vmem:[#allocation5 + $0x818] sm:$0xff]  ;;  %v3247_v25 = vpack.c.bf16 %v722_v22, %v720_v21  ;;  %v757_v21 = vld [vmem:[#allocation5 + $0x908] sm:$0xff] }
 0x191   : > { %3200 = vmatpush1.bf16.msra.mxu0 %v3199_v32  ;;  %1113 = vmatprep.mubr.f32.mxu0 %v428_v37  ;;  %v1385_v32 = vld [vmem:[#allocation7 + $0x28] sm:$0xff]  ;;  %v3249_v26 = vpack.c.bf16 %v727_v24, %v725_v23  ;;  %v759_v22 = vld [vmem:[#allocation5 + $0x918] sm:$0xff]  ;;  %v459_v24 = vld [vmem:[%s4509_s20 + $0x260] sm:$0xff] }
 0x192   : > { %3202 = vmatprep.subr.bf16.mxu0 %v3201_v34  ;;  %v702_v34 = vld [vmem:[#allocation5 + $0x750] sm:$0xff]  ;;  %v705_v37 = vld [vmem:[#allocation5 + $0x768] sm:$0xff]  ;;  %v3323_v39 = vpack.c.bf16 %v1385_v32, %v1384_v31  ;;  %3322 = vmatprep.subr.bf16.mxu1 %v3321_v30  ;;  %v731_v30 = vld [vmem:[#allocation5 + $0x838] sm:$0xff] }
 0x193   : > { %v389_v31 = vld [vmem:[%s4509_s20 + $0x30] sm:$0xff] }
 0x194   : > { %1114 = vmatmul.mubr.f32.gmra.mrb[8].mxu0 %v427_v41  ;;  %v704_v41 = vld [vmem:[#allocation5 + $0x760] sm:$0xff]  ;;  %3324 = vmatpush3.bf16.msra.mxu1 %v3323_v39 }
 0x195   : > { %3204 = vmatpush1.bf16.msra.mxu0 %v3203_v40  ;;  %1119 = vmatprep.mubr.f32.mxu0 %v438_v45  ;;  %v3227_v40 = vpack.c.bf16 %v702_v34, %v700_v29  ;;  %v3229_v45 = vpack.c.bf16 %v707_v38, %v705_v37  ;;  %v3231_v52 = vpack.c.bf16 %v706_v46, %v704_v41  ;;  %v729_v29 = vld [vmem:[#allocation5 + $0x828] sm:$0xff]  ;;  %v728_v34 = vld [vmem:[#allocation5 + $0x820] sm:$0xff]  ;;  %v735_v38 = vld [vmem:[#allocation5 + $0x858] sm:$0xff] }
 0x196   : > { %3206 = vmatprep.subr.bf16.mxu0 %v3205_v42  ;;  %v3325_v42 = vpack.c.bf16 %v1403_v36, %v1402_v35  ;;  %v730_v35 = vld [vmem:[#allocation5 + $0x830] sm:$0xff]  ;;  %v400_v36 = vld [vmem:[%s4509_s20 + $0x88] sm:$0xff]  ;;  %v739_v46 = vld [vmem:[#allocation5 + $0x878] sm:$0xff] }
 0x197   : > { %v733_v37 = vld [vmem:[#allocation5 + $0x848] sm:$0xff]  ;;  %v3255_v39 = vpack.c.bf16 %v730_v35, %v728_v34  ;;  %v762_v34 = vld [vmem:[#allocation5 + $0x930] sm:$0xff] }
 0x198   : > { %1120 = vmatmul.mubr.f32.gmra.mrb[10].mxu0 %v437_v49  ;;  %v709_v49 = vld [vmem:[#allocation5 + $0x788] sm:$0xff]  ;;  %3326 = vmatprep.subr.bf16.mxu1 %v3325_v42  ;;  %v3257_v41 = vpack.c.bf16 %v735_v38, %v733_v37  ;;  %v732_v42 = vld [vmem:[#allocation5 + $0x840] sm:$0xff] }
 0x199   : > { %3208 = vmatpush1.bf16.msra.mxu0 %v3207_v48  ;;  %1125 = vmatprep.mubr.f32.mxu0 %v448_v53  ;;  %v1405_v48 = vld [vmem:[#allocation7 + $0xc8] sm:$0xff]  ;;  %v708_v53 = vld [vmem:[#allocation5 + $0x780] sm:$0xff] }
 0x19a   : > { %3210 = vmatprep.subr.bf16.mxu0 %v3209_v50  ;;  %v711_v50 = vld [vmem:[#allocation5 + $0x798] sm:$0xff]  ;;  %v3329_v54 = vpack.c.bf16 %v1405_v48, %v1404_v47  ;;  %3328 = vmatpush3.bf16.msra.mxu1 %v3327_v51  ;;  %v3259_v47 = vpack.c.bf16 %v734_v43, %v732_v42  ;;  %v409_v48 = vld [vmem:[%s4509_s20 + $0xd0] sm:$0xff]  ;;  %v765_v35 = vld [vmem:[#allocation5 + $0x948] sm:$0xff] }
 0x19b   : > { %v738_v51 = vld [vmem:[#allocation5 + $0x870] sm:$0xff]  ;;  %v771_v42 = vld [vmem:[#allocation5 + $0x978] sm:$0xff] }
 0x19c   : > { %1126 = vmatmul.mubr.f32.gmra.mrb[12].mxu0 %v447_v57  ;;  %v3233_v57 = vpack.c.bf16 %v711_v50, %v709_v49  ;;  %3330 = vmatprep.subr.bf16.mxu1 %v3329_v54  ;;  %v736_v50 = vld [vmem:[#allocation5 + $0x860] sm:$0xff]  ;;  %v743_v54 = vld [vmem:[#allocation5 + $0x898] sm:$0xff] }
 0x19d   : > { %3212 = vmatpush1.bf16.msra.mxu0 %v3211_v56  ;;  %1131 = vmatprep.mubr.f32.mxu0 %v458_v61  ;;  %v1389_v56 = vld [vmem:[#allocation7 + $0x48] sm:$0xff] }
 0x19e   : > { %3214 = vmatprep.subr.bf16.mxu0 %v3213_v58  ;;  %v710_v58 = vld [vmem:[#allocation5 + $0x790] sm:$0xff]  ;;  %v713_v61 = vld [vmem:[#allocation5 + $0x7a8] sm:$0xff]  ;;  %v3331_v63 = vpack.c.bf16 %v1389_v56, %v1388_v55  ;;  %v3263_v55 = vpack.c.bf16 %v738_v51, %v736_v50  ;;  %v419_v56 = vld [vmem:[%s4509_s20 + $0x120] sm:$0xff] }
 0x19f   : > { %v772_v51 = vld [vmem:[#allocation5 + $0x980] sm:$0xff] }
 0x1a0   : > { %1132 = vmatmul.mubr.f32.gmra.mrb[14].mxu0 %v457_v1  ;;  %v712_v1 = vld [vmem:[#allocation5 + $0x7a0] sm:$0xff]  ;;  %3332 = vmatpush3.bf16.msra.mxu1 %v3331_v63 }
 0x1a1   : > { %3216 = vmatpush1.bf16.msra.mxu0 %v3215_v0  ;;  %1202 = vmatprep.mubr.f32.mxu0 %v390_v5  ;;  %v3235_v0 = vpack.c.bf16 %v710_v58, %v708_v53  ;;  %v3237_v5 = vpack.c.bf16 %v715_v62, %v713_v61  ;;  %v3239_v12 = vpack.c.bf16 %v714_v6, %v712_v1  ;;  %v741_v53 = vld [vmem:[#allocation5 + $0x888] sm:$0xff]  ;;  %v740_v58 = vld [vmem:[#allocation5 + $0x880] sm:$0xff]  ;;  %v747_v62 = vld [vmem:[#allocation5 + $0x8b8] sm:$0xff] }
 0x1a2   : > { %3218 = vmatprep.subr.bf16.mxu0 %v3217_v2  ;;  %v3333_v2 = vpack.c.bf16 %v1407_v60, %v1406_v59  ;;  %v742_v59 = vld [vmem:[#allocation5 + $0x890] sm:$0xff]  ;;  %v430_v60 = vld [vmem:[%s4509_s20 + $0x178] sm:$0xff]  ;;  %v745_v61 = vld [vmem:[#allocation5 + $0x8a8] sm:$0xff] }
 0x1a3   : > { %v3267_v63 = vpack.c.bf16 %v742_v59, %v740_v58  ;;  %v3269_v1 = vpack.c.bf16 %v747_v62, %v745_v61  ;;  %v751_v6 = vld [vmem:[#allocation5 + $0x8d8] sm:$0xff]  ;;  %v778_v58 = vld [vmem:[#allocation5 + $0x9b0] sm:$0xff]  ;;  %v781_v59 = vld [vmem:[#allocation5 + $0x9c8] sm:$0xff] }
 0x1a4   : > { %3334 = vmatprep.subr.bf16.mxu1 %v3333_v2  ;;  %v744_v2 = vld [vmem:[#allocation5 + $0x8a0] sm:$0xff] }
 0x1a5   : > { %3220 = vmatpush1.bf16.msra.mxu0 %v3219_v13  ;;  %v3337_v13 = vpack.c.bf16 %v1409_v8, %v1408_v7  ;;  %3336 = vmatpush3.bf16.msra.mxu1 %v3335_v11  ;;  %v3271_v7 = vpack.c.bf16 %v746_v3, %v744_v2  ;;  %v439_v8 = vld [vmem:[%s4509_s20 + $0x1c0] sm:$0xff]  ;;  %v750_v11 = vld [vmem:[#allocation5 + $0x8d0] sm:$0xff]  ;;  %v787_v2 = vld [vmem:[#allocation5 + $0x9f8] sm:$0xff] }
 0x1a6   : > { %3222 = vmatprep.subr.bf16.mxu0 %v3221_v18  ;;  %v723_v18 = vld [vmem:[#allocation5 + $0x7f8] sm:$0xff]  ;;  %v3275_v15 = vpack.c.bf16 %v750_v11, %v748_v10  ;;  %v401_v10 = vld [vmem:[%s4509_s20 + $0x90] sm:$0xff]  ;;  %v412_v11 = vld [vmem:[%s4509_s20 + $0xe8] sm:$0xff] }
 0x1a7   : > { %3338 = vmatprep.subr.bf16.mxu1 %v3337_v13  ;;  %v3245_v20 = vpack.c.bf16 %v723_v18, %v721_v17  ;;  %v753_v13 = vld [vmem:[#allocation5 + $0x8e8] sm:$0xff]  ;;  %v752_v18 = vld [vmem:[#allocation5 + $0x8e0] sm:$0xff] }
 0x1a9   : > { %3224 = vmatpush1.bf16.msra.mxu0 %v3223_v28  ;;  %v726_v28 = vld [vmem:[#allocation5 + $0x810] sm:$0xff] }
 0x1aa   : > { %3226 = vmatprep.subr.bf16.mxu0 %v3225_v33  ;;  %v3251_v32 = vpack.c.bf16 %v726_v28, %v724_v27  ;;  %v3253_v33 = vpack.c.bf16 %v731_v30, %v729_v29  ;;  %v758_v27 = vld [vmem:[#allocation5 + $0x910] sm:$0xff]  ;;  %v392_v28 = vld [vmem:[%s4509_s20 + $0x48] sm:$0xff]  ;;  %v763_v30 = vld [vmem:[#allocation5 + $0x938] sm:$0xff] }
 0x1ab   : > { %v761_v29 = vld [vmem:[#allocation5 + $0x928] sm:$0xff] }
 0x1ad   : > { %3228 = vmatpush1.bf16.msra.mxu0 %v3227_v40  ;;  %v399_v40 = vld [vmem:[%s4509_s20 + $0x80] sm:$0xff] }
 0x1ae   : > { %3230 = vmatprep.subr.bf16.mxu0 %v3229_v45  ;;  %v737_v45 = vld [vmem:[#allocation5 + $0x868] sm:$0xff] }
 0x1af   : > { %v3261_v49 = vpack.c.bf16 %v739_v46, %v737_v45  ;;  %v768_v45 = vld [vmem:[#allocation5 + $0x960] sm:$0xff]  ;;  %v770_v46 = vld [vmem:[#allocation5 + $0x970] sm:$0xff] }
 0x1b1   : > { %3232 = vmatpush1.bf16.msra.mxu0 %v3231_v52  ;;  %v420_v52 = vld [vmem:[%s4509_s20 + $0x128] sm:$0xff] }
 0x1b2   : > { %3234 = vmatprep.subr.bf16.mxu0 %v3233_v57  ;;  %v3265_v57 = vpack.c.bf16 %v743_v54, %v741_v53  ;;  %v777_v53 = vld [vmem:[#allocation5 + $0x9a8] sm:$0xff]  ;;  %v779_v54 = vld [vmem:[#allocation5 + $0x9b8] sm:$0xff] }
 0x1b5   : > { %3236 = vmatpush1.bf16.msra.mxu0 %v3235_v0  ;;  %v429_v0 = vld [vmem:[%s4509_s20 + $0x170] sm:$0xff] }
 0x1b6   : > { %3238 = vmatprep.subr.bf16.mxu0 %v3237_v5  ;;  %v749_v5 = vld [vmem:[#allocation5 + $0x8c8] sm:$0xff] }
 0x1b7   : > { %v3273_v9 = vpack.c.bf16 %v751_v6, %v749_v5  ;;  %v784_v5 = vld [vmem:[#allocation5 + $0x9e0] sm:$0xff]  ;;  %v786_v6 = vld [vmem:[#allocation5 + $0x9f0] sm:$0xff] }
 0x1b9   : > { %3240 = vmatpush1.bf16.msra.mxu0 %v3239_v12  ;;  %v450_v12 = vld [vmem:[%s4509_s20 + $0x218] sm:$0xff] }
 0x1ba   : > { %3242 = vmatprep.subr.bf16.mxu0 %v3241_v14  ;;  %v755_v14 = vld [vmem:[#allocation5 + $0x8f8] sm:$0xff] }
 0x1bb   : > { %v3277_v17 = vpack.c.bf16 %v755_v14, %v753_v13  ;;  %v422_v13 = vld [vmem:[%s4509_s20 + $0x138] sm:$0xff]  ;;  %v421_v14 = vld [vmem:[%s4509_s20 + $0x130] sm:$0xff] }
 0x1bd   : > { %3244 = vmatpush1.bf16.msra.mxu0 %v3243_v19  ;;  %v754_v19 = vld [vmem:[#allocation5 + $0x8f0] sm:$0xff] }
 0x1be   : > { %3246 = vmatprep.subr.bf16.mxu0 %v3245_v20  ;;  %v460_v20 = vld [vmem:[%s4509_s20 + $0x268] sm:$0xff]  ;;  %v3279_v23 = vpack.c.bf16 %v754_v19, %v752_v18  ;;  %v441_v18 = vld [vmem:[%s4509_s20 + $0x1d0] sm:$0xff] }
 0x1bf   : > { %v452_v19 = vld [vmem:[%s4509_s20 + $0x228] sm:$0xff] }
 0x1c1   : > { %3248 = vmatpush1.bf16.msra.mxu0 %v3247_v25  ;;  %v3281_v25 = vpack.c.bf16 %v759_v22, %v757_v21  ;;  %v462_v21 = vld [vmem:[%s4509_s20 + $0x278] sm:$0xff]  ;;  %v461_v22 = vld [vmem:[%s4509_s20 + $0x270] sm:$0xff] }
 0x1c2   : > { %3250 = vmatprep.subr.bf16.mxu0 %v3249_v26  ;;  %v756_v26 = vld [vmem:[#allocation5 + $0x900] sm:$0xff] }
 0x1c4   : > { %1203 = vmatmul.mubr.f32.vlgmr.msra.gmra.mrb[0].mxu0 %v389_v31  ;;  %v3283_v31 = vpack.c.bf16 %v758_v27, %v756_v26  ;;  %v1410_v26 = vld [vmem:[#allocation7 + $0xf0] sm:$0xff]  ;;  %v1411_v27 = vld [vmem:[#allocation7 + $0xf8] sm:$0xff] }
 0x1c5   : > { %3252 = vmatpush1.bf16.msra.mxu0 %v3251_v32  ;;  %1208 = vmatprep.mubr.f32.mxu0 %v400_v36  ;;  %v3285_v32 = vpack.c.bf16 %v763_v30, %v761_v29  ;;  %v767_v36 = vld [vmem:[#allocation5 + $0x958] sm:$0xff]  ;;  %v1394_v29 = vld [vmem:[#allocation7 + $0x70] sm:$0xff] }
 0x1c6   : > { %3254 = vmatprep.subr.bf16.mxu0 %v3253_v33  ;;  %v760_v33 = vld [vmem:[#allocation5 + $0x920] sm:$0xff]  ;;  %v3289_v38 = vpack.c.bf16 %v767_v36, %v765_v35  ;;  %v1395_v30 = vld [vmem:[#allocation7 + $0x78] sm:$0xff]  ;;  %v789_v35 = vlaneseq }
 0x1c7   : > { %v3287_v37 = vpack.c.bf16 %v762_v34, %v760_v33  ;;  %v1534_v33 = vld [vmem:[#allocation8 + $0x18] sm:$0xff] }
 0x1c8   : > { %1209 = vmatmul.mubr.f32.gmra.mrb[2].mxu0 %v399_v40  ;;  %v766_v40 = vld [vmem:[#allocation5 + $0x950] sm:$0xff]  ;;  %v4607_v36 = vshrl.u32 %v789_v35, 7 }
 0x1c9   : > { %3256 = vmatpush1.bf16.msra.mxu0 %v3255_v39  ;;  %1214 = vmatprep.mubr.f32.mxu0 %v410_v44  ;;  %v764_v39 = vld [vmem:[#allocation5 + $0x940] sm:$0xff] }
 0x1ca   : > { %3258 = vmatprep.subr.bf16.mxu0 %v3257_v41  ;;  %v769_v41 = vld [vmem:[#allocation5 + $0x968] sm:$0xff]  ;;  %v3291_v43 = vpack.c.bf16 %v766_v40, %v764_v39  ;;  %5215 = vst [vmem:[#allocation22_spill] sm:$0xff] %v4607_v36  ;;  %v4613_v39 = vsub.s32 1, %v4607_v36 }
 0x1cb   : > { %v3293_v44 = vpack.c.bf16 %v771_v42, %v769_v41 }
 0x1cc   : > { %1215 = vmatmul.mubr.f32.gmra.mrb[4].mxu0 %v409_v48  ;;  %v775_v48 = vld [vmem:[#allocation5 + $0x998] sm:$0xff] }
 0x1cd   : > { %3260 = vmatpush1.bf16.msra.mxu0 %v3259_v47  ;;  %1220 = vmatprep.mubr.f32.mxu0 %v420_v52  ;;  %v773_v47 = vld [vmem:[#allocation5 + $0x988] sm:$0xff]  ;;  %v774_v52 = vld [vmem:[#allocation5 + $0x990] sm:$0xff] }
 0x1ce   : > { %3262 = vmatprep.subr.bf16.mxu0 %v3261_v49  ;;  %v3295_v49 = vpack.c.bf16 %v770_v46, %v768_v45  ;;  %v3297_v50 = vpack.c.bf16 %v775_v48, %v773_v47  ;;  %v1531_v45 = vld [vmem:[#allocation8] sm:$0xff]  ;;  %v1533_v46 = vld [vmem:[#allocation8 + $0x10] sm:$0xff]  ;;  %v1536_v48 = vld [vmem:[#allocation8 + $0x28] sm:$0xff] }
 0x1d0   : > { %1221 = vmatmul.mubr.f32.gmra.mrb[6].mxu0 %v419_v56  ;;  %v3301_v56 = vpack.c.bf16 %v779_v54, %v777_v53 }
 0x1d1   : > { %3264 = vmatpush1.bf16.msra.mxu0 %v3263_v55  ;;  %1226 = vmatprep.mubr.f32.mxu0 %v430_v60  ;;  %v3299_v55 = vpack.c.bf16 %v774_v52, %v772_v51  ;;  %v783_v60 = vld [vmem:[#allocation5 + $0x9d8] sm:$0xff]  ;;  %v3347_v52 = vpack.c.bf16 %v1533_v46, %v1531_v45  ;;  %v1551_v46 = vld [vmem:[#allocation8 + $0xa0] sm:$0xff] }
 0x1d2   : > { %3266 = vmatprep.subr.bf16.mxu0 %v3265_v57  ;;  %v776_v57 = vld [vmem:[#allocation5 + $0x9a0] sm:$0xff]  ;;  %v3305_v62 = vpack.c.bf16 %v783_v60, %v781_v59  ;;  %v1540_v60 = vld [vmem:[#allocation8 + $0x48] sm:$0xff] }
 0x1d3   : > { %v3303_v61 = vpack.c.bf16 %v778_v58, %v776_v57  ;;  %v1535_v57 = vld [vmem:[#allocation8 + $0x20] sm:$0xff]  ;;  %v1537_v58 = vld [vmem:[#allocation8 + $0x30] sm:$0xff] }
 0x1d4   : > { %1227 = vmatmul.mubr.f32.gmra.mrb[8].mxu0 %v429_v0  ;;  %v782_v0 = vld [vmem:[#allocation5 + $0x9d0] sm:$0xff] }
 0x1d5   : > { %3268 = vmatpush1.bf16.msra.mxu0 %v3267_v63  ;;  %1232 = vmatprep.mubr.f32.mxu0 %v440_v4  ;;  %v780_v63 = vld [vmem:[#allocation5 + $0x9c0] sm:$0xff] }
 0x1d6   : > { %3270 = vmatprep.subr.bf16.mxu0 %v3269_v1  ;;  %v785_v1 = vld [vmem:[#allocation5 + $0x9e8] sm:$0xff]  ;;  %v3307_v3 = vpack.c.bf16 %v782_v0, %v780_v63  ;;  %v3351_v0 = vpack.c.bf16 %v1537_v58, %v1535_v57  ;;  %v1555_v58 = vld [vmem:[#allocation8 + $0xc0] sm:$0xff] }
 0x1d7   : > { %v3309_v4 = vpack.c.bf16 %v787_v2, %v785_v1 }
 0x1d8   : > { %1233 = vmatmul.mubr.f32.gmra.mrb[10].mxu0 %v439_v8  ;;  %v391_v8 = vld [vmem:[%s4509_s20 + $0x40] sm:$0xff] }
 0x1d9   : > { %3272 = vmatpush1.bf16.msra.mxu0 %v3271_v7  ;;  %1238 = vmatprep.mubr.f32.mxu0 %v450_v12  ;;  %v3311_v7 = vpack.c.bf16 %v786_v6, %v784_v5  ;;  %v411_v12 = vld [vmem:[%s4509_s20 + $0xe0] sm:$0xff]  ;;  %v1541_v6 = vld [vmem:[#allocation8 + $0x50] sm:$0xff] }
 0x1da   : > { %3274 = vmatprep.subr.bf16.mxu0 %v3273_v9  ;;  %v402_v9 = vld [vmem:[%s4509_s20 + $0x98] sm:$0xff]  ;;  %v1539_v5 = vld [vmem:[#allocation8 + $0x40] sm:$0xff] }
 0x1dc   : > { %1239 = vmatmul.mubr.f32.gmra.mrb[12].mxu0 %v449_v16  ;;  %v431_v16 = vld [vmem:[%s4509_s20 + $0x180] sm:$0xff] }
 0x1dd   : > { %3276 = vmatpush1.bf16.msra.mxu0 %v3275_v15  ;;  %1244 = vmatprep.mubr.f32.mxu0 %v460_v20  ;;  %v432_v15 = vld [vmem:[%s4509_s20 + $0x188] sm:$0xff]  ;;  %v451_v20 = vld [vmem:[%s4509_s20 + $0x220] sm:$0xff] }
 0x1de   : > { %3278 = vmatprep.subr.bf16.mxu0 %v3277_v17  ;;  %v442_v17 = vld [vmem:[%s4509_s20 + $0x1d8] sm:$0xff] }
 0x1e0   : > { %1245 = vmatmul.mubr.f32.gmra.mrb[14].mxu0 %v459_v24  ;;  %v1393_v24 = vld [vmem:[#allocation7 + $0x68] sm:$0xff] }
 0x1e1   : > { %3280 = vmatpush1.bf16.msra.mxu0 %v3279_v23  ;;  %1315 = vmatprep.mubr.f32.mxu0 %v392_v28  ;;  %v1392_v23 = vld [vmem:[#allocation7 + $0x60] sm:$0xff]  ;;  %v3341_v28 = vpack.c.bf16 %v1411_v27, %v1410_v26 }
 0x1e2   : > { %3282 = vmatprep.subr.bf16.mxu0 %v3281_v25  ;;  %v3339_v25 = vpack.c.bf16 %v1393_v24, %v1392_v23 }
 0x1e4   : > { %3340 = vmatpush3.bf16.msra.mxu1 %v3339_v25 }
 0x1e5   : > { %3284 = vmatpush1.bf16.msra.mxu0 %v3283_v31  ;;  %v3343_v31 = vpack.c.bf16 %v1395_v30, %v1394_v29  ;;  %3342 = vmatprep.subr.bf16.mxu1 %v3341_v28  ;;  %v1547_v29 = vld [vmem:[#allocation8 + $0x80] sm:$0xff]  ;;  %v1549_v30 = vld [vmem:[#allocation8 + $0x90] sm:$0xff] }
 0x1e6   : > { %3286 = vmatprep.subr.bf16.mxu0 %v3285_v32  ;;  %v1532_v32 = vld [vmem:[#allocation8 + $0x8] sm:$0xff] }
 0x1e7   : > { %v3345_v34 = vpack.c.bf16 %v1534_v33, %v1532_v32  ;;  %v1552_v32 = vld [vmem:[#allocation8 + $0xa8] sm:$0xff]  ;;  %v1554_v33 = vld [vmem:[#allocation8 + $0xb8] sm:$0xff] }
 0x1e8   : > { %3344 = vmatpush3.bf16.msra.mxu1 %v3343_v31  ;;  %v3365_v45 = vpack.c.bf16 %v1554_v33, %v1552_v32  ;;  %v1772_v32 = vld [vmem:[#allocation10 + $0x228] sm:$0xff]  ;;  %v1782_v33 = vld [vmem:[#allocation10 + $0x278] sm:$0xff] }
 0x1e9   : > { %3288 = vmatpush1.bf16.msra.mxu0 %v3287_v37  ;;  %3346 = vmatprep.subr.bf16.mxu1 %v3345_v34  ;;  %v4610_v37 = vsub.s32 0, %v4607_v36  ;;  %v1836_v36 = vld [vmem:[#allocation10 + $0x428] sm:$0xff] }
 0x1ea   : > { %3290 = vmatprep.subr.bf16.mxu0 %v3289_v38  ;;  %v463_v38 = vld [vmem:[#allocation11] sm:$0x3] }
 0x1eb   : > { %v4616_v40 = vrot.slane %v463_v38, %v4610_v37  ;;  %v4619_v41 = vrot.slane %v463_v38, %v4613_v39  ;;  %v3363_v38 = vpack.c.bf16 %v1549_v30, %v1547_v29  ;;  %v1761_v29 = vld [vmem:[#allocation10 + $0x1d0] sm:$0xff] }
 0x1ed   : > { %3292 = vmatpush1.bf16.msra.mxu0 %v3291_v43 }
 0x1ee   : > { %3294 = vmatprep.subr.bf16.mxu0 %v3293_v44 }
 0x1f1   : > { %3296 = vmatpush1.bf16.msra.mxu0 %v3295_v49  ;;  %v1538_v49 = vld [vmem:[#allocation8 + $0x38] sm:$0xff] }
 0x1f2   : > { %3298 = vmatprep.subr.bf16.mxu0 %v3297_v50 }
 0x1f5   : > { %3300 = vmatpush1.bf16.msra.mxu0 %v3299_v55 }
 0x1f6   : > { %3302 = vmatprep.subr.bf16.mxu0 %v3301_v56  ;;  %v3349_v56 = vpack.c.bf16 %v1538_v49, %v1536_v48  ;;  %v1556_v49 = vld [vmem:[#allocation8 + $0xc8] sm:$0xff] }
 0x1f9   : > { %3304 = vmatpush1.bf16.msra.mxu0 %v3303_v61  ;;  %v1542_v61 = vld [vmem:[#allocation8 + $0x58] sm:$0xff] }
 0x1fa   : > { %3306 = vmatprep.subr.bf16.mxu0 %v3305_v62 }
 0x1fd   : > { %3308 = vmatpush1.bf16.msra.mxu0 %v3307_v3 }
 0x1fe   : > { %3310 = vmatprep.subr.bf16.mxu0 %v3309_v4  ;;  %v3353_v4 = vpack.c.bf16 %v1542_v61, %v1540_v60 }
 0x201   : > { %3312 = vmatpush1.bf16.msra.mxu0 %v3311_v7 }
 0x204   : > { %1316 = vmatmul.mubr.f32.vlgmr.msra.gmra.mrb[0].mxu0 %v391_v8  ;;  %v1544_v8 = vld [vmem:[#allocation8 + $0x68] sm:$0xff] }
 0x205   : > { %1321 = vmatprep.mubr.f32.mxu0 %v402_v9  ;;  %v1546_v9 = vld [vmem:[#allocation8 + $0x78] sm:$0xff] }
 0x208   : > { %1322 = vmatmul.mubr.f32.gmra.mrb[2].mxu0 %v401_v10 }
 0x209   : > { %1327 = vmatprep.mubr.f32.mxu0 %v412_v11 }
 0x20c   : > { %1328 = vmatmul.mubr.f32.gmra.mrb[4].mxu0 %v411_v12  ;;  %v3355_v12 = vpack.c.bf16 %v1541_v6, %v1539_v5  ;;  %v1560_v6 = vld [vmem:[#allocation8 + $0xe8] sm:$0xff] }
 0x20d   : > { %1333 = vmatprep.mubr.f32.mxu0 %v422_v13 }
 0x210   : > { %1334 = vmatmul.mubr.f32.gmra.mrb[6].mxu0 %v421_v14 }
 0x211   : > { %1339 = vmatprep.mubr.f32.mxu0 %v432_v15 }
 0x214   : > { %1340 = vmatmul.mubr.f32.gmra.mrb[8].mxu0 %v431_v16  ;;  %v3357_v16 = vpack.c.bf16 %v1546_v9, %v1544_v8  ;;  %v1559_v9 = vld [vmem:[#allocation8 + $0xe0] sm:$0xff] }
 0x215   : > { %1345 = vmatprep.mubr.f32.mxu0 %v442_v17  ;;  %v1543_v17 = vld [vmem:[#allocation8 + $0x60] sm:$0xff] }
 0x218   : > { %1346 = vmatmul.mubr.f32.gmra.mrb[10].mxu0 %v441_v18  ;;  %v1545_v18 = vld [vmem:[#allocation8 + $0x70] sm:$0xff] }
 0x219   : > { %1351 = vmatprep.mubr.f32.mxu0 %v452_v19  ;;  %v3359_v24 = vpack.c.bf16 %v1545_v18, %v1543_v17  ;;  %v1711_v17 = vld [vmem:[#allocation10 + $0x40] sm:$0xff]  ;;  %v1721_v18 = vld [vmem:[#allocation10 + $0x90] sm:$0xff] }
 0x21c   : > { %1352 = vmatmul.mubr.f32.gmra.mrb[12].mxu0 %v451_v20  ;;  %v1548_v20 = vld [vmem:[#allocation8 + $0x88] sm:$0xff] }
 0x21d   : > { %1357 = vmatprep.mubr.f32.mxu0 %v462_v21  ;;  %v1550_v21 = vld [vmem:[#allocation8 + $0x98] sm:$0xff] }
 0x21e   : > { %v3361_v28 = vpack.c.bf16 %v1550_v21, %v1548_v20  ;;  %v1732_v20 = vld [vmem:[#allocation10 + $0xe8] sm:$0xff]  ;;  %v1742_v21 = vld [vmem:[#allocation10 + $0x138] sm:$0xff] }
 0x220   : > { %1358 = vmatmul.mubr.f32.gmra.mrb[14].mxu0 %v461_v22 }
 0x2d7   : > { %v1317_v42 = vpop.f32.mrb[0].mxu0 }
 0x2d8   : > { %v3729_v43 = vadd.f32 %v1317_v42, %v4616_v40  ;;  %v1319_v44 = vpop.f32.mrb[1].mxu0 }
 0x2d9   : > { %v3730_v47 = vadd.f32 %v1319_v44, %v4619_v41 }
 0x2da   : > { %v1364_v53 = vmax.f32 %v3729_v43, 0.0 }
 0x2db   : > { %v1323_v50 = vpop.f32.mrb[2].mxu0  ;;  %v1365_v51 = vmax.f32 %v3730_v47, 0.0  ;;  %v1553_v47 = vld [vmem:[#allocation8 + $0xb0] sm:$0xff] }
 0x2dc   : > { %v3731_v54 = vadd.f32 %v1323_v50, %v4616_v40  ;;  %v1325_v55 = vpop.f32.mrb[3].mxu0  ;;  %v1558_v50 = vld [vmem:[#allocation8 + $0xd8] sm:$0xff] }
 0x2dd   : > { %v3732_v59 = vadd.f32 %v1325_v55, %v4619_v41  ;;  %1482 = vmatprep.mubr.f32.mxu1 %v1365_v51  ;;  %v3369_v57 = vpack.c.bf16 %v1558_v50, %v1556_v49  ;;  %v1822_v49 = vld [vmem:[#allocation10 + $0x3b8] sm:$0xff] }
 0x2de   : > { %1483 = vmatmul.mubr.f32.vlgmr.msra.gmra.mrb[0].mxu1 %v1364_v53  ;;  %v1366_v1 = vmax.f32 %v3731_v54, 0.0  ;;  %v3367_v53 = vpack.c.bf16 %v1553_v47, %v1551_v46  ;;  %v1791_v46 = vld [vmem:[#allocation10 + $0x2c0] sm:$0xff]  ;;  %v1801_v47 = vld [vmem:[#allocation10 + $0x310] sm:$0xff] }
 0x2df   : > { %v1367_v62 = vmax.f32 %v3732_v59, 0.0  ;;  %v1329_v63 = vpop.f32.mrb[4].mxu0  ;;  %3348 = vmatpush1.bf16.msra.mxu1 %v3347_v52  ;;  %v1557_v59 = vld [vmem:[#allocation8 + $0xd0] sm:$0xff]  ;;  %v4664_v50 = vpack.c.bf16 %v1801_v47, %v1791_v46  ;;  %v1982_v46 = vld [vmem:[#allocation10 + $0x8b8] sm:$0xff] }
 0x2e0   : > { %v3733_v2 = vadd.f32 %v1329_v63, %v4616_v40  ;;  %v1331_v3 = vpop.f32.mrb[5].mxu0  ;;  %3350 = vmatprep.subr.bf16.mxu1 %v3349_v56  ;;  %v3371_v63 = vpack.c.bf16 %v1557_v59, %v1555_v58  ;;  %v1831_v58 = vld [vmem:[#allocation10 + $0x400] sm:$0xff]  ;;  %v1841_v59 = vld [vmem:[#allocation10 + $0x450] sm:$0xff] }
 0x2e1   : > { %v3734_v7 = vadd.f32 %v1331_v3, %v4619_v41  ;;  %1487 = vmatprep.mubr.f32.mxu1 %v1367_v62 }
 0x2e2   : > { %1488 = vmatmul.mubr.f32.gmra.mrb[2].mxu1 %v1366_v1  ;;  %v1368_v13 = vmax.f32 %v3733_v2, 0.0 }
 0x2e3   : > { %v1369_v10 = vmax.f32 %v3734_v7, 0.0  ;;  %v1335_v11 = vpop.f32.mrb[6].mxu0  ;;  %3352 = vmatpush1.bf16.msra.mxu1 %v3351_v0  ;;  %v1562_v7 = vld [vmem:[#allocation8 + $0xf8] sm:$0xff] }
 0x2e4   : > { %v3735_v14 = vadd.f32 %v1335_v11, %v4616_v40  ;;  %v1337_v15 = vpop.f32.mrb[7].mxu0  ;;  %3354 = vmatprep.subr.bf16.mxu1 %v3353_v4  ;;  %v3373_v8 = vpack.c.bf16 %v1562_v7, %v1560_v6  ;;  %v1871_v6 = vld [vmem:[#allocation10 + $0x540] sm:$0xff]  ;;  %v1881_v7 = vld [vmem:[#allocation10 + $0x590] sm:$0xff] }
 0x2e5   : > { %v3736_v19 = vadd.f32 %v1337_v15, %v4619_v41  ;;  %1492 = vmatprep.mubr.f32.mxu1 %v1369_v10  ;;  %v1561_v10 = vld [vmem:[#allocation8 + $0xf0] sm:$0xff]  ;;  %v1722_v15 = vld [vmem:[#allocation10 + $0x98] sm:$0xff] }
 0x2e6   : > { %1493 = vmatmul.mubr.f32.gmra.mrb[4].mxu1 %v1368_v13  ;;  %v1370_v25 = vmax.f32 %v3735_v14, 0.0  ;;  %v3375_v11 = vpack.c.bf16 %v1561_v10, %v1559_v9  ;;  %v1712_v14 = vld [vmem:[#allocation10 + $0x48] sm:$0xff]  ;;  %v1902_v9 = vld [vmem:[#allocation10 + $0x638] sm:$0xff]  ;;  %v4688_v10 = vpack.c.bf16 %v1881_v7, %v1871_v6 }
 0x2e7   : > { %v1371_v22 = vmax.f32 %v3736_v19, 0.0  ;;  %v1341_v23 = vpop.f32.mrb[8].mxu0  ;;  %3356 = vmatpush1.bf16.msra.mxu1 %v3355_v12  ;;  %v1704_v12 = vld [vmem:[#allocation10 + $0x8] sm:$0xff]  ;;  %v4640_v19 = vpack.c.bf16 %v1721_v18, %v1711_v17  ;;  %v1911_v18 = vld [vmem:[#allocation10 + $0x680] sm:$0xff] }
 0x2e8   : > { %v3737_v26 = vadd.f32 %v1341_v23, %v4616_v40  ;;  %v1343_v27 = vpop.f32.mrb[9].mxu0  ;;  %3358 = vmatprep.subr.bf16.mxu1 %v3357_v16  ;;  %v4638_v16 = vpack.c.bf16 %v1722_v15, %v1712_v14  ;;  %v4644_v23 = vpack.c.bf16 %v1742_v21, %v1732_v20  ;;  %v1922_v14 = vld [vmem:[#allocation10 + $0x6d8] sm:$0xff]  ;;  %v1921_v20 = vld [vmem:[#allocation10 + $0x6d0] sm:$0xff]  ;;  %v1932_v21 = vld [vmem:[#allocation10 + $0x728] sm:$0xff] }
 0x2e9   : > { %v3738_v31 = vadd.f32 %v1343_v27, %v4619_v41  ;;  %1497 = vmatprep.mubr.f32.mxu1 %v1371_v22  ;;  %v1731_v22 = vld [vmem:[#allocation10 + $0xe0] sm:$0xff]  ;;  %v1762_v27 = vld [vmem:[#allocation10 + $0x1d8] sm:$0xff] }
 0x2ea   : > { %1498 = vmatmul.mubr.f32.gmra.mrb[6].mxu1 %v1370_v25  ;;  %v1372_v42 = vmax.f32 %v3737_v26, 0.0  ;;  %3634 = vmatprep.subr.bf16.mxu0 %v4638_v16  ;;  %v1752_v26 = vld [vmem:[#allocation10 + $0x188] sm:$0xff] }
 0x2eb   : > { %v1373_v34 = vmax.f32 %v3738_v31, 0.0  ;;  %v1347_v35 = vpop.f32.mrb[10].mxu0  ;;  %3360 = vmatpush1.bf16.msra.mxu1 %v3359_v24  ;;  %3636 = vmatpush1.bf16.msra.mxu0 %v4640_v19  ;;  %v1741_v24 = vld [vmem:[#allocation10 + $0x130] sm:$0xff]  ;;  %v4649_v30 = vpack.c.bf16 %v1762_v27, %v1752_v26  ;;  %v1931_v27 = vld [vmem:[#allocation10 + $0x720] sm:$0xff] }
 0x2ec   : > { %v3739_v43 = vadd.f32 %v1347_v35, %v4616_v40  ;;  %v1349_v44 = vpop.f32.mrb[11].mxu0  ;;  %3362 = vmatprep.subr.bf16.mxu1 %v3361_v28  ;;  %v4646_v25 = vpack.c.bf16 %v1741_v24, %v1731_v22  ;;  %3638 = vmatprep.subr.bf16.mxu0 %v4644_v23  ;;  %v1751_v28 = vld [vmem:[#allocation10 + $0x180] sm:$0xff]  ;;  %v1942_v22 = vld [vmem:[#allocation10 + $0x778] sm:$0xff]  ;;  %v4700_v24 = vpack.c.bf16 %v1921_v20, %v1911_v18  ;;  %v1744_v18 = vld [vmem:[#allocation10 + $0x148] sm:$0xff] }
 0x2ed   : > { %v3740_v48 = vadd.f32 %v1349_v44, %v4619_v41  ;;  %1502 = vmatprep.mubr.f32.mxu1 %v1373_v34  ;;  %v4652_v31 = vpack.c.bf16 %v1761_v29, %v1751_v28  ;;  %v4655_v34 = vpack.c.bf16 %v1782_v33, %v1772_v32  ;;  %v1771_v35 = vld [vmem:[#allocation10 + $0x220] sm:$0xff]  ;;  %v4703_v26 = vpack.c.bf16 %v1942_v22, %v1932_v21  ;;  %v1941_v28 = vld [vmem:[#allocation10 + $0x770] sm:$0xff]  ;;  %v1952_v29 = vld [vmem:[#allocation10 + $0x7c8] sm:$0xff] }
 0x2ee   : > { %1503 = vmatmul.mubr.f32.gmra.mrb[8].mxu1 %v1372_v42  ;;  %v1374_v54 = vmax.f32 %v3739_v43, 0.0  ;;  %v1792_v42 = vld [vmem:[#allocation10 + $0x2c8] sm:$0xff]  ;;  %v1802_v43 = vld [vmem:[#allocation10 + $0x318] sm:$0xff]  ;;  %v4706_v33 = vpack.c.bf16 %v1941_v28, %v1931_v27 }
 0x2ef   : > { %v1375_v51 = vmax.f32 %v3740_v48, 0.0  ;;  %v1353_v52 = vpop.f32.mrb[12].mxu0  ;;  %3364 = vmatpush1.bf16.msra.mxu1 %v3363_v38  ;;  %3640 = vmatpush1.bf16.msra.mxu0 %v4646_v25  ;;  %v1781_v38 = vld [vmem:[#allocation10 + $0x270] sm:$0xff]  ;;  %v1812_v48 = vld [vmem:[#allocation10 + $0x368] sm:$0xff]  ;;  %v1962_v32 = vld [vmem:[#allocation10 + $0x818] sm:$0xff] }
 0x2f0   : > { %v3741_v55 = vadd.f32 %v1353_v52, %v4616_v40  ;;  %v1355_v56 = vpop.f32.mrb[13].mxu0  ;;  %3366 = vmatprep.subr.bf16.mxu1 %v3365_v45  ;;  %3642 = vmatprep.subr.bf16.mxu0 %v4649_v30  ;;  %v4658_v44 = vpack.c.bf16 %v1781_v38, %v1771_v35  ;;  %v4661_v45 = vpack.c.bf16 %v1802_v43, %v1792_v42  ;;  %v1811_v52 = vld [vmem:[#allocation10 + $0x360] sm:$0xff]  ;;  %v1961_v42 = vld [vmem:[#allocation10 + $0x810] sm:$0xff]  ;;  %v1972_v43 = vld [vmem:[#allocation10 + $0x868] sm:$0xff] }
 0x2f1   : > { %v3742_v60 = vadd.f32 %v1355_v56, %v4619_v41  ;;  %1507 = vmatprep.mubr.f32.mxu1 %v1375_v51  ;;  %v4667_v51 = vpack.c.bf16 %v1822_v49, %v1812_v48  ;;  %v4709_v35 = vpack.c.bf16 %v1962_v32, %v1952_v29  ;;  %v1951_v38 = vld [vmem:[#allocation10 + $0x7c0] sm:$0xff]  ;;  %v4715_v48 = vpack.c.bf16 %v1982_v46, %v1972_v43  ;;  %v1754_v20 = vld [vmem:[#allocation10 + $0x198] sm:$0xff]  ;;  %v1764_v43 = vld [vmem:[#allocation10 + $0x1e8] sm:$0xff] }
 0x2f2   : > { %1508 = vmatmul.mubr.f32.gmra.mrb[10].mxu1 %v1374_v54  ;;  %v1376_v0 = vmax.f32 %v3741_v55, 0.0  ;;  %v1832_v54 = vld [vmem:[#allocation10 + $0x408] sm:$0xff]  ;;  %v1842_v55 = vld [vmem:[#allocation10 + $0x458] sm:$0xff]  ;;  %v4712_v47 = vpack.c.bf16 %v1961_v42, %v1951_v38  ;;  %v1971_v49 = vld [vmem:[#allocation10 + $0x860] sm:$0xff]  ;;  %v3385_v29 = vpack.c.bf16 %v1754_v20, %v1744_v18 }
 0x2f3   : > { %v1377_v61 = vmax.f32 %v3742_v60, 0.0  ;;  %v1359_v62 = vpop.f32.mrb[14].mxu0  ;;  %3368 = vmatpush1.bf16.msra.mxu1 %v3367_v53  ;;  %3644 = vmatpush1.bf16.msra.mxu0 %v4652_v31  ;;  %v1821_v53 = vld [vmem:[#allocation10 + $0x3b0] sm:$0xff]  ;;  %v1852_v60 = vld [vmem:[#allocation10 + $0x4a8] sm:$0xff]  ;;  %5216 = vst [vmem:[#allocation23_spill] sm:$0xff] %v4715_v48  ;;  %v1743_v32 = vld [vmem:[#allocation10 + $0x140] sm:$0xff] }
 0x2f4   : > { %v3743_v1 = vadd.f32 %v1359_v62, %v4616_v40  ;;  %v1361_v2 = vpop.f32.mrb[15].mxu0  ;;  %3370 = vmatprep.subr.bf16.mxu1 %v3369_v57  ;;  %v4220_v40 = vmov 0.0   ;;  %3646 = vmatprep.subr.bf16.mxu0 %v4655_v34  ;;  %v4670_v56 = vpack.c.bf16 %v1821_v53, %v1811_v52  ;;  %v4673_v57 = vpack.c.bf16 %v1842_v55, %v1832_v54  ;;  %v1981_v52 = vld [vmem:[#allocation10 + $0x8b0] sm:$0xff]  ;;  %v1992_v53 = vld [vmem:[#allocation10 + $0x908] sm:$0xff]  ;;  %v2002_v54 = vld [vmem:[#allocation10 + $0x958] sm:$0xff] }
 0x2f5   : > { %v3744_v3 = vadd.f32 %v1361_v2, %v4619_v41  ;;  %1512 = vmatprep.mubr.f32.mxu1 %v1377_v61  ;;  %v1714_v41 = vld [vmem:[#allocation10 + $0x58] sm:$0xff]  ;;  %v4676_v62 = vpack.c.bf16 %v1841_v59, %v1831_v58  ;;  %v1872_v2 = vld [vmem:[#allocation10 + $0x548] sm:$0xff]  ;;  %v4718_v55 = vpack.c.bf16 %v1981_v52, %v1971_v49  ;;  %v4721_v58 = vpack.c.bf16 %v2002_v54, %v1992_v53  ;;  %v1753_v38 = vld [vmem:[#allocation10 + $0x190] sm:$0xff] }
 0x2f6   : > { %1513 = vmatmul.mubr.f32.gmra.mrb[12].mxu1 %v1376_v0  ;;  %v1378_v5 = vmax.f32 %v3743_v1, 0.0  ;;  %v3377_v13 = vpack.c.bf16 %v1714_v41, %v1704_v12  ;;  %v1862_v61 = vld [vmem:[#allocation10 + $0x4f8] sm:$0xff]  ;;  %v1851_v0 = vld [vmem:[#allocation10 + $0x4a0] sm:$0xff]  ;;  %v1861_v1 = vld [vmem:[#allocation10 + $0x4f0] sm:$0xff]  ;;  %v3387_v52 = vpack.c.bf16 %v1753_v38, %v1743_v32 }
 0x2f7   : > { %v1379_v4 = vmax.f32 %v3744_v3, 0.0  ;;  %3372 = vmatpush1.bf16.msra.mxu1 %v3371_v63  ;;  %3648 = vmatpush1.bf16.msra.mxu0 %v4658_v44  ;;  %v4679_v63 = vpack.c.bf16 %v1862_v61, %v1852_v60  ;;  %v1882_v3 = vld [vmem:[#allocation10 + $0x598] sm:$0xff]  ;;  %v1891_v12 = vld [vmem:[#allocation10 + $0x5e0] sm:$0xff]  ;;  %v1901_v41 = vld [vmem:[#allocation10 + $0x630] sm:$0xff]  ;;  %5217 = vst [vmem:[#allocation24_spill] sm:$0xff] %v4718_v55 }
 0x2f8   : > { %3374 = vmatprep.subr.bf16.mxu1 %v3373_v8  ;;  %3650 = vmatprep.subr.bf16.mxu0 %v4661_v45  ;;  %v1892_v8 = vld [vmem:[#allocation10 + $0x5e8] sm:$0xff]  ;;  %v4694_v15 = vpack.c.bf16 %v1901_v41, %v1891_v12  ;;  %5218 = vst [vmem:[#allocation25_spill] sm:$0xff] %v4721_v58  ;;  %v1703_v60 = vld [vmem:[#allocation10] sm:$0xff]  ;;  %v1713_v61 = vld [vmem:[#allocation10 + $0x50] sm:$0xff] }
 0x2f9   : > { %1517 = vmatprep.mubr.f32.mxu1 %v1379_v4  ;;  %v4682_v4 = vpack.c.bf16 %v1861_v1, %v1851_v0  ;;  %v4726_v0 = vld [vmem:[#allocation11 + $0x2] ss:$0 sm:$0xff]  ;;  %v3379_v7 = vpack.c.bf16 %v1713_v61, %v1703_v60  ;;  %v1774_v46 = vld [vmem:[#allocation10 + $0x238] sm:$0xff]  ;;  %v1773_v61 = vld [vmem:[#allocation10 + $0x230] sm:$0xff] }
 0x2fa   : > { %1518 = vmatmul.mubr.f32.gmra.mrb[14].mxu1 %v1378_v5  ;;  %v4685_v5 = vpack.c.bf16 %v1882_v3, %v1872_v2  ;;  %v1724_v2 = vld [vmem:[#allocation10 + $0xa8] sm:$0xff]  ;;  %v1734_v3 = vld [vmem:[#allocation10 + $0xf8] sm:$0xff]  ;;  %v1723_v41 = vld [vmem:[#allocation10 + $0xa0] sm:$0xff] }
 0x2fb   : > { %3376 = vmatpush1.bf16.msra.mxu1 %v3375_v11  ;;  %1638 = vmatprep.mubr.f32.mxu1 %v4220_v40  ;;  %v4691_v11 = vpack.c.bf16 %v1902_v9, %v1892_v8  ;;  %v3381_v12 = vpack.c.bf16 %v1734_v3, %v1724_v2  ;;  %v1763_v60 = vld [vmem:[#allocation10 + $0x1e0] sm:$0xff]  ;;  %v1784_v2 = vld [vmem:[#allocation10 + $0x288] sm:$0xff]  ;;  %v1794_v3 = vld [vmem:[#allocation10 + $0x2d8] sm:$0xff] }
 0x2fc   : > { %3378 = vmatprep.subr.bf16.mxu1 %v3377_v13  ;;  %3652 = vmatpush1.bf16.msra.mxu0 %v4664_v50  ;;  %v1912_v13 = vld [vmem:[#allocation10 + $0x688] sm:$0xff]  ;;  %v1814_v20 = vld [vmem:[#allocation10 + $0x378] sm:$0xff]  ;;  %v1803_v32 = vld [vmem:[#allocation10 + $0x320] sm:$0xff] }
 0x2fd   : > { %3654 = vmatprep.subr.bf16.mxu0 %v4667_v51  ;;  %v4697_v17 = vpack.c.bf16 %v1922_v14, %v1912_v13  ;;  %v1733_v13 = vld [vmem:[#allocation10 + $0xf0] sm:$0xff]  ;;  %v1804_v18 = vld [vmem:[#allocation10 + $0x328] sm:$0xff] }
 0x2fe   : > { %v3383_v22 = vpack.c.bf16 %v1733_v13, %v1723_v41  ;;  %v1783_v41 = vld [vmem:[#allocation10 + $0x280] sm:$0xff]  ;;  %v1793_v13 = vld [vmem:[#allocation10 + $0x2d0] sm:$0xff] }
 0x2ff   : > { %v1813_v38 = vld [vmem:[#allocation10 + $0x370] sm:$0xff] }
 0x300   : > { %3656 = vmatpush1.bf16.msra.mxu0 %v4670_v56 }
 0x301   : > { %3658 = vmatprep.subr.bf16.mxu0 %v4673_v57 }
 0x304   : > { %3660 = vmatpush1.bf16.msra.mxu0 %v4676_v62 }
 0x305   : > { %3662 = vmatprep.subr.bf16.mxu0 %v4679_v63 }
 0x308   : > { %3664 = vmatpush1.bf16.msra.mxu0 %v4682_v4 }
 0x309   : > { %3666 = vmatprep.subr.bf16.mxu0 %v4685_v5 }
 0x30c   : > { %3668 = vmatpush1.bf16.msra.mxu0 %v4688_v10 }
 0x30d   : > { %3670 = vmatprep.subr.bf16.mxu0 %v4691_v11 }
 0x310   : > { %3672 = vmatpush1.bf16.msra.mxu0 %v4694_v15 }
 0x311   : > { %3674 = vmatprep.subr.bf16.mxu0 %v4697_v17 }
 0x314   : > { %3676 = vmatpush1.bf16.msra.mxu0 %v4700_v24 }
 0x315   : > { %3678 = vmatprep.subr.bf16.mxu0 %v4703_v26 }
 0x318   : > { %3680 = vmatpush1.bf16.msra.mxu0 %v4706_v33 }
 0x319   : > { %3682 = vmatprep.subr.bf16.mxu0 %v4709_v35 }
 0x31c   : > { %3684 = vmatpush1.bf16.msra.mxu0 %v4712_v47 }
 0x31d   : > { %3686 = vmatprep.subr.bf16.mxu0 %v4715_v48  ;;  %v1925_v48 = vld [vmem:[#allocation10 + $0x6f0] sm:$0xff] }
 0x320   : > { %3688 = vmatpush1.bf16.msra.mxu0 %v4718_v55 }
 0x321   : > { %3690 = vmatprep.subr.bf16.mxu0 %v4721_v58  ;;  %v1876_v58 = vld [vmem:[#allocation10 + $0x568] sm:$0xff] }
 0x3b1   : > { %v2969_v59 = vpop.f32.mrb[0].mxu1 }
 0x3b2   : > { %v2970_v1 = vpop.f32.mrb[1].mxu1 }
 0x3b3   : > { %v2971_v6 = vadd.f32 %v2970_v1, %v2969_v59  ;;  %v3389_v59 = vpack.c.bf16 %v1774_v46, %v1764_v43  ;;  %v1824_v43 = vld [vmem:[#allocation10 + $0x3c8] sm:$0xff]  ;;  %v1834_v46 = vld [vmem:[#allocation10 + $0x418] sm:$0xff] }
 0x3b5   : > { %v1485_v8 = vadd.f32 %v2971_v6, %v4726_v0  ;;  %v2972_v9 = vpop.f32.mrb[2].mxu1 }
 0x3b6   : > { %v2973_v14 = vpop.f32.mrb[3].mxu1 }
 0x3b7   : > { %1523 = vst [vmem:[%s4729_s15] sm:$0xff] %v1485_v8  ;;  %v2974_v21 = vadd.f32 %v2973_v14, %v2972_v9  ;;  %1639 = vmatmul.mubr.f32.vlgmr.msra.gmra.mrb[16].mxu1 %v1485_v8 }
 0x3b8   : > { %1644 = vmatprep.mubr.f32.mxu1 %v4220_v40  ;;  %3380 = vmatpush1.bf16.msra.mxu1 %v3379_v7  ;;  %v3391_v7 = vpack.c.bf16 %v1773_v61, %v1763_v60  ;;  %v1823_v60 = vld [vmem:[#allocation10 + $0x3c0] sm:$0xff]  ;;  %v1833_v61 = vld [vmem:[#allocation10 + $0x410] sm:$0xff] }
 0x3b9   : > { %v1490_v27 = vadd.f32 %v2974_v21, %v4726_v0  ;;  %v2975_v28 = vpop.f32.mrb[4].mxu1  ;;  %3382 = vmatprep.subr.bf16.mxu1 %v3381_v12  ;;  %v3393_v12 = vpack.c.bf16 %v1794_v3, %v1784_v2  ;;  %v1844_v2 = vld [vmem:[#allocation10 + $0x468] sm:$0xff]  ;;  %v1854_v3 = vld [vmem:[#allocation10 + $0x4b8] sm:$0xff] }
 0x3ba   : > { %v2976_v42 = vpop.f32.mrb[5].mxu1 }
 0x3bb   : > { %1524 = vst [vmem:[%s4729_s15 + $0x8] sm:$0xff] %v1490_v27  ;;  %v2977_v49 = vadd.f32 %v2976_v42, %v2975_v28  ;;  %1645 = vmatmul.mubr.f32.gmra.mrb[18].mxu1 %v1490_v27 }
 0x3bc   : > { %1650 = vmatprep.mubr.f32.mxu1 %v4220_v40  ;;  %3384 = vmatpush1.bf16.msra.mxu1 %v3383_v22  ;;  %v3395_v22 = vpack.c.bf16 %v1793_v13, %v1783_v41  ;;  %v1843_v41 = vld [vmem:[#allocation10 + $0x460] sm:$0xff]  ;;  %v1853_v13 = vld [vmem:[#allocation10 + $0x4b0] sm:$0xff] }
 0x3bd   : > { %v1495_v53 = vadd.f32 %v2977_v49, %v4726_v0  ;;  %v2978_v54 = vpop.f32.mrb[6].mxu1  ;;  %3386 = vmatprep.subr.bf16.mxu1 %v3385_v29  ;;  %v3397_v29 = vpack.c.bf16 %v1814_v20, %v1804_v18  ;;  %v1864_v18 = vld [vmem:[#allocation10 + $0x508] sm:$0xff]  ;;  %v1874_v20 = vld [vmem:[#allocation10 + $0x558] sm:$0xff] }
 0x3be   : > { %v2979_v1 = vpop.f32.mrb[7].mxu1 }
 0x3bf   : > { %1525 = vst [vmem:[%s4729_s15 + $0x10] sm:$0xff] %v1495_v53  ;;  %v2980_v6 = vadd.f32 %v2979_v1, %v2978_v54  ;;  %1651 = vmatmul.mubr.f32.gmra.mrb[20].mxu1 %v1495_v53 }
 0x3c0   : > { %1656 = vmatprep.mubr.f32.mxu1 %v4220_v40  ;;  %3388 = vmatpush1.bf16.msra.mxu1 %v3387_v52  ;;  %v3399_v52 = vpack.c.bf16 %v1813_v38, %v1803_v32  ;;  %v1873_v32 = vld [vmem:[#allocation10 + $0x550] sm:$0xff]  ;;  %v1884_v38 = vld [vmem:[#allocation10 + $0x5a8] sm:$0xff] }
 0x3c1   : > { %v1500_v8 = vadd.f32 %v2980_v6, %v4726_v0  ;;  %v2981_v9 = vpop.f32.mrb[8].mxu1  ;;  %3390 = vmatprep.subr.bf16.mxu1 %v3389_v59  ;;  %v3401_v59 = vpack.c.bf16 %v1834_v46, %v1824_v43 }
 0x3c2   : > { %v2982_v14 = vpop.f32.mrb[9].mxu1 }
 0x3c3   : > { %1526 = vst [vmem:[%s4729_s15 + $0x18] sm:$0xff] %v1500_v8  ;;  %v2983_v21 = vadd.f32 %v2982_v14, %v2981_v9  ;;  %1657 = vmatmul.mubr.f32.gmra.mrb[22].mxu1 %v1500_v8 }
 0x3c4   : > { %1662 = vmatprep.mubr.f32.mxu1 %v4220_v40  ;;  %3392 = vmatpush1.bf16.msra.mxu1 %v3391_v7  ;;  %v3403_v7 = vpack.c.bf16 %v1833_v61, %v1823_v60  ;;  %v1913_v60 = vld [vmem:[#allocation10 + $0x690] sm:$0xff]  ;;  %v1924_v61 = vld [vmem:[#allocation10 + $0x6e8] sm:$0xff] }
 0x3c5   : > { %v1505_v27 = vadd.f32 %v2983_v21, %v4726_v0  ;;  %v2984_v28 = vpop.f32.mrb[10].mxu1  ;;  %3394 = vmatprep.subr.bf16.mxu1 %v3393_v12  ;;  %v3405_v12 = vpack.c.bf16 %v1854_v3, %v1844_v2 }
 0x3c6   : > { %v2985_v42 = vpop.f32.mrb[11].mxu1 }
 0x3c7   : > { %1527 = vst [vmem:[%s4729_s15 + $0x20] sm:$0xff] %v1505_v27  ;;  %v2986_v49 = vadd.f32 %v2985_v42, %v2984_v28  ;;  %1663 = vmatmul.mubr.f32.gmra.mrb[24].mxu1 %v1505_v27  ;;  %v3409_v28 = vpack.c.bf16 %v1874_v20, %v1864_v18  ;;  %v1894_v42 = vld [vmem:[#allocation10 + $0x5f8] sm:$0xff]  ;;  %v1964_v18 = vld [vmem:[#allocation10 + $0x828] sm:$0xff] }
 0x3c8   : > { %1668 = vmatprep.mubr.f32.mxu1 %v4220_v40  ;;  %3396 = vmatpush1.bf16.msra.mxu1 %v3395_v22  ;;  %v3407_v22 = vpack.c.bf16 %v1853_v13, %v1843_v41  ;;  %v3413_v46 = vpack.c.bf16 %v1894_v42, %v1884_v38  ;;  %v1943_v13 = vld [vmem:[#allocation10 + $0x780] sm:$0xff]  ;;  %v1974_v20 = vld [vmem:[#allocation10 + $0x878] sm:$0xff] }
 0x3c9   : > { %v1510_v53 = vadd.f32 %v2986_v49, %v4726_v0  ;;  %v2987_v54 = vpop.f32.mrb[12].mxu1  ;;  %3398 = vmatprep.subr.bf16.mxu1 %v3397_v29  ;;  %v1863_v29 = vld [vmem:[#allocation10 + $0x500] sm:$0xff] }
 0x3ca   : > { %v2988_v1 = vpop.f32.mrb[13].mxu1  ;;  %v3411_v43 = vpack.c.bf16 %v1873_v32, %v1863_v29  ;;  %v1883_v49 = vld [vmem:[#allocation10 + $0x5a0] sm:$0xff]  ;;  %v1984_v29 = vld [vmem:[#allocation10 + $0x8c8] sm:$0xff]  ;;  %v1994_v32 = vld [vmem:[#allocation10 + $0x918] sm:$0xff] }
 0x3cb   : > { %1528 = vst [vmem:[%s4729_s15 + $0x28] sm:$0xff] %v1510_v53  ;;  %v2989_v6 = vadd.f32 %v2988_v1, %v2987_v54  ;;  %1669 = vmatmul.mubr.f32.gmra.mrb[26].mxu1 %v1510_v53  ;;  %v1904_v53 = vld [vmem:[#allocation10 + $0x648] sm:$0xff]  ;;  %v1934_v1 = vld [vmem:[#allocation10 + $0x738] sm:$0xff]  ;;  %v3433_v42 = vpack.c.bf16 %v1994_v32, %v1984_v29  ;;  %v1715_v29 = vld [vmem:[#allocation10 + $0x60] sm:$0xff] }
 0x3cc   : > { %1674 = vmatprep.mubr.f32.mxu1 %v4220_v40  ;;  %3400 = vmatpush1.bf16.msra.mxu1 %v3399_v52  ;;  %v1893_v52 = vld [vmem:[#allocation10 + $0x5f0] sm:$0xff]  ;;  %v3421_v3 = vpack.c.bf16 %v1934_v1, %v1924_v61  ;;  %v2012_v1 = vld [vmem:[#allocation10 + $0x9a8] sm:$0xff] }
 0x3cd   : > { %v1515_v8 = vadd.f32 %v2989_v6, %v4726_v0  ;;  %v2990_v9 = vpop.f32.mrb[14].mxu1  ;;  %3402 = vmatprep.subr.bf16.mxu1 %v3401_v59  ;;  %v3415_v54 = vpack.c.bf16 %v1893_v52, %v1883_v49  ;;  %v1903_v59 = vld [vmem:[#allocation10 + $0x640] sm:$0xff]  ;;  %v2013_v61 = vld [vmem:[#allocation10 + $0x9b0] sm:$0xff] }
 0x3ce   : > { %v2991_v14 = vpop.f32.mrb[15].mxu1  ;;  %v3419_v2 = vpack.c.bf16 %v1913_v60, %v1903_v59  ;;  %v1923_v6 = vld [vmem:[#allocation10 + $0x6e0] sm:$0xff] }
 0x3cf   : > { %1529 = vst [vmem:[%s4729_s15 + $0x30] sm:$0xff] %v1515_v8  ;;  %v2992_v21 = vadd.f32 %v2991_v14, %v2990_v9  ;;  %1675 = vmatmul.mubr.f32.gmra.mrb[28].mxu1 %v1515_v8  ;;  %v1944_v8 = vld [vmem:[#allocation10 + $0x788] sm:$0xff]  ;;  %v1954_v9 = vld [vmem:[#allocation10 + $0x7d8] sm:$0xff]  ;;  %v1953_v14 = vld [vmem:[#allocation10 + $0x7d0] sm:$0xff] }
 0x3d0   : > { %1680 = vmatprep.mubr.f32.mxu1 %v4220_v40  ;;  %3404 = vmatpush1.bf16.msra.mxu1 %v3403_v7  ;;  %v1914_v40 = vld [vmem:[#allocation10 + $0x698] sm:$0xff]  ;;  %v1933_v7 = vld [vmem:[#allocation10 + $0x730] sm:$0xff]  ;;  %v3425_v41 = vpack.c.bf16 %v1954_v9, %v1944_v8  ;;  %v1991_v52 = vld [vmem:[#allocation10 + $0x900] sm:$0xff] }
 0x3d1   : > { %v1520_v27 = vadd.f32 %v2992_v21, %v4726_v0  ;;  %3406 = vmatprep.subr.bf16.mxu1 %v3405_v12  ;;  %v3417_v0 = vpack.c.bf16 %v1914_v40, %v1904_v53  ;;  %v3423_v12 = vpack.c.bf16 %v1933_v7, %v1923_v6  ;;  %v3427_v21 = vpack.c.bf16 %v1953_v14, %v1943_v13  ;;  %v2001_v53 = vld [vmem:[#allocation10 + $0x950] sm:$0xff]  ;;  %v2003_v60 = vld [vmem:[#allocation10 + $0x960] sm:$0xff] }
 0x3d2   : > { %v4753_v40 = vpack.c.bf16 %v2001_v53, %v1991_v52  ;;  %v2011_v6 = vld [vmem:[#allocation10 + $0x9a0] sm:$0xff]  ;;  %v2021_v7 = vld [vmem:[#allocation10 + $0x9f0] sm:$0xff] }
 0x3d3   : > { %1530 = vst [vmem:[%s4729_s15 + $0x38] sm:$0xff] %v1520_v27  ;;  %1681 = vmatmul.mubr.f32.gmra.mrb[30].mxu1 %v1520_v27  ;;  %v1963_v27 = vld [vmem:[#allocation10 + $0x820] sm:$0xff]  ;;  %v4758_v9 = vpack.c.bf16 %v2021_v7, %v2011_v6 }
 0x3d4   : > { %3408 = vmatpush1.bf16.msra.mxu1 %v3407_v22  ;;  %v3429_v22 = vpack.c.bf16 %v1974_v20, %v1964_v18  ;;  %5219 = vst [vmem:[#allocation26_spill] sm:$0xff] %v4753_v40  ;;  %3692 = vmatpush1.bf16.msra.mxu0 %v4753_v40  ;;  %v465_v14 = vld [vmem:[#allocation11 + $0x3] sm:$0x3]  ;;  %v1866_v40 = vld [vmem:[#allocation10 + $0x518] sm:$0xff] }
 0x3d5   : > { %3410 = vmatprep.subr.bf16.mxu1 %v3409_v28  ;;  %v1973_v28 = vld [vmem:[#allocation10 + $0x870] sm:$0xff]  ;;  %5221 = vst [vmem:[#allocation28_spill] sm:$0xff] %v4758_v9  ;;  %v4763_v18 = vrot.slane %v465_v14, %v4610_v37  ;;  %v4766_v20 = vrot.slane %v465_v14, %v4613_v39 }
 0x3d6   : > { %v3431_v38 = vpack.c.bf16 %v1973_v28, %v1963_v27  ;;  %v1705_v28 = vld [vmem:[#allocation10 + $0x10] sm:$0xff] }
 0x3d8   : > { %3412 = vmatpush1.bf16.msra.mxu1 %v3411_v43  ;;  %v1983_v43 = vld [vmem:[#allocation10 + $0x8c0] sm:$0xff] }
 0x3d9   : > { %3414 = vmatprep.subr.bf16.mxu1 %v3413_v46  ;;  %v1993_v46 = vld [vmem:[#allocation10 + $0x910] sm:$0xff] }
 0x3da   : > { %v3435_v49 = vpack.c.bf16 %v1993_v46, %v1983_v43 }
 0x3dc   : > { %3416 = vmatpush1.bf16.msra.mxu1 %v3415_v54  ;;  %v2004_v54 = vld [vmem:[#allocation10 + $0x968] sm:$0xff] }
 0x3dd   : > { %3418 = vmatprep.subr.bf16.mxu1 %v3417_v0  ;;  %v2014_v0 = vld [vmem:[#allocation10 + $0x9b8] sm:$0xff] }
 0x3de   : > { %v3437_v59 = vpack.c.bf16 %v2014_v0, %v2004_v54 }
 0x3e0   : > { %3420 = vmatpush1.bf16.msra.mxu1 %v3419_v2  ;;  %v3439_v2 = vpack.c.bf16 %v2013_v61, %v2003_v60  ;;  %v1735_v60 = vld [vmem:[#allocation10 + $0x100] sm:$0xff] }
 0x3e1   : > { %3422 = vmatprep.subr.bf16.mxu1 %v3421_v3  ;;  %v2022_v3 = vld [vmem:[#allocation10 + $0x9f8] sm:$0xff] }
 0x3e2   : > { %v4756_v8 = vpack.c.bf16 %v2022_v3, %v2012_v1  ;;  %v1746_v1 = vld [vmem:[#allocation10 + $0x158] sm:$0xff] }
 0x3e4   : > { %3424 = vmatpush1.bf16.msra.mxu1 %v3423_v12  ;;  %5220 = vst [vmem:[#allocation27_spill] sm:$0xff] %v4756_v8  ;;  %v1706_v12 = vld [vmem:[#allocation10 + $0x18] sm:$0xff]  ;;  %3694 = vmatprep.subr.bf16.mxu0 %v4756_v8  ;;  %v1856_v8 = vld [vmem:[#allocation10 + $0x4c8] sm:$0xff] }
 0x3e5   : > { %3426 = vmatprep.subr.bf16.mxu1 %v3425_v41  ;;  %v1716_v41 = vld [vmem:[#allocation10 + $0x68] sm:$0xff]  ;;  %3696 = vmatpush1.bf16.msra.mxu0 %v4758_v9  ;;  %v1846_v9 = vld [vmem:[#allocation10 + $0x478] sm:$0xff] }
 0x3e6   : > { %v3441_v13 = vpack.c.bf16 %v1716_v41, %v1706_v12 }
 0x3e8   : > { %3428 = vmatpush1.bf16.msra.mxu1 %v3427_v21 }
 0x3e9   : > { %3430 = vmatprep.subr.bf16.mxu1 %v3429_v22 }
 0x3ec   : > { %3432 = vmatpush1.bf16.msra.mxu1 %v3431_v38  ;;  %v1726_v38 = vld [vmem:[#allocation10 + $0xb8] sm:$0xff] }
 0x3ed   : > { %3434 = vmatprep.subr.bf16.mxu1 %v3433_v42  ;;  %v1736_v42 = vld [vmem:[#allocation10 + $0x108] sm:$0xff] }
 0x3ee   : > { %v3445_v0 = vpack.c.bf16 %v1736_v42, %v1726_v38 }
 0x3f0   : > { %3436 = vmatpush1.bf16.msra.mxu1 %v3435_v49  ;;  %v3443_v49 = vpack.c.bf16 %v1715_v29, %v1705_v28  ;;  %v1766_v28 = vld [vmem:[#allocation10 + $0x1f8] sm:$0xff]  ;;  %v1776_v29 = vld [vmem:[#allocation10 + $0x248] sm:$0xff] }
 0x3f1   : > { %3438 = vmatprep.subr.bf16.mxu1 %v3437_v59  ;;  %v1725_v59 = vld [vmem:[#allocation10 + $0xb0] sm:$0xff] }
 0x3f2   : > { %v3447_v7 = vpack.c.bf16 %v1735_v60, %v1725_v59  ;;  %v1775_v59 = vld [vmem:[#allocation10 + $0x240] sm:$0xff] }
 0x3f4   : > { %3440 = vmatpush1.bf16.msra.mxu1 %v3439_v2  ;;  %v1756_v2 = vld [vmem:[#allocation10 + $0x1a8] sm:$0xff] }
 0x3f5   : > { %3442 = vmatprep.subr.bf16.mxu1 %v3441_v13  ;;  %v3449_v14 = vpack.c.bf16 %v1756_v2, %v1746_v1  ;;  %v1796_v1 = vld [vmem:[#allocation10 + $0x2e8] sm:$0xff] }
 0x48a   : > { %v1640_v21 = vpop.f32.mrb[16].mxu1 }
 0x48b   : > { %v1641_v22 = vadd.f32 %v1640_v21, %v4763_v18  ;;  %v1642_v27 = vpop.f32.mrb[17].mxu1  ;;  %v1745_v21 = vld [vmem:[#allocation10 + $0x150] sm:$0xff] }
 0x48c   : > { %v1643_v32 = vadd.f32 %v1642_v27, %v4766_v20 }
 0x48d   : > { %v4772_v52 = vmax.f32 %v1641_v22, 0.0  ;;  %v1755_v22 = vld [vmem:[#allocation10 + $0x1a0] sm:$0xff] }
 0x48e   : > { %v4770_v43 = vmax.f32 %v1643_v32, 0.0  ;;  %v1646_v46 = vpop.f32.mrb[18].mxu1  ;;  %v3451_v42 = vpack.c.bf16 %v1755_v22, %v1745_v21  ;;  %v1785_v22 = vld [vmem:[#allocation10 + $0x290] sm:$0xff] }
 0x48f   : > { %v1647_v53 = vadd.f32 %v1646_v46, %v4763_v18  ;;  %v1648_v54 = vpop.f32.mrb[19].mxu1 }
 0x490   : > { %v1649_v61 = vadd.f32 %v1648_v54, %v4766_v20  ;;  %2139 = vmatprep.mubr.f32.mxu1 %v4770_v43  ;;  %2591 = vmatprep.mubr.f32.mxu0 %v4770_v43  ;;  %v3453_v54 = vpack.c.bf16 %v1776_v29, %v1766_v28  ;;  %v1806_v29 = vld [vmem:[#allocation10 + $0x338] sm:$0xff] }
 0x491   : > { %2140 = vmatmul.mubr.f32.vlgmr.msra.gmra.mrb[32].mxu1 %v4772_v52  ;;  %2592 = vmatmul.mubr.f32.vlgmr.msra.gmra.mrb[16].mxu0 %v4772_v52  ;;  %v4782_v12 = vmax.f32 %v1647_v53, 0.0 }
 0x492   : > { %v4780_v3 = vmax.f32 %v1649_v61, 0.0  ;;  %3444 = vmatpush1.bf16.msra.mxu1 %v3443_v49  ;;  %v1652_v6 = vpop.f32.mrb[20].mxu1  ;;  %v1786_v61 = vld [vmem:[#allocation10 + $0x298] sm:$0xff] }
 0x493   : > { %v1653_v41 = vadd.f32 %v1652_v6, %v4763_v18  ;;  %v1654_v13 = vpop.f32.mrb[21].mxu1  ;;  %3446 = vmatprep.subr.bf16.mxu1 %v3445_v0  ;;  %v1765_v0 = vld [vmem:[#allocation10 + $0x1f0] sm:$0xff]  ;;  %v3457_v21 = vpack.c.bf16 %v1796_v1, %v1786_v61  ;;  %v1815_v1 = vld [vmem:[#allocation10 + $0x380] sm:$0xff] }
 0x494   : > { %v1655_v27 = vadd.f32 %v1654_v13, %v4766_v20  ;;  %2145 = vmatprep.mubr.f32.mxu1 %v4780_v3  ;;  %2597 = vmatprep.mubr.f32.mxu0 %v4780_v3  ;;  %v1805_v61 = vld [vmem:[#allocation10 + $0x330] sm:$0xff] }
 0x495   : > { %2146 = vmatmul.mubr.f32.gmra.mrb[34].mxu1 %v4782_v12  ;;  %2598 = vmatmul.mubr.f32.gmra.mrb[18].mxu0 %v4782_v12  ;;  %v4792_v46 = vmax.f32 %v1653_v41, 0.0 }
 0x496   : > { %v4790_v32 = vmax.f32 %v1655_v27, 0.0  ;;  %3448 = vmatpush1.bf16.msra.mxu1 %v3447_v7  ;;  %v1658_v38 = vpop.f32.mrb[22].mxu1  ;;  %v3455_v7 = vpack.c.bf16 %v1775_v59, %v1765_v0  ;;  %v1795_v27 = vld [vmem:[#allocation10 + $0x2e0] sm:$0xff] }
 0x497   : > { %v1659_v49 = vadd.f32 %v1658_v38, %v4763_v18  ;;  %v1660_v53 = vpop.f32.mrb[23].mxu1  ;;  %3450 = vmatprep.subr.bf16.mxu1 %v3449_v14  ;;  %v1816_v38 = vld [vmem:[#allocation10 + $0x388] sm:$0xff] }
 0x498   : > { %v1661_v60 = vadd.f32 %v1660_v53, %v4766_v20  ;;  %2151 = vmatprep.mubr.f32.mxu1 %v4790_v32  ;;  %2603 = vmatprep.mubr.f32.mxu0 %v4790_v32  ;;  %v3459_v53 = vpack.c.bf16 %v1795_v27, %v1785_v22  ;;  %v3463_v22 = vpack.c.bf16 %v1815_v1, %v1805_v61 }
 0x499   : > { %2152 = vmatmul.mubr.f32.gmra.mrb[36].mxu1 %v4792_v46  ;;  %2604 = vmatmul.mubr.f32.gmra.mrb[20].mxu0 %v4792_v46  ;;  %v4802_v41 = vmax.f32 %v1659_v49, 0.0 }
 0x49a   : > { %v4800_v2 = vmax.f32 %v1661_v60, 0.0  ;;  %3452 = vmatpush1.bf16.msra.mxu1 %v3451_v42  ;;  %v1664_v6 = vpop.f32.mrb[24].mxu1  ;;  %v3461_v60 = vpack.c.bf16 %v1816_v38, %v1806_v29  ;;  %v1825_v38 = vld [vmem:[#allocation10 + $0x3d0] sm:$0xff] }
 0x49b   : > { %v1665_v13 = vadd.f32 %v1664_v6, %v4763_v18  ;;  %v1666_v14 = vpop.f32.mrb[25].mxu1  ;;  %3454 = vmatprep.subr.bf16.mxu1 %v3453_v54 }
 0x49c   : > { %v1667_v28 = vadd.f32 %v1666_v14, %v4766_v20  ;;  %2157 = vmatprep.mubr.f32.mxu1 %v4800_v2  ;;  %2609 = vmatprep.mubr.f32.mxu0 %v4800_v2  ;;  %v1826_v14 = vld [vmem:[#allocation10 + $0x3d8] sm:$0xff] }
 0x49d   : > { %2158 = vmatmul.mubr.f32.gmra.mrb[38].mxu1 %v4802_v41  ;;  %2610 = vmatmul.mubr.f32.gmra.mrb[22].mxu0 %v4802_v41  ;;  %v4812_v54 = vmax.f32 %v1665_v13, 0.0  ;;  %v3465_v29 = vpack.c.bf16 %v1836_v36, %v1826_v14  ;;  %v1845_v14 = vld [vmem:[#allocation10 + $0x470] sm:$0xff] }
 0x49e   : > { %v4810_v42 = vmax.f32 %v1667_v28, 0.0  ;;  %3456 = vmatpush1.bf16.msra.mxu1 %v3455_v7  ;;  %v1670_v49 = vpop.f32.mrb[26].mxu1 }
 0x49f   : > { %v1671_v0 = vadd.f32 %v1670_v49, %v4763_v18  ;;  %v1672_v59 = vpop.f32.mrb[27].mxu1  ;;  %3458 = vmatprep.subr.bf16.mxu1 %v3457_v21  ;;  %v1835_v49 = vld [vmem:[#allocation10 + $0x420] sm:$0xff] }
 0x4a0   : > { %v1673_v6 = vadd.f32 %v1672_v59, %v4766_v20  ;;  %2163 = vmatprep.mubr.f32.mxu1 %v4810_v42  ;;  %v3467_v61 = vpack.c.bf16 %v1835_v49, %v1825_v38 }
 0x4a1   : > { %2164 = vmatmul.mubr.f32.gmra.mrb[40].mxu1 %v4812_v54  ;;  %v4820_v27 = vmax.f32 %v1671_v0, 0.0 }
 0x4a2   : > { %v4818_v7 = vmax.f32 %v1673_v6, 0.0  ;;  %3460 = vmatpush1.bf16.msra.mxu1 %v3459_v53  ;;  %v1676_v13 = vpop.f32.mrb[28].mxu1  ;;  %v3469_v6 = vpack.c.bf16 %v1856_v8, %v1846_v9  ;;  %v1875_v8 = vld [vmem:[#allocation10 + $0x560] sm:$0xff]  ;;  %v1886_v9 = vld [vmem:[#allocation10 + $0x5b8] sm:$0xff] }
 0x4a3   : > { %v1677_v21 = vadd.f32 %v1676_v13, %v4763_v18  ;;  %v1678_v28 = vpop.f32.mrb[29].mxu1  ;;  %3462 = vmatprep.subr.bf16.mxu1 %v3461_v60  ;;  %v1855_v13 = vld [vmem:[#allocation10 + $0x4c0] sm:$0xff] }
 0x4a4   : > { %v1679_v59 = vadd.f32 %v1678_v28, %v4766_v20  ;;  %2169 = vmatprep.mubr.f32.mxu1 %v4818_v7 }
 0x4a5   : > { %2170 = vmatmul.mubr.f32.gmra.mrb[42].mxu1 %v4820_v27  ;;  %v4828_v1 = vmax.f32 %v1677_v21, 0.0  ;;  %v3471_v21 = vpack.c.bf16 %v1855_v13, %v1845_v14  ;;  %v1915_v14 = vld [vmem:[#allocation10 + $0x6a0] sm:$0xff]  ;;  %v1926_v13 = vld [vmem:[#allocation10 + $0x6f8] sm:$0xff] }
 0x4a6   : > { %v4826_v53 = vmax.f32 %v1679_v59, 0.0  ;;  %3464 = vmatpush1.bf16.msra.mxu1 %v3463_v22  ;;  %v1682_v0 = vpop.f32.mrb[30].mxu1 }
 0x4a7   : > { %v1683_v60 = vadd.f32 %v1682_v0, %v4763_v18  ;;  %v1684_v36 = vpop.f32.mrb[31].mxu1  ;;  %3466 = vmatprep.subr.bf16.mxu1 %v3465_v29  ;;  %v3473_v18 = vpack.c.bf16 %v1876_v58, %v1866_v40  ;;  %v1865_v29 = vld [vmem:[#allocation10 + $0x510] sm:$0xff] }
 0x4a8   : > { %v1685_v28 = vadd.f32 %v1684_v36, %v4766_v20  ;;  %2175 = vmatprep.mubr.f32.mxu1 %v4826_v53  ;;  %v1896_v20 = vld [vmem:[#allocation10 + $0x608] sm:$0xff]  ;;  %v3475_v49 = vpack.c.bf16 %v1875_v8, %v1865_v29  ;;  %v1885_v0 = vld [vmem:[#allocation10 + $0x5b0] sm:$0xff]  ;;  %v1935_v29 = vld [vmem:[#allocation10 + $0x740] sm:$0xff] }
 0x4a9   : > { %2176 = vmatmul.mubr.f32.gmra.mrb[44].mxu1 %v4828_v1  ;;  %v4836_v38 = vmax.f32 %v1683_v60, 0.0  ;;  %v3477_v59 = vpack.c.bf16 %v1896_v20, %v1886_v9  ;;  %v1906_v60 = vld [vmem:[#allocation10 + $0x658] sm:$0xff]  ;;  %v1916_v36 = vld [vmem:[#allocation10 + $0x6a8] sm:$0xff]  ;;  %v3487_v9 = vpack.c.bf16 %v1935_v29, %v1925_v48  ;;  %v1995_v48 = vld [vmem:[#allocation10 + $0x920] sm:$0xff] }
 0x4aa   : > { %v4834_v22 = vmax.f32 %v1685_v28, 0.0  ;;  %3468 = vmatpush1.bf16.msra.mxu1 %v3467_v61  ;;  %v1895_v61 = vld [vmem:[#allocation10 + $0x600] sm:$0xff]  ;;  %v3481_v40 = vpack.c.bf16 %v1916_v36, %v1906_v60  ;;  %v1936_v28 = vld [vmem:[#allocation10 + $0x748] sm:$0xff] }
 0x4ab   : > { %3470 = vmatprep.subr.bf16.mxu1 %v3469_v6  ;;  %v3479_v58 = vpack.c.bf16 %v1895_v61, %v1885_v0  ;;  %v1905_v6 = vld [vmem:[#allocation10 + $0x650] sm:$0xff]  ;;  %v1956_v8 = vld [vmem:[#allocation10 + $0x7e8] sm:$0xff]  ;;  %v1955_v0 = vld [vmem:[#allocation10 + $0x7e0] sm:$0xff] }
 0x4ac   : > { %2181 = vmatprep.mubr.f32.mxu1 %v4834_v22  ;;  %v3483_v55 = vpack.c.bf16 %v1915_v14, %v1905_v6  ;;  %v1976_v61 = vld [vmem:[#allocation10 + $0x888] sm:$0xff]  ;;  %v1975_v6 = vld [vmem:[#allocation10 + $0x880] sm:$0xff] }
 0x4ad   : > { %2182 = vmatmul.mubr.f32.gmra.mrb[46].mxu1 %v4836_v38  ;;  %v1996_v14 = vld [vmem:[#allocation10 + $0x928] sm:$0xff] }
 0x4ae   : > { %3472 = vmatpush1.bf16.msra.mxu1 %v3471_v21  ;;  %2252 = vmatprep.mubr.f32.mxu1 %v4770_v43  ;;  %v3485_v21 = vpack.c.bf16 %v1936_v28, %v1926_v13  ;;  %v2016_v29 = vld [vmem:[#allocation10 + $0x9c8] sm:$0xff] }
 0x4af   : > { %3474 = vmatprep.subr.bf16.mxu1 %v3473_v18  ;;  %v1946_v18 = vld [vmem:[#allocation10 + $0x798] sm:$0xff] }
 0x4b0   : > { %v3489_v20 = vpack.c.bf16 %v1956_v8, %v1946_v18 }
 0x4b2   : > { %3476 = vmatpush1.bf16.msra.mxu1 %v3475_v49  ;;  %v1945_v49 = vld [vmem:[#allocation10 + $0x790] sm:$0xff] }
 0x4b3   : > { %3478 = vmatprep.subr.bf16.mxu1 %v3477_v59  ;;  %v1966_v59 = vld [vmem:[#allocation10 + $0x838] sm:$0xff]  ;;  %v3491_v60 = vpack.c.bf16 %v1955_v0, %v1945_v49  ;;  %v2015_v49 = vld [vmem:[#allocation10 + $0x9c0] sm:$0xff] }
 0x4b4   : > { %v3493_v36 = vpack.c.bf16 %v1976_v61, %v1966_v59  ;;  %v1718_v0 = vld [vmem:[#allocation10 + $0x78] sm:$0xff] }
 0x4b6   : > { %3480 = vmatpush1.bf16.msra.mxu1 %v3479_v58  ;;  %v1965_v58 = vld [vmem:[#allocation10 + $0x830] sm:$0xff] }
 0x4b7   : > { %3482 = vmatprep.subr.bf16.mxu1 %v3481_v40  ;;  %v1986_v40 = vld [vmem:[#allocation10 + $0x8d8] sm:$0xff]  ;;  %v3495_v13 = vpack.c.bf16 %v1975_v6, %v1965_v58  ;;  %v1717_v58 = vld [vmem:[#allocation10 + $0x70] sm:$0xff] }
 0x4b8   : > { %v3497_v28 = vpack.c.bf16 %v1996_v14, %v1986_v40  ;;  %v1738_v6 = vld [vmem:[#allocation10 + $0x118] sm:$0xff] }
 0x4ba   : > { %3484 = vmatpush1.bf16.msra.mxu1 %v3483_v55  ;;  %v1985_v55 = vld [vmem:[#allocation10 + $0x8d0] sm:$0xff] }
 0x4bb   : > { %3486 = vmatprep.subr.bf16.mxu1 %v3485_v21  ;;  %v2006_v21 = vld [vmem:[#allocation10 + $0x978] sm:$0xff]  ;;  %v3499_v18 = vpack.c.bf16 %v1995_v48, %v1985_v55  ;;  %v1737_v55 = vld [vmem:[#allocation10 + $0x110] sm:$0xff] }
 0x4bc   : > { %v3501_v8 = vpack.c.bf16 %v2016_v29, %v2006_v21  ;;  %v1758_v48 = vld [vmem:[#allocation10 + $0x1b8] sm:$0xff] }
 0x4be   : > { %3488 = vmatpush1.bf16.msra.mxu1 %v3487_v9  ;;  %v2005_v9 = vld [vmem:[#allocation10 + $0x970] sm:$0xff] }
 0x4bf   : > { %3490 = vmatprep.subr.bf16.mxu1 %v3489_v20  ;;  %v1708_v20 = vld [vmem:[#allocation10 + $0x28] sm:$0xff]  ;;  %v3503_v59 = vpack.c.bf16 %v2015_v49, %v2005_v9  ;;  %v1778_v49 = vld [vmem:[#allocation10 + $0x258] sm:$0xff] }
 0x4c0   : > { %v3505_v61 = vpack.c.bf16 %v1718_v0, %v1708_v20  ;;  %v1768_v9 = vld [vmem:[#allocation10 + $0x208] sm:$0xff] }
 0x4c1   : > { %v3517_v0 = vpack.c.bf16 %v1778_v49, %v1768_v9 }
 0x4c2   : > { %3492 = vmatpush1.bf16.msra.mxu1 %v3491_v60  ;;  %v1707_v60 = vld [vmem:[#allocation10 + $0x20] sm:$0xff] }
 0x4c3   : > { %3494 = vmatprep.subr.bf16.mxu1 %v3493_v36  ;;  %v1728_v36 = vld [vmem:[#allocation10 + $0xc8] sm:$0xff]  ;;  %v3507_v40 = vpack.c.bf16 %v1717_v58, %v1707_v60  ;;  %v1798_v58 = vld [vmem:[#allocation10 + $0x2f8] sm:$0xff] }
 0x4c4   : > { %v3509_v14 = vpack.c.bf16 %v1738_v6, %v1728_v36  ;;  %v1788_v60 = vld [vmem:[#allocation10 + $0x2a8] sm:$0xff] }
 0x4c5   : > { %v3521_v6 = vpack.c.bf16 %v1798_v58, %v1788_v60 }
 0x4c6   : > { %3496 = vmatpush1.bf16.msra.mxu1 %v3495_v13  ;;  %v1727_v13 = vld [vmem:[#allocation10 + $0xc0] sm:$0xff] }
 0x4c7   : > { %3498 = vmatprep.subr.bf16.mxu1 %v3497_v28  ;;  %v1748_v28 = vld [vmem:[#allocation10 + $0x168] sm:$0xff]  ;;  %v3511_v21 = vpack.c.bf16 %v1737_v55, %v1727_v13  ;;  %v1818_v55 = vld [vmem:[#allocation10 + $0x398] sm:$0xff] }
 0x4c8   : > { %v3513_v29 = vpack.c.bf16 %v1758_v48, %v1748_v28  ;;  %v1808_v13 = vld [vmem:[#allocation10 + $0x348] sm:$0xff] }
 0x4c9   : > { %v3525_v48 = vpack.c.bf16 %v1818_v55, %v1808_v13 }
 0x4ca   : > { %3500 = vmatpush1.bf16.msra.mxu1 %v3499_v18  ;;  %v1747_v18 = vld [vmem:[#allocation10 + $0x160] sm:$0xff] }
 0x4cb   : > { %3502 = vmatprep.subr.bf16.mxu1 %v3501_v8  ;;  %v1757_v8 = vld [vmem:[#allocation10 + $0x1b0] sm:$0xff] }
 0x4cc   : > { %v3515_v20 = vpack.c.bf16 %v1757_v8, %v1747_v18  ;;  %v1828_v18 = vld [vmem:[#allocation10 + $0x3e8] sm:$0xff]  ;;  %v1838_v8 = vld [vmem:[#allocation10 + $0x438] sm:$0xff] }
 0x4cd   : > { %v3529_v49 = vpack.c.bf16 %v1838_v8, %v1828_v18 }
 0x4ce   : > { %3504 = vmatpush1.bf16.msra.mxu1 %v3503_v59  ;;  %v1767_v59 = vld [vmem:[#allocation10 + $0x200] sm:$0xff] }
 0x4cf   : > { %3506 = vmatprep.subr.bf16.mxu1 %v3505_v61  ;;  %v1777_v61 = vld [vmem:[#allocation10 + $0x250] sm:$0xff] }
 0x4d0   : > { %v3519_v36 = vpack.c.bf16 %v1777_v61, %v1767_v59  ;;  %v1848_v59 = vld [vmem:[#allocation10 + $0x488] sm:$0xff]  ;;  %v1858_v61 = vld [vmem:[#allocation10 + $0x4d8] sm:$0xff] }
 0x4d1   : > { %2253 = vmatmul.mubr.f32.vlgmr.msra.gmra.mrb[48].mxu1 %v4772_v52  ;;  %v3533_v58 = vpack.c.bf16 %v1858_v61, %v1848_v59 }
 0x4d2   : > { %2258 = vmatprep.mubr.f32.mxu1 %v4780_v3  ;;  %3508 = vmatpush1.bf16.msra.mxu1 %v3507_v40  ;;  %v1787_v40 = vld [vmem:[#allocation10 + $0x2a0] sm:$0xff] }
 0x4d3   : > { %3510 = vmatprep.subr.bf16.mxu1 %v3509_v14  ;;  %v1797_v14 = vld [vmem:[#allocation10 + $0x2f0] sm:$0xff] }
 0x4d4   : > { %v3523_v28 = vpack.c.bf16 %v1797_v14, %v1787_v40  ;;  %v1868_v40 = vld [vmem:[#allocation10 + $0x528] sm:$0xff]  ;;  %v1878_v14 = vld [vmem:[#allocation10 + $0x578] sm:$0xff] }
 0x4d5   : > { %2259 = vmatmul.mubr.f32.gmra.mrb[50].mxu1 %v4782_v12  ;;  %v3537_v55 = vpack.c.bf16 %v1878_v14, %v1868_v40 }
 0x4d6   : > { %2264 = vmatprep.mubr.f32.mxu1 %v4790_v32  ;;  %3512 = vmatpush1.bf16.msra.mxu1 %v3511_v21  ;;  %v1807_v21 = vld [vmem:[#allocation10 + $0x340] sm:$0xff] }
 0x4d7   : > { %3514 = vmatprep.subr.bf16.mxu1 %v3513_v29  ;;  %v1817_v29 = vld [vmem:[#allocation10 + $0x390] sm:$0xff] }
 0x4d8   : > { %v3527_v9 = vpack.c.bf16 %v1817_v29, %v1807_v21  ;;  %v1888_v21 = vld [vmem:[#allocation10 + $0x5c8] sm:$0xff]  ;;  %v1898_v29 = vld [vmem:[#allocation10 + $0x618] sm:$0xff] }
 0x4d9   : > { %2265 = vmatmul.mubr.f32.gmra.mrb[52].mxu1 %v4792_v46  ;;  %v3541_v8 = vpack.c.bf16 %v1898_v29, %v1888_v21 }
 0x4da   : > { %2270 = vmatprep.mubr.f32.mxu1 %v4800_v2  ;;  %3516 = vmatpush1.bf16.msra.mxu1 %v3515_v20  ;;  %v1827_v20 = vld [vmem:[#allocation10 + $0x3e0] sm:$0xff] }
 0x4db   : > { %3518 = vmatprep.subr.bf16.mxu1 %v3517_v0  ;;  %v1837_v0 = vld [vmem:[#allocation10 + $0x430] sm:$0xff] }
 0x4dc   : > { %v3531_v60 = vpack.c.bf16 %v1837_v0, %v1827_v20  ;;  %v1908_v20 = vld [vmem:[#allocation10 + $0x668] sm:$0xff]  ;;  %v1918_v0 = vld [vmem:[#allocation10 + $0x6b8] sm:$0xff] }
 0x4dd   : > { %2271 = vmatmul.mubr.f32.gmra.mrb[54].mxu1 %v4802_v41  ;;  %v3545_v61 = vpack.c.bf16 %v1918_v0, %v1908_v20 }
 0x4de   : > { %2276 = vmatprep.mubr.f32.mxu1 %v4810_v42  ;;  %3520 = vmatpush1.bf16.msra.mxu1 %v3519_v36  ;;  %v1847_v36 = vld [vmem:[#allocation10 + $0x480] sm:$0xff] }
 0x4df   : > { %3522 = vmatprep.subr.bf16.mxu1 %v3521_v6  ;;  %v1857_v6 = vld [vmem:[#allocation10 + $0x4d0] sm:$0xff] }
 0x4e0   : > { %v3535_v13 = vpack.c.bf16 %v1857_v6, %v1847_v36  ;;  %v1928_v36 = vld [vmem:[#allocation10 + $0x708] sm:$0xff]  ;;  %v1938_v6 = vld [vmem:[#allocation10 + $0x758] sm:$0xff] }
 0x4e1   : > { %2277 = vmatmul.mubr.f32.gmra.mrb[56].mxu1 %v4812_v54  ;;  %v3549_v14 = vpack.c.bf16 %v1938_v6, %v1928_v36 }
 0x4e2   : > { %2282 = vmatprep.mubr.f32.mxu1 %v4818_v7  ;;  %3524 = vmatpush1.bf16.msra.mxu1 %v3523_v28  ;;  %v1867_v28 = vld [vmem:[#allocation10 + $0x520] sm:$0xff] }
 0x4e3   : > { %3526 = vmatprep.subr.bf16.mxu1 %v3525_v48  ;;  %v1877_v48 = vld [vmem:[#allocation10 + $0x570] sm:$0xff] }
 0x4e4   : > { %v3539_v18 = vpack.c.bf16 %v1877_v48, %v1867_v28  ;;  %v1937_v28 = vld [vmem:[#allocation10 + $0x750] sm:$0xff]  ;;  %v1958_v48 = vld [vmem:[#allocation10 + $0x7f8] sm:$0xff] }
 0x4e5   : > { %2283 = vmatmul.mubr.f32.gmra.mrb[58].mxu1 %v4820_v27 }
 0x4e6   : > { %2288 = vmatprep.mubr.f32.mxu1 %v4826_v53  ;;  %3528 = vmatpush1.bf16.msra.mxu1 %v3527_v9  ;;  %v1887_v9 = vld [vmem:[#allocation10 + $0x5c0] sm:$0xff] }
 0x4e7   : > { %3530 = vmatprep.subr.bf16.mxu1 %v3529_v49  ;;  %v1897_v49 = vld [vmem:[#allocation10 + $0x610] sm:$0xff] }
 0x4e8   : > { %v3543_v59 = vpack.c.bf16 %v1897_v49, %v1887_v9  ;;  %v1957_v9 = vld [vmem:[#allocation10 + $0x7f0] sm:$0xff]  ;;  %v1978_v49 = vld [vmem:[#allocation10 + $0x898] sm:$0xff] }
 0x4e9   : > { %2289 = vmatmul.mubr.f32.gmra.mrb[60].mxu1 %v4828_v1 }
 0x4ea   : > { %2294 = vmatprep.mubr.f32.mxu1 %v4834_v22  ;;  %3532 = vmatpush1.bf16.msra.mxu1 %v3531_v60  ;;  %v1907_v60 = vld [vmem:[#allocation10 + $0x660] sm:$0xff] }
 0x4eb   : > { %3534 = vmatprep.subr.bf16.mxu1 %v3533_v58  ;;  %v1917_v58 = vld [vmem:[#allocation10 + $0x6b0] sm:$0xff] }
 0x4ec   : > { %v3547_v40 = vpack.c.bf16 %v1917_v58, %v1907_v60  ;;  %v1977_v60 = vld [vmem:[#allocation10 + $0x890] sm:$0xff]  ;;  %v1998_v58 = vld [vmem:[#allocation10 + $0x938] sm:$0xff] }
 0x4ed   : > { %2295 = vmatmul.mubr.f32.gmra.mrb[62].mxu1 %v4836_v38 }
 0x4ee   : > { %3536 = vmatpush1.bf16.msra.mxu1 %v3535_v13  ;;  %2365 = vmatprep.mubr.f32.mxu1 %v4770_v43  ;;  %v1927_v13 = vld [vmem:[#allocation10 + $0x700] sm:$0xff] }
 0x4ef   : > { %3538 = vmatprep.subr.bf16.mxu1 %v3537_v55  ;;  %v1948_v55 = vld [vmem:[#allocation10 + $0x7a8] sm:$0xff]  ;;  %v3551_v21 = vpack.c.bf16 %v1937_v28, %v1927_v13  ;;  %v1997_v13 = vld [vmem:[#allocation10 + $0x930] sm:$0xff]  ;;  %v2018_v28 = vld [vmem:[#allocation10 + $0x9d8] sm:$0xff] }
 0x4f0   : > { %v3553_v29 = vpack.c.bf16 %v1958_v48, %v1948_v55 }
 0x4f2   : > { %3540 = vmatpush1.bf16.msra.mxu1 %v3539_v18  ;;  %v1947_v18 = vld [vmem:[#allocation10 + $0x7a0] sm:$0xff] }
 0x4f3   : > { %3542 = vmatprep.subr.bf16.mxu1 %v3541_v8  ;;  %v1968_v8 = vld [vmem:[#allocation10 + $0x848] sm:$0xff]  ;;  %v3555_v20 = vpack.c.bf16 %v1957_v9, %v1947_v18  ;;  %v2017_v18 = vld [vmem:[#allocation10 + $0x9d0] sm:$0xff] }
 0x4f4   : > { %v3557_v0 = vpack.c.bf16 %v1978_v49, %v1968_v8  ;;  %v1720_v9 = vld [vmem:[#allocation10 + $0x88] sm:$0xff] }
 0x4f6   : > { %3544 = vmatpush1.bf16.msra.mxu1 %v3543_v59  ;;  %v1967_v59 = vld [vmem:[#allocation10 + $0x840] sm:$0xff] }
 0x4f7   : > { %3546 = vmatprep.subr.bf16.mxu1 %v3545_v61  ;;  %v1988_v61 = vld [vmem:[#allocation10 + $0x8e8] sm:$0xff]  ;;  %v3559_v36 = vpack.c.bf16 %v1977_v60, %v1967_v59  ;;  %v1719_v59 = vld [vmem:[#allocation10 + $0x80] sm:$0xff] }
 0x4f8   : > { %v3561_v6 = vpack.c.bf16 %v1998_v58, %v1988_v61  ;;  %v1740_v60 = vld [vmem:[#allocation10 + $0x128] sm:$0xff] }
 0x4fa   : > { %3548 = vmatpush1.bf16.msra.mxu1 %v3547_v40  ;;  %v1987_v40 = vld [vmem:[#allocation10 + $0x8e0] sm:$0xff] }
 0x4fb   : > { %3550 = vmatprep.subr.bf16.mxu1 %v3549_v14  ;;  %v2008_v14 = vld [vmem:[#allocation10 + $0x988] sm:$0xff]  ;;  %v3563_v55 = vpack.c.bf16 %v1997_v13, %v1987_v40  ;;  %v1739_v40 = vld [vmem:[#allocation10 + $0x120] sm:$0xff] }
 0x4fc   : > { %v3565_v48 = vpack.c.bf16 %v2018_v28, %v2008_v14  ;;  %v1760_v13 = vld [vmem:[#allocation10 + $0x1c8] sm:$0xff] }
 0x4fe   : > { %3552 = vmatpush1.bf16.msra.mxu1 %v3551_v21  ;;  %v2007_v21 = vld [vmem:[#allocation10 + $0x980] sm:$0xff] }
 0x4ff   : > { %3554 = vmatprep.subr.bf16.mxu1 %v3553_v29  ;;  %v1710_v29 = vld [vmem:[#allocation10 + $0x38] sm:$0xff]  ;;  %v3567_v8 = vpack.c.bf16 %v2017_v18, %v2007_v21  ;;  %v1780_v18 = vld [vmem:[#allocation10 + $0x268] sm:$0xff] }
 0x500   : > { %v3569_v49 = vpack.c.bf16 %v1720_v9, %v1710_v29  ;;  %v1770_v21 = vld [vmem:[#allocation10 + $0x218] sm:$0xff] }
 0x501   : > { %v3581_v9 = vpack.c.bf16 %v1780_v18, %v1770_v21 }
 0x502   : > { %3556 = vmatpush1.bf16.msra.mxu1 %v3555_v20  ;;  %v1709_v20 = vld [vmem:[#allocation10 + $0x30] sm:$0xff] }
 0x503   : > { %3558 = vmatprep.subr.bf16.mxu1 %v3557_v0  ;;  %v1730_v0 = vld [vmem:[#allocation10 + $0xd8] sm:$0xff]  ;;  %v3571_v61 = vpack.c.bf16 %v1719_v59, %v1709_v20  ;;  %v1800_v59 = vld [vmem:[#allocation10 + $0x308] sm:$0xff] }
 0x504   : > { %v3573_v58 = vpack.c.bf16 %v1740_v60, %v1730_v0  ;;  %v1790_v20 = vld [vmem:[#allocation10 + $0x2b8] sm:$0xff] }
 0x505   : > { %v3585_v60 = vpack.c.bf16 %v1800_v59, %v1790_v20 }
 0x506   : > { %3560 = vmatpush1.bf16.msra.mxu1 %v3559_v36  ;;  %v1729_v36 = vld [vmem:[#allocation10 + $0xd0] sm:$0xff] }
 0x507   : > { %3562 = vmatprep.subr.bf16.mxu1 %v3561_v6  ;;  %v1750_v6 = vld [vmem:[#allocation10 + $0x178] sm:$0xff]  ;;  %v3575_v14 = vpack.c.bf16 %v1739_v40, %v1729_v36  ;;  %v1820_v40 = vld [vmem:[#allocation10 + $0x3a8] sm:$0xff] }
 0x508   : > { %v3577_v28 = vpack.c.bf16 %v1760_v13, %v1750_v6  ;;  %v1810_v36 = vld [vmem:[#allocation10 + $0x358] sm:$0xff] }
 0x509   : > { %v3589_v13 = vpack.c.bf16 %v1820_v40, %v1810_v36 }
 0x50a   : > { %3564 = vmatpush1.bf16.msra.mxu1 %v3563_v55  ;;  %v1749_v55 = vld [vmem:[#allocation10 + $0x170] sm:$0xff] }
 0x50b   : > { %3566 = vmatprep.subr.bf16.mxu1 %v3565_v48  ;;  %v1759_v48 = vld [vmem:[#allocation10 + $0x1c0] sm:$0xff] }
 0x50c   : > { %v3579_v29 = vpack.c.bf16 %v1759_v48, %v1749_v55  ;;  %v1830_v55 = vld [vmem:[#allocation10 + $0x3f8] sm:$0xff]  ;;  %v1840_v48 = vld [vmem:[#allocation10 + $0x448] sm:$0xff] }
 0x50d   : > { %v3593_v18 = vpack.c.bf16 %v1840_v48, %v1830_v55 }
 0x50e   : > { %3568 = vmatpush1.bf16.msra.mxu1 %v3567_v8  ;;  %v1769_v8 = vld [vmem:[#allocation10 + $0x210] sm:$0xff] }
 0x50f   : > { %3570 = vmatprep.subr.bf16.mxu1 %v3569_v49  ;;  %v1779_v49 = vld [vmem:[#allocation10 + $0x260] sm:$0xff] }
 0x510   : > { %v3583_v0 = vpack.c.bf16 %v1779_v49, %v1769_v8  ;;  %v1850_v8 = vld [vmem:[#allocation10 + $0x498] sm:$0xff]  ;;  %v1860_v49 = vld [vmem:[#allocation10 + $0x4e8] sm:$0xff] }
 0x511   : > { %2366 = vmatmul.mubr.f32.vlgmr.msra.gmra.mrb[64].mxu1 %v4772_v52  ;;  %v3597_v59 = vpack.c.bf16 %v1860_v49, %v1850_v8 }
 0x512   : > { %2371 = vmatprep.mubr.f32.mxu1 %v4780_v3  ;;  %3572 = vmatpush1.bf16.msra.mxu1 %v3571_v61  ;;  %v1789_v61 = vld [vmem:[#allocation10 + $0x2b0] sm:$0xff] }
 0x513   : > { %3574 = vmatprep.subr.bf16.mxu1 %v3573_v58  ;;  %v1799_v58 = vld [vmem:[#allocation10 + $0x300] sm:$0xff] }
 0x514   : > { %v3587_v6 = vpack.c.bf16 %v1799_v58, %v1789_v61  ;;  %v1870_v61 = vld [vmem:[#allocation10 + $0x538] sm:$0xff]  ;;  %v1880_v58 = vld [vmem:[#allocation10 + $0x588] sm:$0xff] }
 0x515   : > { %2372 = vmatmul.mubr.f32.gmra.mrb[66].mxu1 %v4782_v12  ;;  %v3601_v40 = vpack.c.bf16 %v1880_v58, %v1870_v61 }
 0x516   : > { %2377 = vmatprep.mubr.f32.mxu1 %v4790_v32  ;;  %3576 = vmatpush1.bf16.msra.mxu1 %v3575_v14  ;;  %v1809_v14 = vld [vmem:[#allocation10 + $0x350] sm:$0xff] }
 0x517   : > { %3578 = vmatprep.subr.bf16.mxu1 %v3577_v28  ;;  %v1819_v28 = vld [vmem:[#allocation10 + $0x3a0] sm:$0xff] }
 0x518   : > { %v3591_v21 = vpack.c.bf16 %v1819_v28, %v1809_v14  ;;  %v1890_v14 = vld [vmem:[#allocation10 + $0x5d8] sm:$0xff]  ;;  %v1900_v28 = vld [vmem:[#allocation10 + $0x628] sm:$0xff] }
 0x519   : > { %2378 = vmatmul.mubr.f32.gmra.mrb[68].mxu1 %v4792_v46  ;;  %v3605_v48 = vpack.c.bf16 %v1900_v28, %v1890_v14  ;;  %v1949_v28 = vld [vmem:[#allocation10 + $0x7b0] sm:$0xff] }
 0x51a   : > { %2383 = vmatprep.mubr.f32.mxu1 %v4800_v2  ;;  %3580 = vmatpush1.bf16.msra.mxu1 %v3579_v29  ;;  %v1829_v29 = vld [vmem:[#allocation10 + $0x3f0] sm:$0xff] }
 0x51b   : > { %3582 = vmatprep.subr.bf16.mxu1 %v3581_v9  ;;  %v1839_v9 = vld [vmem:[#allocation10 + $0x440] sm:$0xff] }
 0x51c   : > { %v3595_v20 = vpack.c.bf16 %v1839_v9, %v1829_v29  ;;  %v1910_v29 = vld [vmem:[#allocation10 + $0x678] sm:$0xff]  ;;  %v1920_v9 = vld [vmem:[#allocation10 + $0x6c8] sm:$0xff] }
 0x51d   : > { %2384 = vmatmul.mubr.f32.gmra.mrb[70].mxu1 %v4802_v41  ;;  %v3609_v49 = vpack.c.bf16 %v1920_v9, %v1910_v29  ;;  %v1969_v9 = vld [vmem:[#allocation10 + $0x850] sm:$0xff] }
 0x51e   : > { %2389 = vmatprep.mubr.f32.mxu1 %v4810_v42  ;;  %3584 = vmatpush1.bf16.msra.mxu1 %v3583_v0  ;;  %v1849_v0 = vld [vmem:[#allocation10 + $0x490] sm:$0xff] }
 0x51f   : > { %3586 = vmatprep.subr.bf16.mxu1 %v3585_v60  ;;  %v1859_v60 = vld [vmem:[#allocation10 + $0x4e0] sm:$0xff] }
 0x520   : > { %v3599_v36 = vpack.c.bf16 %v1859_v60, %v1849_v0  ;;  %v1930_v0 = vld [vmem:[#allocation10 + $0x718] sm:$0xff]  ;;  %v1940_v60 = vld [vmem:[#allocation10 + $0x768] sm:$0xff] }
 0x521   : > { %2390 = vmatmul.mubr.f32.gmra.mrb[72].mxu1 %v4812_v54  ;;  %v3613_v58 = vpack.c.bf16 %v1940_v60, %v1930_v0  ;;  %v1989_v60 = vld [vmem:[#allocation10 + $0x8f0] sm:$0xff] }
 0x522   : > { %2395 = vmatprep.mubr.f32.mxu1 %v4818_v7  ;;  %3588 = vmatpush1.bf16.msra.mxu1 %v3587_v6  ;;  %v1869_v6 = vld [vmem:[#allocation10 + $0x530] sm:$0xff] }
 0x523   : > { %3590 = vmatprep.subr.bf16.mxu1 %v3589_v13  ;;  %v1879_v13 = vld [vmem:[#allocation10 + $0x580] sm:$0xff] }
 0x524   : > { %v3603_v55 = vpack.c.bf16 %v1879_v13, %v1869_v6  ;;  %v1960_v6 = vld [vmem:[#allocation10 + $0x808] sm:$0xff] }
 0x525   : > { %2396 = vmatmul.mubr.f32.gmra.mrb[74].mxu1 %v4820_v27 }
 0x526   : > { %2401 = vmatprep.mubr.f32.mxu1 %v4826_v53  ;;  %3592 = vmatpush1.bf16.msra.mxu1 %v3591_v21  ;;  %v1889_v21 = vld [vmem:[#allocation10 + $0x5d0] sm:$0xff] }
 0x527   : > { %3594 = vmatprep.subr.bf16.mxu1 %v3593_v18  ;;  %v1899_v18 = vld [vmem:[#allocation10 + $0x620] sm:$0xff] }
 0x528   : > { %v3607_v8 = vpack.c.bf16 %v1899_v18, %v1889_v21  ;;  %v1980_v21 = vld [vmem:[#allocation10 + $0x8a8] sm:$0xff] }
 0x529   : > { %2402 = vmatmul.mubr.f32.gmra.mrb[76].mxu1 %v4828_v1 }
 0x52a   : > { %2407 = vmatprep.mubr.f32.mxu1 %v4834_v22  ;;  %3596 = vmatpush1.bf16.msra.mxu1 %v3595_v20  ;;  %v1909_v20 = vld [vmem:[#allocation10 + $0x670] sm:$0xff] }
 0x52b   : > { %3598 = vmatprep.subr.bf16.mxu1 %v3597_v59  ;;  %v1919_v59 = vld [vmem:[#allocation10 + $0x6c0] sm:$0xff] }
 0x52c   : > { %v3611_v61 = vpack.c.bf16 %v1919_v59, %v1909_v20  ;;  %v2000_v20 = vld [vmem:[#allocation10 + $0x948] sm:$0xff] }
 0x52d   : > { %2408 = vmatmul.mubr.f32.gmra.mrb[78].mxu1 %v4836_v38 }
 0x52e   : > { %3600 = vmatpush1.bf16.msra.mxu1 %v3599_v36  ;;  %2478 = vmatprep.mubr.f32.mxu1 %v4770_v43  ;;  %v1929_v43 = vld [vmem:[#allocation10 + $0x710] sm:$0xff]  ;;  %v1939_v36 = vld [vmem:[#allocation10 + $0x760] sm:$0xff] }
 0x52f   : > { %3602 = vmatprep.subr.bf16.mxu1 %v3601_v40  ;;  %v1950_v40 = vld [vmem:[#allocation10 + $0x7b8] sm:$0xff]  ;;  %v3615_v13 = vpack.c.bf16 %v1939_v36, %v1929_v43  ;;  %v2020_v43 = vld [vmem:[#allocation10 + $0x9e8] sm:$0xff] }
 0x530   : > { %v3617_v14 = vpack.c.bf16 %v1960_v6, %v1950_v40  ;;  %v2009_v6 = vld [vmem:[#allocation10 + $0x990] sm:$0xff] }
 0x532   : > { %3604 = vmatpush1.bf16.msra.mxu1 %v3603_v55  ;;  %v1959_v55 = vld [vmem:[#allocation10 + $0x800] sm:$0xff] }
 0x533   : > { %3606 = vmatprep.subr.bf16.mxu1 %v3605_v48  ;;  %v1970_v48 = vld [vmem:[#allocation10 + $0x858] sm:$0xff]  ;;  %v3619_v18 = vpack.c.bf16 %v1959_v55, %v1949_v28 }
 0x534   : > { %v3621_v29 = vpack.c.bf16 %v1980_v21, %v1970_v48 }
 0x536   : > { %3608 = vmatpush1.bf16.msra.mxu1 %v3607_v8  ;;  %v1979_v8 = vld [vmem:[#allocation10 + $0x8a0] sm:$0xff] }
 0x537   : > { %3610 = vmatprep.subr.bf16.mxu1 %v3609_v49  ;;  %v1990_v49 = vld [vmem:[#allocation10 + $0x8f8] sm:$0xff]  ;;  %v3623_v59 = vpack.c.bf16 %v1979_v8, %v1969_v9 }
 0x538   : > { %v3625_v0 = vpack.c.bf16 %v2000_v20, %v1990_v49 }
 0x53a   : > { %3612 = vmatpush1.bf16.msra.mxu1 %v3611_v61  ;;  %v1999_v61 = vld [vmem:[#allocation10 + $0x940] sm:$0xff] }
 0x53b   : > { %3614 = vmatprep.subr.bf16.mxu1 %v3613_v58  ;;  %v2010_v58 = vld [vmem:[#allocation10 + $0x998] sm:$0xff]  ;;  %v3627_v36 = vpack.c.bf16 %v1999_v61, %v1989_v60 }
 0x53c   : > { %v3629_v40 = vpack.c.bf16 %v2020_v43, %v2010_v58 }
 0x53e   : > { %3616 = vmatpush1.bf16.msra.mxu1 %v3615_v13  ;;  %v2019_v13 = vld [vmem:[#allocation10 + $0x9e0] sm:$0xff] }
 0x53f   : > { %3618 = vmatprep.subr.bf16.mxu1 %v3617_v14  ;;  %v3631_v14 = vpack.c.bf16 %v2019_v13, %v2009_v6 }
 0x542   : > { %3620 = vmatpush1.bf16.msra.mxu1 %v3619_v18 }
 0x543   : > { %3622 = vmatprep.subr.bf16.mxu1 %v3621_v29 }
 0x546   : > { %3624 = vmatpush1.bf16.msra.mxu1 %v3623_v59 }
 0x547   : > { %3626 = vmatprep.subr.bf16.mxu1 %v3625_v0 }
 0x54a   : > { %3628 = vmatpush1.bf16.msra.mxu1 %v3627_v36 }
 0x54b   : > { %3630 = vmatprep.subr.bf16.mxu1 %v3629_v40 }
 0x54e   : > { %3632 = vmatpush1.bf16.msra.mxu1 %v3631_v14 }
 0x54f   : > { %3697 = vmatprep.subr.bf16.mxu1 %v4638_v16  ;;  %v4889_v16 = vld [vmem:[#allocation11 + $0x5] sm:$0xff] }
 0x551   : > { %2479 = vmatmul.mubr.f32.vlgmr.msra.gmra.mrb[80].mxu1 %v4772_v52 }
 0x552   : > { %2484 = vmatprep.mubr.f32.mxu1 %v4780_v3  ;;  %3713 = vmatpush1.bf16.msra.mxu1 %v4640_v19  ;;  %v467_v19 = vld [vmem:[#allocation11 + $0xd] sm:$0x3] }
 0x553   : > { %3698 = vmatprep.subr.bf16.mxu1 %v4644_v23  ;;  %v4895_v23 = vrot.slane %v4889_v16, %v4610_v37 }
 0x555   : > { %2485 = vmatmul.mubr.f32.gmra.mrb[82].mxu1 %v4782_v12 }
 0x556   : > { %2490 = vmatprep.mubr.f32.mxu1 %v4790_v32  ;;  %3714 = vmatpush1.bf16.msra.mxu1 %v4646_v25  ;;  %v4898_v25 = vrot.slane %v467_v19, %v4610_v37 }
 0x557   : > { %3699 = vmatprep.subr.bf16.mxu1 %v4649_v30  ;;  %v4904_v30 = vrot.slane %v4889_v16, %v4613_v39 }
 0x559   : > { %2491 = vmatmul.mubr.f32.gmra.mrb[84].mxu1 %v4792_v46 }
 0x55a   : > { %2496 = vmatprep.mubr.f32.mxu1 %v4800_v2  ;;  %3715 = vmatpush1.bf16.msra.mxu1 %v4652_v31  ;;  %v4907_v31 = vrot.slane %v467_v19, %v4613_v39  ;;  %v5222_v19 = vld [vmem:[#allocation23_spill] sm:$0xff] }
 0x55b   : > { %3700 = vmatprep.subr.bf16.mxu1 %v4655_v34 }
 0x55d   : > { %2497 = vmatmul.mubr.f32.gmra.mrb[86].mxu1 %v4802_v41 }
 0x55e   : > { %2502 = vmatprep.mubr.f32.mxu1 %v4810_v42  ;;  %3716 = vmatpush1.bf16.msra.mxu1 %v4658_v44 }
 0x55f   : > { %3701 = vmatprep.subr.bf16.mxu1 %v4661_v45 }
 0x561   : > { %2503 = vmatmul.mubr.f32.gmra.mrb[88].mxu1 %v4812_v54 }
 0x562   : > { %2508 = vmatprep.mubr.f32.mxu1 %v4818_v7  ;;  %3717 = vmatpush1.bf16.msra.mxu1 %v4664_v50 }
 0x563   : > { %3702 = vmatprep.subr.bf16.mxu1 %v4667_v51 }
 0x564   : > { %v2141_v34 = vpop.f32.mrb[32].mxu1  ;;  %v2593_v44 = vpop.f32.mrb[16].mxu0 }
 0x565   : > { %v2142_v45 = vadd.f32 %v2141_v34, %v4895_v23  ;;  %2509 = vmatmul.mubr.f32.gmra.mrb[90].mxu1 %v4820_v27  ;;  %v2594_v37 = vadd.f32 %v2593_v44, %v4898_v25  ;;  %v2143_v52 = vpop.f32.mrb[33].mxu1  ;;  %v2595_v3 = vpop.f32.mrb[17].mxu0  ;;  %v5223_v34 = vld [vmem:[#allocation24_spill] sm:$0xff]  ;;  %v5224_v44 = vld [vmem:[#allocation25_spill] sm:$0xff] }
 0x566   : > { %v2144_v50 = vadd.f32 %v2143_v52, %v4904_v30  ;;  %2514 = vmatprep.mubr.f32.mxu1 %v4826_v53  ;;  %3718 = vmatpush1.bf16.msra.mxu1 %v4670_v56  ;;  %v2596_v39 = vadd.f32 %v2595_v3, %v4907_v31 }
 0x567   : > { %2640 = vst [vmem:[%s4919_s21] sm:$0xff] %v2142_v45  ;;  %2648 = vst [vmem:[%s4919_s21 + $0x40] sm:$0xff] %v2594_v37  ;;  %3703 = vmatprep.subr.bf16.mxu1 %v4673_v57  ;;  %v5227_v45 = vld [vmem:[#allocation28_spill] sm:$0xff] }
 0x568   : > { %2641 = vst [vmem:[%s4919_s21 + $0x8] sm:$0xff] %v2144_v50  ;;  %2649 = vst [vmem:[%s4919_s21 + $0x48] sm:$0xff] %v2596_v39  ;;  %v2147_v51 = vpop.f32.mrb[34].mxu1  ;;  %v2599_v56 = vpop.f32.mrb[18].mxu0 }
 0x569   : > { %v2148_v12 = vadd.f32 %v2147_v51, %v4895_v23  ;;  %2515 = vmatmul.mubr.f32.gmra.mrb[92].mxu1 %v4828_v1  ;;  %v2600_v32 = vadd.f32 %v2599_v56, %v4898_v25  ;;  %v2149_v46 = vpop.f32.mrb[35].mxu1  ;;  %v2601_v2 = vpop.f32.mrb[19].mxu0 }
 0x56a   : > { %v2150_v41 = vadd.f32 %v2149_v46, %v4904_v30  ;;  %2520 = vmatprep.mubr.f32.mxu1 %v4834_v22  ;;  %3719 = vmatpush1.bf16.msra.mxu1 %v4676_v62  ;;  %v2602_v57 = vadd.f32 %v2601_v2, %v4907_v31 }
 0x56b   : > { %2650 = vst [vmem:[%s4919_s21 + $0x50] sm:$0xff] %v2148_v12  ;;  %2658 = vst [vmem:[%s4919_s21 + $0x90] sm:$0xff] %v2600_v32  ;;  %3704 = vmatprep.subr.bf16.mxu1 %v4679_v63 }
 0x56c   : > { %2651 = vst [vmem:[%s4919_s21 + $0x58] sm:$0xff] %v2150_v41  ;;  %2659 = vst [vmem:[%s4919_s21 + $0x98] sm:$0xff] %v2602_v57  ;;  %v2153_v28 = vpop.f32.mrb[36].mxu1  ;;  %v2605_v55 = vpop.f32.mrb[20].mxu0 }
 0x56d   : > { %v2154_v48 = vadd.f32 %v2153_v28, %v4895_v23  ;;  %2521 = vmatmul.mubr.f32.gmra.mrb[94].mxu1 %v4836_v38  ;;  %v2606_v62 = vadd.f32 %v2605_v55, %v4898_v25  ;;  %v2155_v21 = vpop.f32.mrb[37].mxu1  ;;  %v2607_v18 = vpop.f32.mrb[21].mxu0 }
 0x56e   : > { %v2156_v29 = vadd.f32 %v2155_v21, %v4904_v30  ;;  %3720 = vmatpush1.bf16.msra.mxu1 %v4682_v4  ;;  %v2608_v63 = vadd.f32 %v2607_v18, %v4907_v31  ;;  %2615 = vmatprep.mubr.f32.mxu1 %v4810_v42 }
 0x56f   : > { %2660 = vst [vmem:[%s4919_s21 + $0xa0] sm:$0xff] %v2154_v48  ;;  %2668 = vst [vmem:[%s4919_s21 + $0xe0] sm:$0xff] %v2606_v62  ;;  %3705 = vmatprep.subr.bf16.mxu1 %v4685_v5 }
 0x570   : > { %2661 = vst [vmem:[%s4919_s21 + $0xa8] sm:$0xff] %v2156_v29  ;;  %2669 = vst [vmem:[%s4919_s21 + $0xe8] sm:$0xff] %v2608_v63  ;;  %v2159_v9 = vpop.f32.mrb[38].mxu1  ;;  %v2611_v8 = vpop.f32.mrb[22].mxu0 }
 0x571   : > { %v2160_v49 = vadd.f32 %v2159_v9, %v4895_v23  ;;  %v2612_v4 = vadd.f32 %v2611_v8, %v4898_v25  ;;  %v2161_v20 = vpop.f32.mrb[39].mxu1  ;;  %v2613_v59 = vpop.f32.mrb[23].mxu0 }
 0x572   : > { %v2162_v42 = vadd.f32 %v2161_v20, %v4904_v30  ;;  %3721 = vmatpush1.bf16.msra.mxu1 %v4688_v10  ;;  %v2614_v0 = vadd.f32 %v2613_v59, %v4907_v31 }
 0x573   : > { %2670 = vst [vmem:[%s4919_s21 + $0xf0] sm:$0xff] %v2160_v49  ;;  %2678 = vst [vmem:[%s4919_s21 + $0x130] sm:$0xff] %v2612_v4  ;;  %3706 = vmatprep.subr.bf16.mxu1 %v4691_v11 }
 0x574   : > { %2671 = vst [vmem:[%s4919_s21 + $0xf8] sm:$0xff] %v2162_v42  ;;  %2679 = vst [vmem:[%s4919_s21 + $0x138] sm:$0xff] %v2614_v0  ;;  %v2165_v5 = vpop.f32.mrb[40].mxu1 }
 0x575   : > { %v2166_v60 = vadd.f32 %v2165_v5, %v4895_v23  ;;  %v2167_v61 = vpop.f32.mrb[41].mxu1 }
 0x576   : > { %v2168_v58 = vadd.f32 %v2167_v61, %v4904_v30  ;;  %3722 = vmatpush1.bf16.msra.mxu1 %v4694_v15 }
 0x577   : > { %2680 = vst [vmem:[%s4919_s21 + $0x140] sm:$0xff] %v2166_v60  ;;  %3707 = vmatprep.subr.bf16.mxu1 %v4697_v17 }
 0x578   : > { %2681 = vst [vmem:[%s4919_s21 + $0x148] sm:$0xff] %v2168_v58  ;;  %v2171_v10 = vpop.f32.mrb[42].mxu1 }
 0x579   : > { %v2172_v11 = vadd.f32 %v2171_v10, %v4895_v23  ;;  %v2173_v43 = vpop.f32.mrb[43].mxu1 }
 0x57a   : > { %v2174_v36 = vadd.f32 %v2173_v43, %v4904_v30  ;;  %3723 = vmatpush1.bf16.msra.mxu1 %v4700_v24 }
 0x57b   : > { %2690 = vst [vmem:[%s4919_s21 + $0x190] sm:$0xff] %v2172_v11  ;;  %3708 = vmatprep.subr.bf16.mxu1 %v4703_v26 }
 0x57c   : > { %2691 = vst [vmem:[%s4919_s21 + $0x198] sm:$0xff] %v2174_v36  ;;  %v2177_v15 = vpop.f32.mrb[44].mxu1 }
 0x57d   : > { %v2178_v40 = vadd.f32 %v2177_v15, %v4895_v23  ;;  %v2179_v17 = vpop.f32.mrb[45].mxu1 }
 0x57e   : > { %v2180_v6 = vadd.f32 %v2179_v17, %v4904_v30  ;;  %3724 = vmatpush1.bf16.msra.mxu1 %v4706_v33  ;;  %v5225_v33 = vld [vmem:[#allocation26_spill] sm:$0xff] }
 0x57f   : > { %2700 = vst [vmem:[%s4919_s21 + $0x1e0] sm:$0xff] %v2178_v40  ;;  %3709 = vmatprep.subr.bf16.mxu1 %v4709_v35  ;;  %v5226_v35 = vld [vmem:[#allocation27_spill] sm:$0xff] }
 0x580   : > { %2701 = vst [vmem:[%s4919_s21 + $0x1e8] sm:$0xff] %v2180_v6  ;;  %v2183_v13 = vpop.f32.mrb[46].mxu1 }
 0x581   : > { %v2184_v24 = vadd.f32 %v2183_v13, %v4895_v23  ;;  %v2185_v14 = vpop.f32.mrb[47].mxu1 }
 0x582   : > { %v2186_v26 = vadd.f32 %v2185_v14, %v4904_v30  ;;  %3725 = vmatpush1.bf16.msra.mxu1 %v4712_v47  ;;  %v5228_v47 = vld [vmem:[#allocation22_spill] sm:$0xff] }
 0x583   : > { %2710 = vst [vmem:[%s4919_s21 + $0x230] sm:$0xff] %v2184_v24  ;;  %3710 = vmatprep.subr.bf16.mxu1 %v5222_v19  ;;  %v2035_v23 = vsub.s32 2, %v5228_v47  ;;  %v2039_v30 = vsub.s32 3, %v5228_v47  ;;  %v2043_v42 = vsub.s32 4, %v5228_v47  ;;  %v2047_v0 = vsub.s32 5, %v5228_v47 }
 0x584   : > { %2711 = vst [vmem:[%s4919_s21 + $0x238] sm:$0xff] %v2186_v26 }
 0x585   : > { %v5019_v5 = vrot.slane %v4889_v16, %v2043_v42  ;;  %v5022_v60 = vrot.slane %v4889_v16, %v2047_v0 }
 0x586   : > { %3726 = vmatpush1.bf16.msra.mxu1 %v5223_v34 }
 0x587   : > { %3711 = vmatprep.subr.bf16.mxu1 %v5224_v44 }
 0x58a   : > { %3727 = vmatpush1.bf16.msra.mxu1 %v5225_v33 }
 0x58b   : > { %3712 = vmatprep.subr.bf16.mxu1 %v5226_v35 }
 0x58e   : > { %3728 = vmatpush1.bf16.msra.mxu1 %v5227_v45 }
 0x591   : > { %2616 = vmatmul.mubr.f32.vlgmr.msra.gmra.mrb[96].mxu1 %v4812_v54  ;;  %v2036_v54 = vrot.slane %v4889_v16, %v2035_v23 }
 0x592   : > { %2621 = vmatprep.mubr.f32.mxu1 %v4818_v7  ;;  %v2040_v7 = vrot.slane %v4889_v16, %v2039_v30 }
 0x595   : > { %2622 = vmatmul.mubr.f32.gmra.mrb[98].mxu1 %v4820_v27 }
 0x596   : > { %2627 = vmatprep.mubr.f32.mxu1 %v4826_v53 }
 0x599   : > { %2628 = vmatmul.mubr.f32.gmra.mrb[100].mxu1 %v4828_v1 }
 0x59a   : > { %2633 = vmatprep.mubr.f32.mxu1 %v4834_v22 }
 0x59d   : > { %2634 = vmatmul.mubr.f32.gmra.mrb[102].mxu1 %v4836_v38 }
 0x5a4   : > { %v2254_v37 = vpop.f32.mrb[48].mxu1 }
 0x5a5   : > { %v2255_v27 = vadd.f32 %v2254_v37, %v2036_v54  ;;  %v2256_v53 = vpop.f32.mrb[49].mxu1 }
 0x5a6   : > { %v2257_v1 = vadd.f32 %v2256_v53, %v2040_v7 }
 0x5a7   : > { %2642 = vst [vmem:[%s4919_s21 + $0x10] sm:$0xff] %v2255_v27 }
 0x5a8   : > { %2643 = vst [vmem:[%s4919_s21 + $0x18] sm:$0xff] %v2257_v1  ;;  %v2260_v22 = vpop.f32.mrb[50].mxu1 }
 0x5a9   : > { %v2261_v38 = vadd.f32 %v2260_v22, %v2036_v54  ;;  %v2262_v52 = vpop.f32.mrb[51].mxu1 }
 0x5aa   : > { %v2263_v3 = vadd.f32 %v2262_v52, %v2040_v7 }
 0x5ab   : > { %2652 = vst [vmem:[%s4919_s21 + $0x60] sm:$0xff] %v2261_v38 }
 0x5ac   : > { %2653 = vst [vmem:[%s4919_s21 + $0x68] sm:$0xff] %v2263_v3  ;;  %v2266_v50 = vpop.f32.mrb[52].mxu1 }
 0x5ad   : > { %v2267_v39 = vadd.f32 %v2266_v50, %v2036_v54  ;;  %v2268_v51 = vpop.f32.mrb[53].mxu1 }
 0x5ae   : > { %v2269_v56 = vadd.f32 %v2268_v51, %v2040_v7 }
 0x5af   : > { %2662 = vst [vmem:[%s4919_s21 + $0xb0] sm:$0xff] %v2267_v39 }
 0x5b0   : > { %2663 = vst [vmem:[%s4919_s21 + $0xb8] sm:$0xff] %v2269_v56  ;;  %v2272_v12 = vpop.f32.mrb[54].mxu1 }
 0x5b1   : > { %v2273_v32 = vadd.f32 %v2272_v12, %v2036_v54  ;;  %v2274_v46 = vpop.f32.mrb[55].mxu1 }
 0x5b2   : > { %v2275_v2 = vadd.f32 %v2274_v46, %v2040_v7 }
 0x5b3   : > { %2672 = vst [vmem:[%s4919_s21 + $0x100] sm:$0xff] %v2273_v32 }
 0x5b4   : > { %2673 = vst [vmem:[%s4919_s21 + $0x108] sm:$0xff] %v2275_v2  ;;  %v2278_v41 = vpop.f32.mrb[56].mxu1 }
 0x5b5   : > { %v2279_v57 = vadd.f32 %v2278_v41, %v2036_v54  ;;  %v2280_v28 = vpop.f32.mrb[57].mxu1 }
 0x5b6   : > { %v2281_v55 = vadd.f32 %v2280_v28, %v2040_v7 }
 0x5b7   : > { %2682 = vst [vmem:[%s4919_s21 + $0x150] sm:$0xff] %v2279_v57 }
 0x5b8   : > { %2683 = vst [vmem:[%s4919_s21 + $0x158] sm:$0xff] %v2281_v55  ;;  %v2284_v48 = vpop.f32.mrb[58].mxu1 }
 0x5b9   : > { %v2285_v62 = vadd.f32 %v2284_v48, %v2036_v54  ;;  %v2286_v21 = vpop.f32.mrb[59].mxu1 }
 0x5ba   : > { %v2287_v18 = vadd.f32 %v2286_v21, %v2040_v7 }
 0x5bb   : > { %2692 = vst [vmem:[%s4919_s21 + $0x1a0] sm:$0xff] %v2285_v62 }
 0x5bc   : > { %2693 = vst [vmem:[%s4919_s21 + $0x1a8] sm:$0xff] %v2287_v18  ;;  %v2290_v29 = vpop.f32.mrb[60].mxu1 }
 0x5bd   : > { %v2291_v63 = vadd.f32 %v2290_v29, %v2036_v54  ;;  %v2292_v9 = vpop.f32.mrb[61].mxu1 }
 0x5be   : > { %v2293_v8 = vadd.f32 %v2292_v9, %v2040_v7 }
 0x5bf   : > { %2702 = vst [vmem:[%s4919_s21 + $0x1f0] sm:$0xff] %v2291_v63 }
 0x5c0   : > { %2703 = vst [vmem:[%s4919_s21 + $0x1f8] sm:$0xff] %v2293_v8  ;;  %v2296_v49 = vpop.f32.mrb[62].mxu1 }
 0x5c1   : > { %v2297_v4 = vadd.f32 %v2296_v49, %v2036_v54  ;;  %v2298_v20 = vpop.f32.mrb[63].mxu1 }
 0x5c2   : > { %v2299_v59 = vadd.f32 %v2298_v20, %v2040_v7 }
 0x5c3   : > { %2712 = vst [vmem:[%s4919_s21 + $0x240] sm:$0xff] %v2297_v4 }
 0x5c4   : > { %2713 = vst [vmem:[%s4919_s21 + $0x248] sm:$0xff] %v2299_v59 }
 0x5e4   : > { %v2367_v61 = vpop.f32.mrb[64].mxu1 }
 0x5e5   : > { %v2368_v58 = vadd.f32 %v2367_v61, %v5019_v5  ;;  %v2369_v10 = vpop.f32.mrb[65].mxu1 }
 0x5e6   : > { %v2370_v11 = vadd.f32 %v2369_v10, %v5022_v60 }
 0x5e7   : > { %2644 = vst [vmem:[%s4919_s21 + $0x20] sm:$0xff] %v2368_v58 }
 0x5e8   : > { %2645 = vst [vmem:[%s4919_s21 + $0x28] sm:$0xff] %v2370_v11  ;;  %v2373_v43 = vpop.f32.mrb[66].mxu1 }
 0x5e9   : > { %v2374_v36 = vadd.f32 %v2373_v43, %v5019_v5  ;;  %v2375_v15 = vpop.f32.mrb[67].mxu1 }
 0x5ea   : > { %v2376_v40 = vadd.f32 %v2375_v15, %v5022_v60 }
 0x5eb   : > { %2654 = vst [vmem:[%s4919_s21 + $0x70] sm:$0xff] %v2374_v36 }
 0x5ec   : > { %2655 = vst [vmem:[%s4919_s21 + $0x78] sm:$0xff] %v2376_v40  ;;  %v2379_v17 = vpop.f32.mrb[68].mxu1 }
 0x5ed   : > { %v2380_v6 = vadd.f32 %v2379_v17, %v5019_v5  ;;  %v2381_v13 = vpop.f32.mrb[69].mxu1 }
 0x5ee   : > { %v2382_v24 = vadd.f32 %v2381_v13, %v5022_v60 }
 0x5ef   : > { %2664 = vst [vmem:[%s4919_s21 + $0xc0] sm:$0xff] %v2380_v6 }
 0x5f0   : > { %2665 = vst [vmem:[%s4919_s21 + $0xc8] sm:$0xff] %v2382_v24  ;;  %v2385_v14 = vpop.f32.mrb[70].mxu1 }
 0x5f1   : > { %v2386_v26 = vadd.f32 %v2385_v14, %v5019_v5  ;;  %v2387_v19 = vpop.f32.mrb[71].mxu1 }
 0x5f2   : > { %v2388_v34 = vadd.f32 %v2387_v19, %v5022_v60 }
 0x5f3   : > { %2674 = vst [vmem:[%s4919_s21 + $0x110] sm:$0xff] %v2386_v26 }
 0x5f4   : > { %2675 = vst [vmem:[%s4919_s21 + $0x118] sm:$0xff] %v2388_v34  ;;  %v2391_v44 = vpop.f32.mrb[72].mxu1 }
 0x5f5   : > { %v2392_v33 = vadd.f32 %v2391_v44, %v5019_v5  ;;  %v2393_v35 = vpop.f32.mrb[73].mxu1 }
 0x5f6   : > { %v2394_v45 = vadd.f32 %v2393_v35, %v5022_v60 }
 0x5f7   : > { %4109 = shalt.err (!%p4106_p7)
}
 0x5f8   : > { %s4110_s20 = scalar_lea.hbm %s5047_s19, 1024  ;;  %s4114_s12 = scalar_lea.hbm %s5181_s6, 8192 }
 0x5f9   : > { %p4111_p5 = scmp.ne.s32.totalorder %s5047_s19, %s4110_s20  ;;  %p4115_p3 = scmp.lt.u32.totalorder %s5047_s19, %s5181_s6 }
 0x5fa   : > { %p4116_p4 = scmp.lt.u32.totalorder %s4114_s12, %s4110_s20  ;;  %p4118_p6 = scmp.lt.u32.totalorder %s4110_s20, %s5047_s19 }
 0x5fb   : > { %p4112_p10 = pnand %p4111_p5, %p5229_p9 }
 0x5fc   : > { %p4117_p8 = por %p4116_p4, %p4115_p3 }
 0x5fd   : > { %p4113_p11 = pneg %p4112_p10 }
 0x5fe   : > { %p4119_p12 = por %p4118_p6, %p4117_p8 }
 0x600   : > { %p4120_p1 = pnand %p4119_p12, %p4113_p11 }
 0x602   : > { %4123 = shalt.err (!%p4120_p1)
}
 0x603   : > { %s4222_s10 = smov 128   ;;  %s4223_s23 = smov 8   ;;  %2684 = vst [vmem:[%s4919_s21 + $0x160] sm:$0xff] %v2392_v33  ;;  %2685 = vst [vmem:[%s4919_s21 + $0x168] sm:$0xff] %v2394_v45  ;;  %v2397_v23 = vpop.f32.mrb[74].mxu1  ;;  %v2051_v50 = vsub.s32 6, %v5228_v47 }
 0x604   : > { %3835 = dma.vmem_to_hbm [thread:$0]  (%p5229_p9), %s5039_s29, 1024, %s5047_s19, %s2721_s1, %s4222_s10, %s4222_s10, %s4223_s23   ;;  %v2398_v30 = vadd.f32 %v2397_v23, %v5019_v5  ;;  %v2399_v54 = vpop.f32.mrb[75].mxu1  ;;  %v2055_v39 = vsub.s32 7, %v5228_v47 }
 0x605   : > { %v2400_v7 = vadd.f32 %v2399_v54, %v5022_v60  ;;  %v2403_v37 = vpop.f32.mrb[76].mxu1  ;;  %v2052_v51 = vrot.slane %v4889_v16, %v2051_v50  ;;  %s3812_s29 = smul.u32 10240, %s4288_s30  ;;  %s2756_s19 = sshll.u32 %s4919_s21, 4  ;;  %s5129_s19 = int_to_ptr.vmem [resolvable:$true] %s2756_s19 }
 0x606   : > { %2694 = vst [vmem:[%s4919_s21 + $0x1b0] sm:$0xff] %v2398_v30  ;;  %v2404_v27 = vadd.f32 %v2403_v37, %v5019_v5  ;;  %v2405_v53 = vpop.f32.mrb[77].mxu1  ;;  %v2056_v56 = vrot.slane %v4889_v16, %v2055_v39  ;;  %s2726_s30 = scalar_lea.sflag [#allocation15], %s4503_s9  ;;  %s4124_s20 = scalar_lea.vmem %s5129_s19, 10240 }
 0x607   : > { %2695 = vst [vmem:[%s4919_s21 + $0x1b8] sm:$0xff] %v2400_v7  ;;  %v2406_v1 = vadd.f32 %v2405_v53, %v5022_v60  ;;  %v2409_v22 = vpop.f32.mrb[78].mxu1  ;;  %s5127_s28 = scalar_lea.hbm %s5182_s7, %s3812_s29  ;;  %p4125_p13 = scmp.ne.s32.totalorder %s5129_s19, %s4124_s20 }
 0x608   : > { %2704 = vst [vmem:[%s4919_s21 + $0x200] sm:$0xff] %v2404_v27  ;;  %v2410_v38 = vadd.f32 %v2409_v22, %v5019_v5  ;;  %v2411_v52 = vpop.f32.mrb[79].mxu1  ;;  %s4224_s8 = smov [#allocation14]  }
 0x609   : > { %2705 = vst [vmem:[%s4919_s21 + $0x208] sm:$0xff] %v2406_v1  ;;  %v2412_v3 = vadd.f32 %v2411_v52, %v5022_v60  ;;  %p4126_p0 = pnand %p4125_p13, %p5229_p9  ;;  %s4128_s15 = sshll.u32 %s4224_s8, 4  ;;  %s4129_s15 = int_to_ptr.vmem [resolvable:$false] %s4128_s15 }
 0x60a   : > { %2714 = vst [vmem:[%s4919_s21 + $0x250] sm:$0xff] %v2410_v38  ;;  %s4130_s12 = scalar_lea.vmem %s4129_s15, 20480  ;;  %p4131_p7 = scmp.lt.s32.totalorder %s5129_s19, %s4129_s15 }
 0x60b   : > { %2715 = vst [vmem:[%s4919_s21 + $0x258] sm:$0xff] %v2412_v3  ;;  %p4127_p2 = pneg %p4126_p0  ;;  %p4132_p5 = scmp.lt.s32.totalorder %s4130_s12, %s4124_s20 }
 0x60d   : > { %p4133_p10 = por %p4132_p5, %p4131_p7 }
 0x60f   : > { %p4134_p11 = pnand %p4133_p10, %p4127_p2 }
 0x624   : > { %v2480_v12 = vpop.f32.mrb[80].mxu1 }
 0x625   : > { %v2481_v32 = vadd.f32 %v2480_v12, %v2052_v51  ;;  %v2482_v46 = vpop.f32.mrb[81].mxu1 }
 0x626   : > { %v2483_v2 = vadd.f32 %v2482_v46, %v2056_v56 }
 0x627   : > { %2646 = vst [vmem:[%s4919_s21 + $0x30] sm:$0xff] %v2481_v32 }
 0x628   : > { %2647 = vst [vmem:[%s4919_s21 + $0x38] sm:$0xff] %v2483_v2  ;;  %v2486_v41 = vpop.f32.mrb[82].mxu1 }
 0x629   : > { %v2487_v57 = vadd.f32 %v2486_v41, %v2052_v51  ;;  %v2488_v28 = vpop.f32.mrb[83].mxu1 }
 0x62a   : > { %v2489_v55 = vadd.f32 %v2488_v28, %v2056_v56 }
 0x62b   : > { %2656 = vst [vmem:[%s4919_s21 + $0x80] sm:$0xff] %v2487_v57 }
 0x62c   : > { %2657 = vst [vmem:[%s4919_s21 + $0x88] sm:$0xff] %v2489_v55  ;;  %v2492_v47 = vpop.f32.mrb[84].mxu1 }
 0x62d   : > { %v2493_v48 = vadd.f32 %v2492_v47, %v2052_v51  ;;  %v2494_v16 = vpop.f32.mrb[85].mxu1 }
 0x62e   : > { %v2495_v62 = vadd.f32 %v2494_v16, %v2056_v56 }
 0x62f   : > { %2666 = vst [vmem:[%s4919_s21 + $0xd0] sm:$0xff] %v2493_v48 }
 0x630   : > { %2667 = vst [vmem:[%s4919_s21 + $0xd8] sm:$0xff] %v2495_v62  ;;  %v2498_v21 = vpop.f32.mrb[86].mxu1 }
 0x631   : > { %v2499_v18 = vadd.f32 %v2498_v21, %v2052_v51  ;;  %v2500_v29 = vpop.f32.mrb[87].mxu1 }
 0x632   : > { %v2501_v63 = vadd.f32 %v2500_v29, %v2056_v56 }
 0x633   : > { %2676 = vst [vmem:[%s4919_s21 + $0x120] sm:$0xff] %v2499_v18 }
 0x634   : > { %2677 = vst [vmem:[%s4919_s21 + $0x128] sm:$0xff] %v2501_v63  ;;  %v2504_v9 = vpop.f32.mrb[88].mxu1 }
 0x635   : > { %v2505_v8 = vadd.f32 %v2504_v9, %v2052_v51  ;;  %v2506_v49 = vpop.f32.mrb[89].mxu1 }
 0x636   : > { %v2507_v4 = vadd.f32 %v2506_v49, %v2056_v56 }
 0x637   : > { %2686 = vst [vmem:[%s4919_s21 + $0x170] sm:$0xff] %v2505_v8 }
 0x638   : > { %2687 = vst [vmem:[%s4919_s21 + $0x178] sm:$0xff] %v2507_v4  ;;  %v2510_v20 = vpop.f32.mrb[90].mxu1 }
 0x639   : > { %v2511_v59 = vadd.f32 %v2510_v20, %v2052_v51  ;;  %v2512_v42 = vpop.f32.mrb[91].mxu1 }
 0x63a   : > { %v2513_v0 = vadd.f32 %v2512_v42, %v2056_v56 }
 0x63b   : > { %2696 = vst [vmem:[%s4919_s21 + $0x1c0] sm:$0xff] %v2511_v59 }
 0x63c   : > { %2697 = vst [vmem:[%s4919_s21 + $0x1c8] sm:$0xff] %v2513_v0  ;;  %v2516_v5 = vpop.f32.mrb[92].mxu1 }
 0x63d   : > { %v2517_v60 = vadd.f32 %v2516_v5, %v2052_v51  ;;  %v2518_v61 = vpop.f32.mrb[93].mxu1 }
 0x63e   : > { %v2519_v58 = vadd.f32 %v2518_v61, %v2056_v56 }
 0x63f   : > { %2706 = vst [vmem:[%s4919_s21 + $0x210] sm:$0xff] %v2517_v60 }
 0x640   : > { %2707 = vst [vmem:[%s4919_s21 + $0x218] sm:$0xff] %v2519_v58  ;;  %v2522_v10 = vpop.f32.mrb[94].mxu1 }
 0x641   : > { %v2523_v11 = vadd.f32 %v2522_v10, %v2052_v51  ;;  %v2524_v43 = vpop.f32.mrb[95].mxu1 }
 0x642   : > { %v2525_v36 = vadd.f32 %v2524_v43, %v2056_v56 }
 0x643   : > { %2716 = vst [vmem:[%s4919_s21 + $0x260] sm:$0xff] %v2523_v11 }
 0x644   : > { %2717 = vst [vmem:[%s4919_s21 + $0x268] sm:$0xff] %v2525_v36 }
 0x664   : > { %v2617_v15 = vpop.f32.mrb[96].mxu1 }
 0x665   : > { %v2618_v40 = vadd.f32 %v2617_v15, %v4898_v25  ;;  %v2619_v17 = vpop.f32.mrb[97].mxu1 }
 0x666   : > { %v2620_v6 = vadd.f32 %v2619_v17, %v4907_v31 }
 0x667   : > { %2688 = vst [vmem:[%s4919_s21 + $0x180] sm:$0xff] %v2618_v40 }
 0x668   : > { %2689 = vst [vmem:[%s4919_s21 + $0x188] sm:$0xff] %v2620_v6  ;;  %v2623_v13 = vpop.f32.mrb[98].mxu1 }
 0x669   : > { %v2624_v24 = vadd.f32 %v2623_v13, %v4898_v25  ;;  %v2625_v14 = vpop.f32.mrb[99].mxu1 }
 0x66a   : > { %v2626_v26 = vadd.f32 %v2625_v14, %v4907_v31 }
 0x66b   : > { %2698 = vst [vmem:[%s4919_s21 + $0x1d0] sm:$0xff] %v2624_v24 }
 0x66c   : > { %2699 = vst [vmem:[%s4919_s21 + $0x1d8] sm:$0xff] %v2626_v26  ;;  %v2629_v19 = vpop.f32.mrb[100].mxu1 }
 0x66d   : > { %v2630_v34 = vadd.f32 %v2629_v19, %v4898_v25  ;;  %v2631_v44 = vpop.f32.mrb[101].mxu1 }
 0x66e   : > { %v2632_v33 = vadd.f32 %v2631_v44, %v4907_v31 }
 0x66f   : > { %2708 = vst [vmem:[%s4919_s21 + $0x220] sm:$0xff] %v2630_v34 }
 0x670   : > { %2709 = vst [vmem:[%s4919_s21 + $0x228] sm:$0xff] %v2632_v33  ;;  %v2635_v35 = vpop.f32.mrb[102].mxu1 }
 0x671   : > { %v2636_v45 = vadd.f32 %v2635_v35, %v4898_v25  ;;  %v2637_v23 = vpop.f32.mrb[103].mxu1 }
 0x672   : > { %v2638_v30 = vadd.f32 %v2637_v23, %v4907_v31 }
 0x673   : > { %2718 = vst [vmem:[%s4919_s21 + $0x270] sm:$0xff] %v2636_v45 }
 0x674   : > { %2719 = vst [vmem:[%s4919_s21 + $0x278] sm:$0xff] %v2638_v30 }
 0x675   : > { %4137 = shalt.err (!%p4134_p11)
}
 0x676   : > { %s4138_s21 = scalar_lea.hbm %s5127_s28, 10240  ;;  %s4142_s10 = scalar_lea.hbm %s5182_s7, 81920 }
 0x677   : > { %p4139_p3 = scmp.ne.s32.totalorder %s5127_s28, %s4138_s21  ;;  %p4143_p6 = scmp.lt.u32.totalorder %s5127_s28, %s5182_s7 }
 0x678   : > { %p4144_p12 = scmp.lt.u32.totalorder %s4142_s10, %s4138_s21  ;;  %p4146_p13 = scmp.lt.u32.totalorder %s4138_s21, %s5127_s28 }
 0x679   : > { %p4140_p4 = pnand %p4139_p3, %p5229_p9 }
 0x67a   : > { %p4145_p1 = por %p4144_p12, %p4143_p6 }
 0x67b   : > { %p4141_p8 = pneg %p4140_p4 }
 0x67c   : > { %p4147_p0 = por %p4146_p13, %p4145_p1 }
 0x67e   : > { %p4148_p2 = pnand %p4147_p0, %p4141_p8 }
 0x680   : > { %4151 = shalt.err (!%p4148_p2)
}
 0x681   : > { %s4225_s1 = smov 1280   ;;  %s4226_s13 = smov 80  }
 0x682   : > { %3836 = dma.vmem_to_hbm [thread:$0]  (%p5229_p9), %s5129_s19, 10240, %s5127_s28, %s2726_s30, %s4225_s1, %s4225_s1, %s4226_s13  }
 0x683 PF: > { %p3877_p7 = scmp.ge.s32.totalorder %s4206_s27, 2  ;;  %s2771_s20 = sand.u32 1, %s4194_s24  }
 0x684   : > { %p5230_p5 = scmp.ne.s32.totalorder %s5204_s17, 0  ;;  %s2772_s8 = scalar_lea.sflag [#allocation4], %s2771_s20 }
 0x686   : > { %p3860_p10 = pnand %p3877_p7, %p5230_p5 }
 0x688   : > { %4185 = dma.done.wait (!%p3860_p10), %s2772_s8, 1024  }
 0x689   : > { %4187 = vsyncadd (!%p3860_p10), %s2772_s8, 4294966272  ;;  %s2781_s15 = scalar_lea.sflag [#allocation15], %s2771_s20 }
 0x68a   : > { %4189 = dma.done.wait (!%p3860_p10), %s2781_s15, 10240  }
 0x68b   : > { %4191 = vsyncadd (!%p3860_p10), %s2781_s15, 4294957056  ;;  %p27_p9 = scmp.ge.s32.totalorder %s4427_s11, 10   ;;  %s5231_s24 = smov %s4198_s25 }
 0x68c   : > { %s5232_s25 = smov %s4202_s26  ;;  %s5233_s26 = smov %s4439_s14 }
 0x68d   : > { %s5234_s27 = smov %s4427_s11  ;;  %29 = sbr.rel (!%p27_p9) target bundleno = 12 (0xc), region = 126 }
 0x694   :  { %2786 = vsyncpa [#allocation3], 1 }
 0x695   :  { %2788 = vsyncpa [#allocation3 + $0x1], 1 }
 0x696   :  { %2789 = vsyncpa [#allocation6], 1 }
 0x697   :  { %2790 = vsyncpa [#allocation9], 1 }
 0x698   :  { %2791 = vsyncpa [#allocation12], 1 }
 0x699   :  { %2792 = vsyncpa [#allocation4], 1 }
 0x69a   :  { %2794 = vsyncpa [#allocation4 + $0x1], 1 }
 0x69b   :  { %2795 = vsyncpa [#allocation15], 1 }
 0x69c   :  { %2797 = vsyncpa [#allocation15 + $0x1], 1 }

</bundles_post_ra>
